<compile_context>
chip_gen: v6e
topology: v6e:2x2x1
jax: 0.10.0
libtpu: 0.0.40
codegen_flags: <defaults>
</compile_context>

<pallas_src>
import functools

import jax
import jax.numpy as jnp
import numpy as np
from jax.experimental import pallas as pl
from jax.experimental.pallas import tpu as pltpu

BN_EPS = 1e-5


# --------------------------------------------------------------------------- #
# Fused kernel: grid = (2, nt)  (pass axis outer, row-tile axis inner)
#   pass 0: input projection + graph conv + temporal conv; t / x_proj -> VMEM
#           scratch; BN sum / sum-of-squares accumulated in VMEM.
#   pass 1: finalize BatchNorm (training-mode batch stats), residual add, store.
# --------------------------------------------------------------------------- #
def stgp_fused_kernel(adj_ref, x_ref, w_ref, b_ref, out_ref,
                      xproj_ref, t_ref, stats_ref, *, n_nodes):
    p = pl.program_id(0)
    i = pl.program_id(1)
    tm = out_ref.shape[0]
    row0 = pl.multiple_of(i * tm, tm)

    @pl.when(p == 0)
    def _compute_pass():
        @pl.when(i == 0)
        def _():
            stats_ref[...] = jnp.zeros_like(stats_ref)

        adj = adj_ref[...]                       # (tm, N) bf16 adjacency row tile
        x_full = x_ref[...]                      # (N, F)  bf16, resident
        wp = w_ref[0]                            # (F, F)  bf16
        wg = w_ref[1]
        wt = w_ref[2]
        bp = b_ref[0:1, :]                       # (1, F)  f32
        bg = b_ref[1:2, :]
        bt = b_ref[2:3, :]

        # Graph aggregation for this row tile.
        ax = jnp.dot(adj, x_full, preferred_element_type=jnp.float32)       # (tm, F)
        deg = jnp.sum(adj, axis=1, keepdims=True, dtype=jnp.float32)        # (tm, 1)

        # Merged Wp matmul: one weight latch, M = 2*tm rows.
        #   rows [0, tm)    -> x_proj pre-bias (residual branch)
        #   rows [tm, 2*tm) -> graph-conv pre-bias term (bias distributed:
        #                      adj @ (x@Wp + bp) == (adj@x)@Wp + rowsum(adj)*bp)
        x_tile = x_ref[pl.ds(row0, tm), :]                                   # (tm, F) bf16
        lhs = jnp.concatenate([x_tile, ax.astype(jnp.bfloat16)], axis=0)     # (2tm, F)
        proj = jnp.dot(lhs, wp, preferred_element_type=jnp.float32)          # (2tm, F)
        x_proj = proj[:tm] + bp
        h = proj[tm:] + deg * bp

        g = jnp.maximum(
            jnp.dot(h.astype(jnp.bfloat16), wg,
                    preferred_element_type=jnp.float32) + bg, 0.0)
        # Temporal conv with kernel_size=1 == per-node channel matmul.
        t = jnp.dot(g.astype(jnp.bfloat16), wt,
                    preferred_element_type=jnp.float32) + bt

        xproj_ref[pl.ds(row0, tm), :] = x_proj
        t_ref[pl.ds(row0, tm), :] = t
        # BN partial statistics (accumulated in f32 across row tiles).
        stats_ref[0:1, :] += jnp.sum(t, axis=0, keepdims=True)
        stats_ref[1:2, :] += jnp.sum(t * t, axis=0, keepdims=True)

    @pl.when(p == 1)
    def _finalize_pass():
        gamma = b_ref[3:4, :]
        beta = b_ref[4:5, :]
        inv_n = 1.0 / n_nodes
        mu = stats_ref[0:1, :] * inv_n                                # E[t]
        var = jnp.maximum(stats_ref[1:2, :] * inv_n - mu * mu, 0.0)   # biased variance
        a = gamma * jax.lax.rsqrt(var + BN_EPS)                       # tile-invariant scale
        b_aff = beta - mu * a                                         # tile-invariant shift
        t = t_ref[pl.ds(row0, tm), :]
        xp = xproj_ref[pl.ds(row0, tm), :]
        out_ref[...] = t * a + b_aff + xp


# --------------------------------------------------------------------------- #
# Wrapper
# --------------------------------------------------------------------------- #
def _vmem_estimate_bytes(n, f, tm):
    return (2 * tm * n * 2        # adj row tile (bf16), double buffered
            + 2 * n * f * 2       # resident x (bf16), double buffered
            + 2 * 3 * f * f * 2   # weight slab (bf16)
            + 2 * 8 * f * 4       # bias slab (f32)
            + 2 * tm * f * 4      # output tile (f32)
            + 2 * n * f * 4       # x_proj + t VMEM scratch (f32)
            + 8 * f * 4)          # BN stats accumulator (padded)


def stgp_block(x_sel, adj, w_slab, b_slab, *, tile_m=None):
    """x_sel: (N, F) node features already gathered at the downsampled indices."""
    n, f = x_sel.shape
    assert adj.shape == (n, n)
    assert w_slab.shape == (3, f, f) and b_slab.shape == (8, f)
    assert f % 128 == 0, "feature dim kept lane-dense (multiple of 128)"
    # TODO(synk): pad N / F for arbitrary sizes; here we require clean tiling, and
    # the fused design keeps t / x_proj VMEM-resident (O(N) scratch) -- spill to a
    # two-call structure only if N grows beyond VMEM.
    budget = 40 << 20            # conservative: v7x has only 64 MiB physical VMEM
    if tile_m is None:
        tm = n
        while tm > 16 and _vmem_estimate_bytes(n, f, tm) > budget:
            tm //= 2
    else:
        tm = min(tile_m, n)
    assert n % tm == 0 and tm % 16 == 0
    nt = n // tm

    x_bf = x_sel.astype(jnp.bfloat16)
    adj_bf = adj.astype(jnp.bfloat16)          # 0/1 adjacency is exact in bf16
    w_bf = w_slab.astype(jnp.bfloat16)
    b_f32 = b_slab.astype(jnp.float32)

    vmem_limit = int(min(max(2 * _vmem_estimate_bytes(n, f, tm), 16 << 20), 48 << 20))
    cparams = pltpu.CompilerParams(
        # Both grid axes carry dependencies (stats accumulate across row tiles,
        # pass 1 consumes them), so they are "arbitrary"; at these sizes one fused
        # call beats two megacore-parallel calls.
        dimension_semantics=("arbitrary", "arbitrary"),
        vmem_limit_bytes=vmem_limit)

    cost = pl.CostEstimate(
        flops=int(2 * n * n * f + 8 * n * f * f),
        transcendentals=int(nt * f),
        bytes_accessed=int(n * n * 2 + n * f * 2 + 3 * f * f * 2 + 8 * f * 4
                           + n * f * 4))

    out = pl.pallas_call(
        functools.partial(stgp_fused_kernel, n_nodes=float(n)),
        grid=(2, nt),
        in_specs=[
            # adj row tile: tile i in pass 0; stay on the last block in pass 1
            # (no refetch, it is unused there).
            pl.BlockSpec((tm, n), lambda p, i: ((1 - p) * i + p * (nt - 1), 0)),
            pl.BlockSpec((n, f), lambda p, i: (0, 0)),           # x, resident
            pl.BlockSpec((3, f, f), lambda p, i: (0, 0, 0)),     # packed weights
            pl.BlockSpec((8, f), lambda p, i: (0, 0)),           # packed biases
        ],
        # Output is written only in pass 1; keep the block index pinned in pass 0
        # so no garbage write-back is triggered.
        out_specs=pl.BlockSpec((tm, f), lambda p, i: (i * p, 0)),
        out_shape=jax.ShapeDtypeStruct((n, f), jnp.float32),
        scratch_shapes=[
            pltpu.VMEM((n, f), jnp.float32),   # x_proj (residual), VMEM-resident
            pltpu.VMEM((n, f), jnp.float32),   # t (pre-BN), VMEM-resident
            pltpu.VMEM((2, f), jnp.float32),   # BN sum / sum-of-squares accumulator
        ],
        compiler_params=cparams,
        cost_estimate=cost,
    )(adj_bf, x_bf, w_bf, b_f32)

    return out


# --------------------------------------------------------------------------- #
# Params + references
# --------------------------------------------------------------------------- #
def _uniform(key, shape, bound):
    return jax.random.uniform(key, shape, jnp.float32, minval=-bound, maxval=bound)


def make_params(key, f):
    """PyTorch-style uniform(+/- 1/sqrt(fan_in)) init, packed into two slabs."""
    ks = jax.random.split(key, 6)
    bound = 1.0 / np.sqrt(f)
    wp = _uniform(ks[0], (f, f), bound)    # input_projection weight^T
    wg = _uniform(ks[1], (f, f), bound)    # graph_conv.fc weight^T
    wt = _uniform(ks[2], (f, f), bound)    # temporal_conv weight[:, :, 0]^T
    bp = _uniform(ks[3], (1, f), bound)
    bg = _uniform(ks[4], (1, f), bound)
    bt = _uniform(ks[5], (1, f), bound)
    gamma = jnp.ones((1, f), jnp.float32)
    beta = jnp.zeros((1, f), jnp.float32)
    w_slab = jnp.stack([wp, wg, wt], axis=0)                                # (3, F, F)
    b_slab = jnp.concatenate(
        [bp, bg, bt, gamma, beta, jnp.zeros((3, f), jnp.float32)], axis=0)  # (8, F)
    return w_slab, b_slab


def reference(x_sel, adj, w_slab, b_slab, *, match_kernel_rounding=False):
    """Module semantics in f32 (HIGHEST precision) on bf16-rounded operands.

    match_kernel_rounding=True additionally mirrors the kernel's bf16 rounding
    points and algebra (distributed bias, sum/sumsq BN) for a tight check."""
    rb = lambda a: a.astype(jnp.bfloat16).astype(jnp.float32)
    dot = functools.partial(jnp.dot, precision=jax.lax.Precision.HIGHEST)
    x, a = rb(x_sel), rb(adj)
    wp, wg, wt = rb(w_slab[0]), rb(w_slab[1]), rb(w_slab[2])
    bp, bg, bt, gamma, beta = (b_slab[k:k + 1] for k in range(5))

    x_proj = dot(x, wp) + bp
    if match_kernel_rounding:
        ax = rb(dot(a, x))
        deg = jnp.sum(a, axis=1, keepdims=True)
        h = dot(ax, wp) + deg * bp
        g = jnp.maximum(dot(rb(h), wg) + bg, 0.0)
        t = dot(rb(g), wt) + bt
        mu = jnp.mean(t, axis=0, keepdims=True)
        var = jnp.maximum(jnp.mean(t * t, axis=0, keepdims=True) - mu * mu, 0.0)
        y = gamma * (t - mu) * jax.lax.rsqrt(var + BN_EPS) + beta
    else:
        h = dot(a, x_proj)
        g = jnp.maximum(dot(h, wg) + bg, 0.0)
        t = dot(g, wt) + bt
        mu = jnp.mean(t, axis=0, keepdims=True)
        var = jnp.mean((t - mu) ** 2, axis=0, keepdims=True)
        y = gamma * (t - mu) / jnp.sqrt(var + BN_EPS) + beta
    return y + x_proj


if __name__ == "__main__":
    key = jax.random.PRNGKey(0)
    k_x, k_adj, k_p = jax.random.split(key, 3)

    n_total = 1024
    f_in = f_out = 128     # module only type-checks with in_features == out_features

    x_full = jax.random.normal(k_x, (n_total, f_in), jnp.float32)

    # TODO(synk): graph_pyramid.downsample() is a networkx op with no Pallas/TPU
    # equivalent; emulate deterministically (keep every other node) and build the
    # downsampled dense 0/1 adjacency directly.
    ds_nodes = jnp.arange(0, n_total, 2)
    n = int(ds_nodes.shape[0])                                  # 512 downsampled nodes
    upper = jnp.triu(
        (jax.random.uniform(k_adj, (n, n)) < 0.02).astype(jnp.float32), k=1)
    adj = upper + upper.T                                       # symmetric 0/1, no self-loops

    x_sel = x_full[ds_nodes]                                    # node gather = plain-JAX glue

    w_slab, b_slab = make_params(k_p, f_out)

    out = stgp_block(x_sel, adj, w_slab, b_slab)
    out = jax.block_until_ready(out)
    assert out.shape == (n, f_out)

    # 1) tight check: same math, same rounding points -> proves the Pallas impl
    ref_exact = reference(x_sel, adj, w_slab, b_slab, match_kernel_rounding=True)
    np.testing.assert_allclose(np.asarray(out), np.asarray(ref_exact),
                               rtol=2e-3, atol=2e-3)
    # 2) module-semantics check in plain f32 (bf16 operand rounding is the only
    #    shared approximation) -> proves the algorithm, tolerance loosened for bf16
    ref_module = reference(x_sel, adj, w_slab, b_slab)
    np.testing.assert_allclose(np.asarray(out), np.asarray(ref_module),
                               rtol=5e-2, atol=1e-1)

    print("KERNEL_OK")
</pallas_src>

<mosaic_0001>
module attributes {stable_mosaic.version = 11 : i64} {
  func.func @stgp_fused_kernel(%arg0: i32, %arg1: i32, %arg2: memref<512x512xbf16, #tpu.memory_space<vmem>>, %arg3: memref<512x128xbf16, #tpu.memory_space<vmem>>, %arg4: memref<3x128x128xbf16, #tpu.memory_space<vmem>>, %arg5: memref<8x128xf32, #tpu.memory_space<vmem>>, %arg6: memref<512x128xf32, #tpu.memory_space<vmem>>, %arg7: memref<512x128xf32, #tpu.memory_space<vmem>>, %arg8: memref<512x128xf32, #tpu.memory_space<vmem>>, %arg9: memref<2x128xf32, #tpu.memory_space<vmem>>) attributes {dimension_semantics = [#tpu.dimension_semantics<arbitrary>, #tpu.dimension_semantics<arbitrary>], iteration_bounds = array<i64: 2, 1>, scalar_prefetch = 0 : i64, scratch_operands = 3 : i64, tpu.core_type = #tpu.core_type<tc>, window_params = [{transform_indices = @transform_0, window_bounds = array<i64: 512, 512>}, {pipeline_mode = #tpu.pipeline_mode<synchronous>, transform_indices = @transform_1, window_bounds = array<i64: 512, 128>}, {pipeline_mode = #tpu.pipeline_mode<synchronous>, transform_indices = @transform_2, window_bounds = array<i64: 3, 128, 128>}, {pipeline_mode = #tpu.pipeline_mode<synchronous>, transform_indices = @transform_3, window_bounds = array<i64: 8, 128>}, {transform_indices = @transform_4, window_bounds = array<i64: 512, 128>}]} {
    %c512_i32 = arith.constant 512 : i32
    %0 = arith.muli %arg1, %c512_i32 : i32
    %1 = tpu.assume_multiple %0, 512 : i32
    %c0_i32 = arith.constant 0 : i32
    %2 = arith.cmpi eq, %arg0, %c0_i32 : i32
    %3 = arith.extui %2 : i1 to i32
    %c0_i32_0 = arith.constant 0 : i32
    %4 = arith.cmpi ne, %3, %c0_i32_0 : i32
    scf.if %4 {
      %c0_i32_2 = arith.constant 0 : i32
      %8 = arith.cmpi eq, %arg1, %c0_i32_2 : i32
      %9 = arith.extui %8 : i1 to i32
      %c0_i32_3 = arith.constant 0 : i32
      %10 = arith.cmpi ne, %9, %c0_i32_3 : i32
      scf.if %10 {
        %cst_38 = arith.constant 0.000000e+00 : f32
        %64 = vector.broadcast %cst_38 : f32 to vector<2x128xf32>
        %c0_39 = arith.constant 0 : index
        %c0_40 = arith.constant 0 : index
        %65 = vector.load %arg9[%c0_39, %c0_40] : memref<2x128xf32, #tpu.memory_space<vmem>>, vector<2x128xf32>
        tpu.vector_store %arg9[%c0_39, %c0_40], %64 {strides = array<i32>} : memref<2x128xf32, #tpu.memory_space<vmem>>, vector<2x128xf32>,
      } else {
      }
      %c0 = arith.constant 0 : index
      %c0_4 = arith.constant 0 : index
      %11 = vector.load %arg2[%c0, %c0_4] : memref<512x512xbf16, #tpu.memory_space<vmem>>, vector<512x512xbf16>
      %c0_5 = arith.constant 0 : index
      %c0_6 = arith.constant 0 : index
      %12 = vector.load %arg3[%c0_5, %c0_6] : memref<512x128xbf16, #tpu.memory_space<vmem>>, vector<512x128xbf16>
      %c0_7 = arith.constant 0 : index
      %c0_8 = arith.constant 0 : index
      %c0_9 = arith.constant 0 : index
      %13 = vector.load %arg4[%c0_7, %c0_8, %c0_9] : memref<3x128x128xbf16, #tpu.memory_space<vmem>>, vector<1x128x128xbf16>
      %14 = vector.shape_cast %13 : vector<1x128x128xbf16> to vector<128x128xbf16>
      %c1 = arith.constant 1 : index
      %c0_10 = arith.constant 0 : index
      %c0_11 = arith.constant 0 : index
      %15 = vector.load %arg4[%c1, %c0_10, %c0_11] : memref<3x128x128xbf16, #tpu.memory_space<vmem>>, vector<1x128x128xbf16>
      %16 = vector.shape_cast %15 : vector<1x128x128xbf16> to vector<128x128xbf16>
      %c2 = arith.constant 2 : index
      %c0_12 = arith.constant 0 : index
      %c0_13 = arith.constant 0 : index
      %17 = vector.load %arg4[%c2, %c0_12, %c0_13] : memref<3x128x128xbf16, #tpu.memory_space<vmem>>, vector<1x128x128xbf16>
      %18 = vector.shape_cast %17 : vector<1x128x128xbf16> to vector<128x128xbf16>
      %c0_14 = arith.constant 0 : index
      %c0_15 = arith.constant 0 : index
      %19 = vector.load %arg5[%c0_14, %c0_15] : memref<8x128xf32, #tpu.memory_space<vmem>>, vector<1x128xf32>
      %c1_16 = arith.constant 1 : index
      %c0_17 = arith.constant 0 : index
      %20 = vector.load %arg5[%c1_16, %c0_17] : memref<8x128xf32, #tpu.memory_space<vmem>>, vector<1x128xf32>
      %c2_18 = arith.constant 2 : index
      %c0_19 = arith.constant 0 : index
      %21 = vector.load %arg5[%c2_18, %c0_19] : memref<8x128xf32, #tpu.memory_space<vmem>>, vector<1x128xf32>
      %cst = arith.constant dense<0.000000e+00> : vector<512x128xf32>
      %22 = tpu.matmul %11, %12, %cst {dimension_numbers = #tpu.dot_dimension_numbers<[1], [0], [0], [1], [0, 0, 1, 1], [], []>} : vector<512x512xbf16>, vector<512x128xbf16>, vector<512x128xf32> -> vector<512x128xf32>
      %23 = arith.extf %11 : vector<512x512xbf16> to vector<512x512xf32>
      %cst_20 = arith.constant dense<0.000000e+00> : vector<512xf32>
      %24 = vector.multi_reduction <add>, %23, %cst_20 [1] : vector<512x512xf32> to vector<512xf32>
      %25 = vector.shape_cast %24 : vector<512xf32> to vector<512x1xf32>
      %26 = arith.index_cast %1 : i32 to index
      %c0_21 = arith.constant 0 : index
      %27 = vector.load %arg3[%26, %c0_21] : memref<512x128xbf16, #tpu.memory_space<vmem>>, vector<512x128xbf16>
      %28 = arith.truncf %22 : vector<512x128xf32> to vector<512x128xbf16>
      %29 = tpu.concatenate %27, %28 in 0 : vector<512x128xbf16>, vector<512x128xbf16> -> vector<1024x128xbf16>
      %cst_22 = arith.constant dense<0.000000e+00> : vector<1024x128xf32>
      %30 = tpu.matmul %29, %14, %cst_22 {dimension_numbers = #tpu.dot_dimension_numbers<[1], [0], [0], [1], [0, 0, 1, 1], [], []>} : vector<1024x128xbf16>, vector<128x128xbf16>, vector<1024x128xf32> -> vector<1024x128xf32>
      %31 = vector.extract_strided_slice %30 {offsets = [0, 0], sizes = [512, 128], strides = [1, 1]} : vector<1024x128xf32> to vector<512x128xf32>
      %32 = vector.broadcast %19 : vector<1x128xf32> to vector<512x128xf32>
      %33 = arith.addf %31, %32 : vector<512x128xf32>
      %34 = vector.extract_strided_slice %30 {offsets = [512, 0], sizes = [512, 128], strides = [1, 1]} : vector<1024x128xf32> to vector<512x128xf32>
      %35 = vector.broadcast %25 : vector<512x1xf32> to vector<512x128xf32>
      %36 = vector.broadcast %19 : vector<1x128xf32> to vector<512x128xf32>
      %37 = arith.mulf %35, %36 : vector<512x128xf32>
      %38 = arith.addf %34, %37 : vector<512x128xf32>
      %39 = arith.truncf %38 : vector<512x128xf32> to vector<512x128xbf16>
      %cst_23 = arith.constant dense<0.000000e+00> : vector<512x128xf32>
      %40 = tpu.matmul %39, %16, %cst_23 {dimension_numbers = #tpu.dot_dimension_numbers<[1], [0], [0], [1], [0, 0, 1, 1], [], []>} : vector<512x128xbf16>, vector<128x128xbf16>, vector<512x128xf32> -> vector<512x128xf32>
      %41 = vector.broadcast %20 : vector<1x128xf32> to vector<512x128xf32>
      %42 = arith.addf %40, %41 : vector<512x128xf32>
      %cst_24 = arith.constant 0.000000e+00 : f32
      %43 = vector.broadcast %cst_24 : f32 to vector<512x128xf32>
      %44 = arith.maximumf %42, %43 : vector<512x128xf32>
      %45 = arith.truncf %44 : vector<512x128xf32> to vector<512x128xbf16>
      %cst_25 = arith.constant dense<0.000000e+00> : vector<512x128xf32>
      %46 = tpu.matmul %45, %18, %cst_25 {dimension_numbers = #tpu.dot_dimension_numbers<[1], [0], [0], [1], [0, 0, 1, 1], [], []>} : vector<512x128xbf16>, vector<128x128xbf16>, vector<512x128xf32> -> vector<512x128xf32>
      %47 = vector.broadcast %21 : vector<1x128xf32> to vector<512x128xf32>
      %48 = arith.addf %46, %47 : vector<512x128xf32>
      %49 = arith.index_cast %1 : i32 to index
      %c0_26 = arith.constant 0 : index
      %50 = vector.load %arg7[%49, %c0_26] : memref<512x128xf32, #tpu.memory_space<vmem>>, vector<512x128xf32>
      tpu.vector_store %arg7[%49, %c0_26], %33 {strides = array<i32>} : memref<512x128xf32, #tpu.memory_space<vmem>>, vector<512x128xf32>,
      %51 = arith.index_cast %1 : i32 to index
      %c0_27 = arith.constant 0 : index
      %52 = vector.load %arg8[%51, %c0_27] : memref<512x128xf32, #tpu.memory_space<vmem>>, vector<512x128xf32>
      tpu.vector_store %arg8[%51, %c0_27], %48 {strides = array<i32>} : memref<512x128xf32, #tpu.memory_space<vmem>>, vector<512x128xf32>,
      %c0_28 = arith.constant 0 : index
      %c0_29 = arith.constant 0 : index
      %53 = vector.load %arg9[%c0_28, %c0_29] : memref<2x128xf32, #tpu.memory_space<vmem>>, vector<1x128xf32>
      %cst_30 = arith.constant dense<0.000000e+00> : vector<128xf32>
      %54 = vector.multi_reduction <add>, %48, %cst_30 [0] : vector<512x128xf32> to vector<128xf32>
      %55 = vector.shape_cast %54 : vector<128xf32> to vector<1x128xf32>
      %56 = arith.addf %53, %55 : vector<1x128xf32>
      %c0_31 = arith.constant 0 : index
      %c0_32 = arith.constant 0 : index
      %57 = vector.load %arg9[%c0_31, %c0_32] : memref<2x128xf32, #tpu.memory_space<vmem>>, vector<1x128xf32>
      tpu.vector_store %arg9[%c0_31, %c0_32], %56 {strides = array<i32>} : memref<2x128xf32, #tpu.memory_space<vmem>>, vector<1x128xf32>,
      %c1_33 = arith.constant 1 : index
      %c0_34 = arith.constant 0 : index
      %58 = vector.load %arg9[%c1_33, %c0_34] : memref<2x128xf32, #tpu.memory_space<vmem>>, vector<1x128xf32>
      %59 = arith.mulf %48, %48 : vector<512x128xf32>
      %cst_35 = arith.constant dense<0.000000e+00> : vector<128xf32>
      %60 = vector.multi_reduction <add>, %59, %cst_35 [0] : vector<512x128xf32> to vector<128xf32>
      %61 = vector.shape_cast %60 : vector<128xf32> to vector<1x128xf32>
      %62 = arith.addf %58, %61 : vector<1x128xf32>
      %c1_36 = arith.constant 1 : index
      %c0_37 = arith.constant 0 : index
      %63 = vector.load %arg9[%c1_36, %c0_37] : memref<2x128xf32, #tpu.memory_space<vmem>>, vector<1x128xf32>
      tpu.vector_store %arg9[%c1_36, %c0_37], %62 {strides = array<i32>} : memref<2x128xf32, #tpu.memory_space<vmem>>, vector<1x128xf32>,
    } else {
    }
    %c1_i32 = arith.constant 1 : i32
    %5 = arith.cmpi eq, %arg0, %c1_i32 : i32
    %6 = arith.extui %5 : i1 to i32
    %c0_i32_1 = arith.constant 0 : i32
    %7 = arith.cmpi ne, %6, %c0_i32_1 : i32
    scf.if %7 {
      %c3 = arith.constant 3 : index
      %c0 = arith.constant 0 : index
      %8 = vector.load %arg5[%c3, %c0] : memref<8x128xf32, #tpu.memory_space<vmem>>, vector<1x128xf32>
      %c4 = arith.constant 4 : index
      %c0_2 = arith.constant 0 : index
      %9 = vector.load %arg5[%c4, %c0_2] : memref<8x128xf32, #tpu.memory_space<vmem>>, vector<1x128xf32>
      %c0_3 = arith.constant 0 : index
      %c0_4 = arith.constant 0 : index
      %10 = vector.load %arg9[%c0_3, %c0_4] : memref<2x128xf32, #tpu.memory_space<vmem>>, vector<1x128xf32>
      %cst = arith.constant 0.001953125 : f32
      %11 = vector.broadcast %cst : f32 to vector<1x128xf32>
      %12 = arith.mulf %10, %11 : vector<1x128xf32>
      %c1 = arith.constant 1 : index
      %c0_5 = arith.constant 0 : index
      %13 = vector.load %arg9[%c1, %c0_5] : memref<2x128xf32, #tpu.memory_space<vmem>>, vector<1x128xf32>
      %cst_6 = arith.constant 0.001953125 : f32
      %14 = vector.broadcast %cst_6 : f32 to vector<1x128xf32>
      %15 = arith.mulf %13, %14 : vector<1x128xf32>
      %16 = arith.mulf %12, %12 : vector<1x128xf32>
      %17 = arith.subf %15, %16 : vector<1x128xf32>
      %cst_7 = arith.constant 0.000000e+00 : f32
      %18 = vector.broadcast %cst_7 : f32 to vector<1x128xf32>
      %19 = arith.maximumf %17, %18 : vector<1x128xf32>
      %cst_8 = arith.constant 9.99999974E-6 : f32
      %20 = vector.broadcast %cst_8 : f32 to vector<1x128xf32>
      %21 = arith.addf %19, %20 : vector<1x128xf32>
      %22 = math.rsqrt %21 : vector<1x128xf32>
      %23 = arith.mulf %8, %22 : vector<1x128xf32>
      %24 = arith.mulf %12, %23 : vector<1x128xf32>
      %25 = arith.subf %9, %24 : vector<1x128xf32>
      %26 = arith.index_cast %1 : i32 to index
      %c0_9 = arith.constant 0 : index
      %27 = vector.load %arg8[%26, %c0_9] : memref<512x128xf32, #tpu.memory_space<vmem>>, vector<512x128xf32>
      %28 = arith.index_cast %1 : i32 to index
      %c0_10 = arith.constant 0 : index
      %29 = vector.load %arg7[%28, %c0_10] : memref<512x128xf32, #tpu.memory_space<vmem>>, vector<512x128xf32>
      %30 = vector.broadcast %23 : vector<1x128xf32> to vector<512x128xf32>
      %31 = arith.mulf %27, %30 : vector<512x128xf32>
      %32 = vector.broadcast %25 : vector<1x128xf32> to vector<512x128xf32>
      %33 = arith.addf %31, %32 : vector<512x128xf32>
      %34 = arith.addf %33, %29 : vector<512x128xf32>
      %c0_11 = arith.constant 0 : index
      %c0_12 = arith.constant 0 : index
      %35 = vector.load %arg6[%c0_11, %c0_12] : memref<512x128xf32, #tpu.memory_space<vmem>>, vector<512x128xf32>
      tpu.vector_store %arg6[%c0_11, %c0_12], %34 {strides = array<i32>} : memref<512x128xf32, #tpu.memory_space<vmem>>, vector<512x128xf32>,
    } else {
    }
    return
  }
  func.func @transform_0(%arg0: i32, %arg1: i32) -> (i32, i32) {
    %c1_i32 = arith.constant 1 : i32
    %0 = arith.subi %c1_i32, %arg0 : i32
    %1 = arith.muli %0, %arg1 : i32
    %c0_i32 = arith.constant 0 : i32
    %2 = arith.muli %arg0, %c0_i32 : i32
    %3 = arith.addi %1, %2 : i32
    %c0_i32_0 = arith.constant 0 : i32
    %c0_i32_1 = arith.constant 0 : i32
    return %3, %c0_i32_0 : i32, i32
  }
  func.func @transform_1(%arg0: i32, %arg1: i32) -> (i32, i32) {
    %c0_i32 = arith.constant 0 : i32
    %c0_i32_0 = arith.constant 0 : i32
    %c0_i32_1 = arith.constant 0 : i32
    return %c0_i32, %c0_i32_0 : i32, i32
  }
  func.func @transform_2(%arg0: i32, %arg1: i32) -> (i32, i32, i32) {
    %c0_i32 = arith.constant 0 : i32
    %c0_i32_0 = arith.constant 0 : i32
    %c0_i32_1 = arith.constant 0 : i32
    %c0_i32_2 = arith.constant 0 : i32
    return %c0_i32, %c0_i32_0, %c0_i32_1 : i32, i32, i32
  }
  func.func @transform_3(%arg0: i32, %arg1: i32) -> (i32, i32) {
    %c0_i32 = arith.constant 0 : i32
    %c0_i32_0 = arith.constant 0 : i32
    %c0_i32_1 = arith.constant 0 : i32
    return %c0_i32, %c0_i32_0 : i32, i32
  }
  func.func @transform_4(%arg0: i32, %arg1: i32) -> (i32, i32) {
    %0 = arith.muli %arg1, %arg0 : i32
    %c0_i32 = arith.constant 0 : i32
    %c0_i32_0 = arith.constant 0 : i32
    return %0, %c0_i32 : i32, i32
  }
}

</mosaic_0001>

<bundles_post_ra>
// kernel: tpu_custom_call.1
= control target key start
LH: loop header
LB: loop body
LE: loop exit
PB: predicated region body
PF: predicated region fallthrough
CT: control target
= control target key end

     0   :  { %9 = vsyncpa [#allocation6], 0  ;;  %s7602_s0 = inlined_call_operand.hbm [shape: bf16[512,512], index: 0, kind: input, shape index: {}]   ;;  %s7603_s1 = inlined_call_operand.hbm [shape: bf16[512,128], index: 1, kind: input, shape index: {}]   ;;  %s7604_s2 = inlined_call_operand.hbm [shape: bf16[3,128,128], index: 2, kind: input, shape index: {}]   ;;  %s7605_s3 = inlined_call_operand.hbm [shape: f32[8,128], index: 3, kind: input, shape index: {}]   ;;  %s7606_s4 = inlined_call_operand.hbm [shape: f32[512,128], index: 4, kind: output, shape index: {}]  }
   0x1   :  { %11 = vsyncpa [#allocation6 + $0x1], 0 }
   0x2   :  { %12 = vsyncpa [#allocation9], 0 }
   0x3   :  { %13 = vsyncpa [#allocation12], 0 }
   0x4   :  { %14 = vsyncpa [#allocation7], 0 }
   0x5   :  { %16 = vsyncpa [#allocation7 + $0x1], 0  ;;  %s6636_s15 = smov 0   ;;  %s6638_s16 = smov 0  }
   0x6   :  { %s6640_s17 = smov 0  }
   0x7 LB: > { %s5302_s18 = sadd.s32 4294967295, %s6596_s17   ;;  %s5303_s19 = sadd.s32 4294967294, %s6596_s17   ;;  %s6596_s17 = sphi %s6640_s17, %s22_s17   ;;  %s6592_s16 = sphi %s6638_s16, %s7675_s16   ;;  %s6588_s15 = sphi %s6636_s15, %s7674_s15  }
   0x8   : > { %s34_s20 = sadd.s32 1, %s6592_s16  ;;  %p5304_p0 = scmp.ge.s32.totalorder %s6596_s17, 1 }
   0x9   : > { %p36_p1 = scmp.ge.s32.totalorder %s34_s20, 2  ;;  %p160_p2 = scmp.lt.s32.totalorder %s6596_s17, 3 }
   0xa   : > { %p6658_p3 = scmp.eq.s32.totalorder %s5302_s18, 0  ;;  %s6598_s23 = smov [#allocation8]  }
   0xb   : > { %s7677_s20 = smov (%p36_p1, %s34_s20), 0  ;;  %p6664_p4 = pnand %p5304_p0, %p160_p2 }
   0xc   : > { %s172_s24 = sshll.u32 %s6598_s23, 4  ;;  %s6599_s26 = smov [#allocation10]   ;;  %s173_s24 = int_to_ptr.vmem [resolvable:$true] %s172_s24 }
   0xd   : > { %p6016_p5 = pneg %p6664_p4  ;;  %s185_s27 = sshll.u32 %s6599_s26, 4  ;;  %s186_s27 = int_to_ptr.vmem [resolvable:$true] %s185_s27 }
   0xe   : > { %s6441_s28 = scalar_lea.vmem %s173_s24, 4096  ;;  %p6449_p12 = scmp.lt.s32.totalorder %s173_s24, %s173_s24 }
   0xf   : > { %p6673_p7 = pnand %p6658_p3, %p6016_p5  ;;  %p6442_p9 = scmp.ne.s32.totalorder %s173_s24, %s6441_s28 }
  0x10   : > { %p6450_p13 = scmp.lt.s32.totalorder %s6441_s28, %s6441_s28 }
  0x11   : > { %p6432_p8 = pneg %p6673_p7 }
  0x12   : > { %p6451_p0 = por %p6450_p13, %p6449_p12 }
  0x13   : > { %p6444_p10 = pnand %p6442_p9, %p6432_p8 }
  0x15   : > { %p6445_p11 = pneg %p6444_p10 }
  0x17   : > { %p6452_p1 = pnand %p6451_p0, %p6445_p11 }
  0x19   : > { %6455 = shalt.err (!%p6452_p1)
}
  0x1a   : > { %s6600_s29 = smov 64   ;;  %s6601_s30 = smov 4  }
  0x1b   : > { %6019 = dma.hbm_to_vmem [thread:$0]  (!%p6673_p7), %s7603_s1, 4096, %s173_s24, [#allocation9], %s6600_s29, %s6600_s29, %s6601_s30  }
  0x1c   : > { %s6602_s7 = smov [#allocation11]   ;;  %s6467_s9 = scalar_lea.vmem %s186_s27, 3072 }
  0x1d   : > { %s199_s8 = sshll.u32 %s6602_s7, 4  ;;  %p6468_p2 = scmp.ne.s32.totalorder %s186_s27, %s6467_s9  ;;  %s200_s8 = int_to_ptr.vmem [resolvable:$true] %s199_s8 }
  0x1e   : > { %p6475_p10 = scmp.lt.s32.totalorder %s186_s27, %s186_s27  ;;  %p6476_p11 = scmp.lt.s32.totalorder %s6467_s9, %s6467_s9 }
  0x1f   : > { %p6470_p5 = pnand %p6468_p2, %p6432_p8 }
  0x20   : > { %p6477_p12 = por %p6476_p11, %p6475_p10 }
  0x21   : > { %p6471_p9 = pneg %p6470_p5 }
  0x23   : > { %p6478_p13 = pnand %p6477_p12, %p6471_p9 }
  0x25   : > { %6481 = shalt.err (!%p6478_p13)
}
  0x26   : > { %6022 = dma.hbm_to_vmem [thread:$0]  (!%p6673_p7), %s7604_s2, 3072, %s186_s27, [#allocation9], %s6600_s29, %s6600_s29, %s6601_s30  }
  0x27   : > { %p6037_p0 = scmp.lt.s32.totalorder %s6596_s17, 2  ;;  %s6493_s12 = scalar_lea.vmem %s200_s8, 128 }
  0x28   : > { %p6494_p1 = scmp.ne.s32.totalorder %s200_s8, %s6493_s12  ;;  %p6501_p6 = scmp.lt.s32.totalorder %s200_s8, %s200_s8 }
  0x29   : > { %p6502_p10 = scmp.lt.s32.totalorder %s6493_s12, %s6493_s12 }
  0x2a   : > { %p6496_p2 = pnand %p6494_p1, %p6432_p8 }
  0x2b   : > { %p6503_p9 = por %p6502_p10, %p6501_p6 }
  0x2c   : > { %p6497_p5 = pneg %p6496_p2 }
  0x2e   : > { %p6504_p11 = pnand %p6503_p9, %p6497_p5 }
  0x30   : > { %6507 = shalt.err (!%p6504_p11)
}
  0x31   : > { %6025 = dma.hbm_to_vmem [thread:$0]  (!%p6673_p7), %s7605_s3, 128, %s200_s8, [#allocation12]  }
  0x32   : > { %p6038_p12 = scmp.eq.s32.totalorder %s6596_s17, 0  ;;  %s6603_s23 = smov [#allocation5]  }
  0x33   : > { %s224_s24 = sshll.u32 %s6603_s23, 4  ;;  %s225_s24 = int_to_ptr.vmem [resolvable:$true] %s224_s24 }
  0x34   : > { %p6707_p8 = pnand %p6038_p12, %p6037_p0  ;;  %s6519_s27 = scalar_lea.vmem %s225_s24, 16384 }
  0x35   : > { %p6520_p13 = scmp.ne.s32.totalorder %s225_s24, %s6519_s27  ;;  %s6526_s25 = scalar_lea.vmem %s225_s24, 32768 }
  0x36   : > { %p6510_p6 = pneg %p6707_p8  ;;  %p6527_p5 = scmp.lt.s32.totalorder %s225_s24, %s225_s24 }
  0x37   : > { %p6528_p10 = scmp.lt.s32.totalorder %s6526_s25, %s6519_s27 }
  0x38   : > { %p6522_p1 = pnand %p6520_p13, %p6510_p6 }
  0x39   : > { %p6529_p7 = por %p6528_p10, %p6527_p5 }
  0x3a   : > { %p6523_p2 = pneg %p6522_p1 }
  0x3c   : > { %p6530_p9 = pnand %p6529_p7, %p6523_p2 }
  0x3e   : > { %6533 = shalt.err (!%p6530_p9)
}
  0x3f   : > { %s6604_s28 = smov 256   ;;  %s6605_s29 = smov 16  }
  0x40   : > { %6029 = dma.hbm_to_vmem [thread:$0]  (!%p6707_p8), %s7602_s0, 16384, %s225_s24, [#allocation6], %s6604_s28, %s6604_s28, %s6605_s29  }
  0x41   : > { %236 = sbr.rel (%p6664_p4) target bundleno = 1394 (0x572), region = 36 }
  0x46   : > { %6571 = dma.done.wait (%p6658_p3), [#allocation6], 16384  }
  0x47   : > { %6573 = vsyncadd (%p6658_p3), [#allocation6], 4294950912 }
  0x48   : > { %6575 = dma.done.wait (%p6658_p3), [#allocation9], 7168  }
  0x49   : > { %6577 = vsyncadd (%p6658_p3), [#allocation9], 4294960128 }
  0x4a   : > { %6579 = dma.done.wait (%p6658_p3), [#allocation12], 128  }
  0x4b   : > { %6581 = vsyncadd (%p6658_p3), [#allocation12], 4294967168  ;;  %p5315_p4 = scmp.ne.s32.totalorder %s6588_s15, 0 }
  0x4d   : > { %289 = sbr.rel (%p5315_p4) target bundleno = 1285 (0x505), region = 56 }
  0x52   : > { %v6083_v0 = vld [vmem:[#allocation8 + $0x38] sm:$0xff]   ;;  %v6606_v1 = vmov 0   ;;  %v6085_v3 = vld [vmem:[#allocation8 + $0x30] sm:$0xff]   ;;  %v6087_v5 = vld [vmem:[#allocation8 + $0x28] sm:$0xff]  }
  0x53   : > { %1372 = vmatprep.subr.bf16.mxu0 %v6606_v1  ;;  %1661 = vmatprep.subr.bf16.mxu1 %v6606_v1  ;;  %v6084_v2 = vld [vmem:[#allocation8 + $0xb8] sm:$0xff]   ;;  %v6086_v4 = vld [vmem:[#allocation8 + $0xb0] sm:$0xff]   ;;  %v6088_v6 = vld [vmem:[#allocation8 + $0xa8] sm:$0xff]  }
  0x54   : > { %1373 = vmatpush1.bf16.msra.mxu0 %v6083_v0  ;;  %1662 = vmatpush1.bf16.msra.mxu1 %v6084_v2  ;;  %v6089_v7 = vld [vmem:[#allocation8 + $0x20] sm:$0xff]   ;;  %v6091_v9 = vld [vmem:[#allocation8 + $0x18] sm:$0xff]   ;;  %v6093_v11 = vld [vmem:[#allocation8 + $0x10] sm:$0xff]  }
  0x55   : > { %1374 = vmatprep.subr.bf16.mxu0 %v6606_v1  ;;  %1663 = vmatprep.subr.bf16.mxu1 %v6606_v1  ;;  %v6090_v8 = vld [vmem:[#allocation8 + $0xa0] sm:$0xff]   ;;  %v6092_v10 = vld [vmem:[#allocation8 + $0x98] sm:$0xff]   ;;  %v6094_v12 = vld [vmem:[#allocation8 + $0x90] sm:$0xff]  }
  0x56   : > { %v6095_v13 = vld [vmem:[#allocation8 + $0x8] sm:$0xff]   ;;  %v6097_v15 = vld [vmem:[#allocation8] sm:$0xff]   ;;  %v6099_v17 = vld [vmem:[#allocation8 + $0x78] sm:$0xff]  }
  0x57   : > { %v6096_v14 = vld [vmem:[#allocation8 + $0x88] sm:$0xff]   ;;  %v6098_v16 = vld [vmem:[#allocation8 + $0x80] sm:$0xff]   ;;  %v6100_v18 = vld [vmem:[#allocation8 + $0xf8] sm:$0xff]  }
  0x58   : > { %1375 = vmatpush1.bf16.msra.mxu0 %v6085_v3  ;;  %1664 = vmatpush1.bf16.msra.mxu1 %v6086_v4  ;;  %v6751_v19 = vld [vmem:[#allocation5] sm:$0xff]  ;;  %v297_v20 = vld [vmem:[#allocation5 + $0x10] sm:$0xff]  ;;  %v296_v21 = vld [vmem:[#allocation5 + $0x8] sm:$0xff] }
  0x59   : > { %1376 = vmatprep.subr.bf16.mxu0 %v6606_v1  ;;  %1665 = vmatprep.subr.bf16.mxu1 %v6606_v1  ;;  %v5317_v22 = vcombine.high %v6751_v19, %v297_v20  ;;  %v298_v23 = vld [vmem:[#allocation5 + $0x18] sm:$0xff]  ;;  %v6101_v24 = vld [vmem:[#allocation8 + $0x70] sm:$0xff]   ;;  %v6103_v27 = vld [vmem:[#allocation8 + $0x68] sm:$0xff]   ;;  %v5316_v44 = vcombine.low %v6751_v19, %v297_v20 }
  0x5a   : > { %v5319_v25 = vcombine.high %v296_v21, %v298_v23  ;;  %v6102_v26 = vld [vmem:[#allocation8 + $0xf0] sm:$0xff]   ;;  %v6104_v28 = vld [vmem:[#allocation8 + $0xe8] sm:$0xff]   ;;  %v6105_v29 = vld [vmem:[#allocation8 + $0x60] sm:$0xff]   ;;  %v5318_v45 = vcombine.low %v296_v21, %v298_v23 }
  0x5b   : > { %1404 = vmatprep.mubr.bf16.mxu0 %v5317_v22  ;;  %v6106_v30 = vld [vmem:[#allocation8 + $0xe0] sm:$0xff]   ;;  %v6107_v31 = vld [vmem:[#allocation8 + $0x58] sm:$0xff]   ;;  %v6109_v33 = vld [vmem:[#allocation8 + $0x50] sm:$0xff]  }
  0x5c   : > { %1377 = vmatpush1.bf16.msra.mxu0 %v6087_v5  ;;  %1666 = vmatpush1.bf16.msra.mxu1 %v6088_v6  ;;  %v6108_v32 = vld [vmem:[#allocation8 + $0xd8] sm:$0xff]   ;;  %v6110_v34 = vld [vmem:[#allocation8 + $0xd0] sm:$0xff]   ;;  %v6111_v35 = vld [vmem:[#allocation8 + $0x48] sm:$0xff]  }
  0x5d   : > { %1378 = vmatprep.subr.bf16.mxu0 %v6606_v1  ;;  %1667 = vmatprep.subr.bf16.mxu1 %v6606_v1  ;;  %v6112_v36 = vld [vmem:[#allocation8 + $0xc8] sm:$0xff]   ;;  %v6113_v37 = vld [vmem:[#allocation8 + $0x40] sm:$0xff]   ;;  %v6119_v39 = vld [vmem:[#allocation10 + $0x38] sm:$0xff]  }
  0x5e   : > { %1693 = vmatprep.mubr.bf16.mxu1 %v5319_v25  ;;  %v6114_v38 = vld [vmem:[#allocation8 + $0xc0] sm:$0xff]   ;;  %v301_v41 = vld [vmem:[#allocation5 + $0x30] sm:$0xff]  ;;  %v300_v42 = vld [vmem:[#allocation5 + $0x28] sm:$0xff] }
  0x5f   : > { %v299_v40 = vld [vmem:[#allocation5 + $0x20] sm:$0xff]  ;;  %v302_v43 = vld [vmem:[#allocation5 + $0x38] sm:$0xff]  ;;  %v6136_v46 = vld [vmem:[#allocation10 + $0x30] sm:$0xff]  }
  0x60   : > { %1379 = vmatpush1.bf16.msra.mxu0 %v6089_v7  ;;  %1668 = vmatpush1.bf16.msra.mxu1 %v6090_v8  ;;  %v5321_v47 = vcombine.high %v299_v40, %v301_v41  ;;  %v5323_v48 = vcombine.high %v300_v42, %v302_v43  ;;  %v303_v49 = vld [vmem:[#allocation5 + $0x40] sm:$0xff]  ;;  %v305_v50 = vld [vmem:[#allocation5 + $0x50] sm:$0xff]  ;;  %v304_v51 = vld [vmem:[#allocation5 + $0x48] sm:$0xff]  ;;  %v5320_v54 = vcombine.low %v299_v40, %v301_v41 }
  0x61   : > { %1380 = vmatprep.subr.bf16.mxu0 %v6606_v1  ;;  %1669 = vmatprep.subr.bf16.mxu1 %v6606_v1  ;;  %v306_v52 = vld [vmem:[#allocation5 + $0x58] sm:$0xff]  ;;  %v6153_v53 = vld [vmem:[#allocation10 + $0x28] sm:$0xff]   ;;  %v5322_v55 = vcombine.low %v300_v42, %v302_v43  ;;  %v5325_v56 = vcombine.high %v303_v49, %v305_v50  ;;  %v6170_v57 = vld [vmem:[#allocation10 + $0x20] sm:$0xff]   ;;  %v5324_v0 = vcombine.low %v303_v49, %v305_v50 }
  0x62   : > { %v5327_v58 = vcombine.high %v304_v51, %v306_v52  ;;  %v307_v59 = vld [vmem:[#allocation5 + $0x60] sm:$0xff]  ;;  %v309_v60 = vld [vmem:[#allocation5 + $0x70] sm:$0xff]  ;;  %v308_v61 = vld [vmem:[#allocation5 + $0x68] sm:$0xff] }
  0x63   : > { %v310_v62 = vld [vmem:[#allocation5 + $0x78] sm:$0xff]  ;;  %v5329_v2 = vcombine.high %v307_v59, %v309_v60  ;;  %v311_v4 = vld [vmem:[#allocation5 + $0x80] sm:$0xff]  ;;  %v313_v5 = vld [vmem:[#allocation5 + $0x90] sm:$0xff]  ;;  %v5328_v8 = vcombine.low %v307_v59, %v309_v60 }
  0x64   : > { %1381 = vmatpush1.bf16.msra.mxu0 %v6091_v9  ;;  %1670 = vmatpush1.bf16.msra.mxu1 %v6092_v10  ;;  %v6187_v63 = vld [vmem:[#allocation10 + $0x18] sm:$0xff]   ;;  %v5331_v3 = vcombine.high %v308_v61, %v310_v62  ;;  %v312_v6 = vld [vmem:[#allocation5 + $0x88] sm:$0xff]  ;;  %v5330_v9 = vcombine.low %v308_v61, %v310_v62  ;;  %v5333_v10 = vcombine.high %v311_v4, %v313_v5  ;;  %v319_v20 = vld [vmem:[#allocation5 + $0xc0] sm:$0xff] }
  0x65   : > { %1382 = vmatprep.subr.bf16.mxu0 %v6606_v1  ;;  %1671 = vmatprep.subr.bf16.mxu1 %v6606_v1  ;;  %v314_v7 = vld [vmem:[#allocation5 + $0x98] sm:$0xff]  ;;  %v6204_v21 = vld [vmem:[#allocation10 + $0x10] sm:$0xff]   ;;  %v320_v23 = vld [vmem:[#allocation5 + $0xc8] sm:$0xff] }
  0x66   : > { %v321_v22 = vld [vmem:[#allocation5 + $0xd0] sm:$0xff]  ;;  %v330_v40 = vld [vmem:[#allocation5 + $0x118] sm:$0xff]  ;;  %v339_v62 = vld [vmem:[#allocation5 + $0x160] sm:$0xff] }
  0x68   : > { %1383 = vmatpush1.bf16.msra.mxu0 %v6093_v11  ;;  %1672 = vmatpush1.bf16.msra.mxu1 %v6094_v12  ;;  %v5335_v11 = vcombine.high %v312_v6, %v314_v7  ;;  %v315_v12 = vld [vmem:[#allocation5 + $0xa0] sm:$0xff] }
  0x69   : > { %1384 = vmatprep.subr.bf16.mxu0 %v6606_v1  ;;  %1673 = vmatprep.subr.bf16.mxu1 %v6606_v1 }
  0x6c   : > { %1385 = vmatpush1.bf16.msra.mxu0 %v6095_v13  ;;  %1674 = vmatpush1.bf16.msra.mxu1 %v6096_v14  ;;  %v317_v13 = vld [vmem:[#allocation5 + $0xb0] sm:$0xff]  ;;  %v316_v14 = vld [vmem:[#allocation5 + $0xa8] sm:$0xff] }
  0x6d   : > { %1386 = vmatprep.subr.bf16.mxu0 %v6606_v1  ;;  %1675 = vmatprep.subr.bf16.mxu1 %v6606_v1  ;;  %v5336_v25 = vcombine.low %v315_v12, %v317_v13 }
  0x70   : > { %1387 = vmatpush1.bf16.msra.mxu0 %v6097_v15  ;;  %1676 = vmatpush1.bf16.msra.mxu1 %v6098_v16  ;;  %v318_v15 = vld [vmem:[#allocation5 + $0xb8] sm:$0xff]  ;;  %v5332_v16 = vcombine.low %v311_v4, %v313_v5 }
  0x71   : > { %1388 = vmatprep.subr.bf16.mxu0 %v6606_v1  ;;  %1677 = vmatprep.subr.bf16.mxu1 %v6606_v1  ;;  %v5339_v19 = vcombine.high %v316_v14, %v318_v15 }
  0x74   : > { %1389 = vmatpush2.bf16.msra.mxu0 %v6099_v17  ;;  %1678 = vmatpush2.bf16.msra.mxu1 %v6100_v18  ;;  %v5334_v17 = vcombine.low %v312_v6, %v314_v7  ;;  %v5337_v18 = vcombine.high %v315_v12, %v317_v13  ;;  %v343_v6 = vld [vmem:[#allocation5 + $0x180] sm:$0xff]  ;;  %v345_v7 = vld [vmem:[#allocation5 + $0x190] sm:$0xff] }
  0x75   : > { %1390 = vmatprep.subr.bf16.mxu0 %v6606_v1  ;;  %1679 = vmatprep.subr.bf16.mxu1 %v6606_v1  ;;  %v5365_v12 = vcombine.high %v343_v6, %v345_v7 }
  0x78   : > { %1391 = vmatpush2.bf16.msra.mxu0 %v6101_v24  ;;  %1680 = vmatpush2.bf16.msra.mxu1 %v6102_v26  ;;  %v322_v24 = vld [vmem:[#allocation5 + $0xd8] sm:$0xff]  ;;  %v5338_v26 = vcombine.low %v316_v14, %v318_v15  ;;  %v347_v14 = vld [vmem:[#allocation5 + $0x1a0] sm:$0xff]  ;;  %v349_v15 = vld [vmem:[#allocation5 + $0x1b0] sm:$0xff] }
  0x79   : > { %1392 = vmatprep.subr.bf16.mxu0 %v6606_v1  ;;  %1681 = vmatprep.subr.bf16.mxu1 %v6606_v1 }
  0x7c   : > { %1393 = vmatpush2.bf16.msra.mxu0 %v6103_v27  ;;  %1682 = vmatpush2.bf16.msra.mxu1 %v6104_v28  ;;  %v5341_v27 = vcombine.high %v319_v20, %v321_v22  ;;  %v5343_v28 = vcombine.high %v320_v23, %v322_v24 }
  0x7d   : > { %1394 = vmatprep.subr.bf16.mxu0 %v6606_v1  ;;  %1683 = vmatprep.subr.bf16.mxu1 %v6606_v1 }
  0x80   : > { %1395 = vmatpush2.bf16.msra.mxu0 %v6105_v29  ;;  %1684 = vmatpush2.bf16.msra.mxu1 %v6106_v30  ;;  %v323_v29 = vld [vmem:[#allocation5 + $0xe0] sm:$0xff]  ;;  %v325_v30 = vld [vmem:[#allocation5 + $0xf0] sm:$0xff] }
  0x81   : > { %1396 = vmatprep.subr.bf16.mxu0 %v6606_v1  ;;  %1685 = vmatprep.subr.bf16.mxu1 %v6606_v1  ;;  %v5344_v41 = vcombine.low %v323_v29, %v325_v30 }
  0x84   : > { %1397 = vmatpush2.bf16.msra.mxu0 %v6107_v31  ;;  %1686 = vmatpush2.bf16.msra.mxu1 %v6108_v32  ;;  %v324_v31 = vld [vmem:[#allocation5 + $0xe8] sm:$0xff]  ;;  %v326_v32 = vld [vmem:[#allocation5 + $0xf8] sm:$0xff] }
  0x85   : > { %1398 = vmatprep.subr.bf16.mxu0 %v6606_v1  ;;  %1687 = vmatprep.subr.bf16.mxu1 %v6606_v1  ;;  %v5346_v42 = vcombine.low %v324_v31, %v326_v32 }
  0x88   : > { %1399 = vmatpush2.bf16.msra.mxu0 %v6109_v33  ;;  %1688 = vmatpush2.bf16.msra.mxu1 %v6110_v34  ;;  %v5340_v33 = vcombine.low %v319_v20, %v321_v22  ;;  %v5342_v34 = vcombine.low %v320_v23, %v322_v24  ;;  %v5369_v20 = vcombine.high %v347_v14, %v349_v15  ;;  %v351_v22 = vld [vmem:[#allocation5 + $0x1c0] sm:$0xff]  ;;  %v353_v23 = vld [vmem:[#allocation5 + $0x1d0] sm:$0xff] }
  0x89   : > { %1400 = vmatprep.subr.bf16.mxu0 %v6606_v1  ;;  %1689 = vmatprep.subr.bf16.mxu1 %v6606_v1  ;;  %v6238_v24 = vld [vmem:[#allocation10] sm:$0xff]  }
  0x8c   : > { %1401 = vmatpush2.bf16.msra.mxu0 %v6111_v35  ;;  %1690 = vmatpush2.bf16.msra.mxu1 %v6112_v36  ;;  %v5345_v35 = vcombine.high %v323_v29, %v325_v30  ;;  %v5347_v36 = vcombine.high %v324_v31, %v326_v32  ;;  %v5373_v29 = vcombine.high %v351_v22, %v353_v23  ;;  %v355_v31 = vld [vmem:[#allocation5 + $0x1e0] sm:$0xff]  ;;  %v357_v32 = vld [vmem:[#allocation5 + $0x1f0] sm:$0xff] }
  0x8d   : > { %1402 = vmatprep.subr.bf16.mxu0 %v6606_v1  ;;  %1691 = vmatprep.subr.bf16.mxu1 %v6606_v1  ;;  %v5326_v1 = vcombine.low %v304_v51, %v306_v52 }
  0x90   : > { %1403 = vmatpush2.bf16.msra.mxu0 %v6113_v37  ;;  %1692 = vmatpush2.bf16.msra.mxu1 %v6114_v38  ;;  %v327_v37 = vld [vmem:[#allocation5 + $0x100] sm:$0xff]  ;;  %v329_v38 = vld [vmem:[#allocation5 + $0x110] sm:$0xff] }
  0x91   : > { %5692 = vmatprep.subr.bf16.mxu0 %v6119_v39  ;;  %v5349_v43 = vcombine.high %v327_v37, %v329_v38  ;;  %v5348_v49 = vcombine.low %v327_v37, %v329_v38  ;;  %v5377_v37 = vcombine.high %v355_v31, %v357_v32 }
  0x93   : > { %1405 = vmatmul.mubr.bf16.vlgmr.msra.gmra.mxu0 %v5316_v44  ;;  %1694 = vmatmul.mubr.bf16.vlgmr.msra.gmra.mxu1 %v5318_v45  ;;  %v331_v45 = vld [vmem:[#allocation5 + $0x120] sm:$0xff] }
  0x94   : > { %5693 = vmatpush3.bf16.msra.mxu0 %v6119_v39  ;;  %1412 = vmatprep.mubr.bf16.mxu0 %v5321_v47  ;;  %v328_v39 = vld [vmem:[#allocation5 + $0x108] sm:$0xff] }
  0x95   : > { %1701 = vmatprep.mubr.bf16.mxu1 %v5323_v48  ;;  %5694 = vmatprep.subr.bf16.mxu0 %v6136_v46  ;;  %v5351_v44 = vcombine.high %v328_v39, %v330_v40  ;;  %v332_v47 = vld [vmem:[#allocation5 + $0x128] sm:$0xff]  ;;  %v334_v48 = vld [vmem:[#allocation5 + $0x138] sm:$0xff]  ;;  %v5350_v50 = vcombine.low %v328_v39, %v330_v40  ;;  %v359_v39 = vld [vmem:[#allocation5 + $0x200] sm:$0xff] }
  0x96   : > { %v5355_v52 = vcombine.high %v332_v47, %v334_v48  ;;  %v5354_v59 = vcombine.low %v332_v47, %v334_v48  ;;  %v361_v40 = vld [vmem:[#allocation5 + $0x210] sm:$0xff]  ;;  %v363_v47 = vld [vmem:[#allocation5 + $0x220] sm:$0xff] }
  0x97   : > { %v365_v48 = vld [vmem:[#allocation5 + $0x230] sm:$0xff] }
  0x98   : > { %5695 = vmatpush3.bf16.msra.mxu0 %v6136_v46  ;;  %v333_v46 = vld [vmem:[#allocation5 + $0x130] sm:$0xff] }
  0x99   : > { %5696 = vmatprep.subr.bf16.mxu0 %v6153_v53  ;;  %v5353_v51 = vcombine.high %v331_v45, %v333_v46 }
  0x9b   : > { %1413 = vmatmul.mubr.bf16.gmra.mxu0 %v5320_v54  ;;  %1702 = vmatmul.mubr.bf16.gmra.mxu1 %v5322_v55  ;;  %v337_v54 = vld [vmem:[#allocation5 + $0x150] sm:$0xff]  ;;  %v6221_v55 = vld [vmem:[#allocation10 + $0x8] sm:$0xff]  }
  0x9c   : > { %1420 = vmatprep.mubr.bf16.mxu0 %v5325_v56  ;;  %1709 = vmatprep.mubr.bf16.mxu1 %v5327_v58  ;;  %v336_v56 = vld [vmem:[#allocation5 + $0x148] sm:$0xff]  ;;  %v5352_v58 = vcombine.low %v331_v45, %v333_v46  ;;  %v5381_v45 = vcombine.high %v359_v39, %v361_v40 }
  0x9d   : > { %5697 = vmatpush3.bf16.msra.mxu0 %v6153_v53  ;;  %v335_v53 = vld [vmem:[#allocation5 + $0x140] sm:$0xff] }
  0x9e   : > { %5698 = vmatprep.subr.bf16.mxu0 %v6170_v57  ;;  %v5357_v60 = vcombine.high %v335_v53, %v337_v54 }
  0xa1   : > { %5699 = vmatpush3.bf16.msra.mxu0 %v6170_v57  ;;  %v338_v57 = vld [vmem:[#allocation5 + $0x158] sm:$0xff] }
  0xa2   : > { %5700 = vmatprep.subr.bf16.mxu0 %v6187_v63  ;;  %v5359_v61 = vcombine.high %v336_v56, %v338_v57 }
  0xa3   : > { %1421 = vmatmul.mubr.bf16.gmra.mxu0 %v5324_v0  ;;  %1710 = vmatmul.mubr.bf16.gmra.mxu1 %v5326_v1  ;;  %v340_v0 = vld [vmem:[#allocation5 + $0x168] sm:$0xff]  ;;  %v342_v1 = vld [vmem:[#allocation5 + $0x178] sm:$0xff] }
  0xa4   : > { %1428 = vmatprep.mubr.bf16.mxu0 %v5329_v2  ;;  %1717 = vmatprep.mubr.bf16.mxu1 %v5331_v3  ;;  %v5356_v2 = vcombine.low %v335_v53, %v337_v54  ;;  %v5358_v3 = vcombine.low %v336_v56, %v338_v57  ;;  %v5363_v5 = vcombine.high %v340_v0, %v342_v1  ;;  %v369_v56 = vld [vmem:[#allocation5 + $0x250] sm:$0xff]  ;;  %v368_v57 = vld [vmem:[#allocation5 + $0x248] sm:$0xff] }
  0xa5   : > { %5701 = vmatpush3.bf16.msra.mxu0 %v6187_v63  ;;  %v341_v63 = vld [vmem:[#allocation5 + $0x170] sm:$0xff]  ;;  %v5385_v53 = vcombine.high %v363_v47, %v365_v48 }
  0xa6   : > { %5702 = vmatprep.subr.bf16.mxu0 %v6204_v21  ;;  %v5361_v4 = vcombine.high %v339_v62, %v341_v63 }
  0xa9   : > { %5703 = vmatpush3.bf16.msra.mxu0 %v6204_v21 }
  0xaa   : > { %5704 = vmatprep.subr.bf16.mxu0 %v6221_v55 }
  0xab   : > { %1429 = vmatmul.mubr.bf16.gmra.mxu0 %v5328_v8  ;;  %1718 = vmatmul.mubr.bf16.gmra.mxu1 %v5330_v9  ;;  %v344_v8 = vld [vmem:[#allocation5 + $0x188] sm:$0xff]  ;;  %v346_v9 = vld [vmem:[#allocation5 + $0x198] sm:$0xff] }
  0xac   : > { %1436 = vmatprep.mubr.bf16.mxu0 %v5333_v10  ;;  %1725 = vmatprep.mubr.bf16.mxu1 %v5335_v11  ;;  %v5360_v10 = vcombine.low %v339_v62, %v341_v63  ;;  %v5362_v11 = vcombine.low %v340_v0, %v342_v1  ;;  %v5367_v13 = vcombine.high %v344_v8, %v346_v9  ;;  %v371_v63 = vld [vmem:[#allocation5 + $0x260] sm:$0xff]  ;;  %v373_v0 = vld [vmem:[#allocation5 + $0x270] sm:$0xff]  ;;  %v372_v1 = vld [vmem:[#allocation5 + $0x268] sm:$0xff] }
  0xad   : > { %5705 = vmatpush3.bf16.msra.mxu0 %v6221_v55  ;;  %v367_v55 = vld [vmem:[#allocation5 + $0x240] sm:$0xff] }
  0xae   : > { %5706 = vmatprep.subr.bf16.mxu0 %v6238_v24 }
  0xb1   : > { %5707 = vmatpush3.bf16.msra.mxu0 %v6238_v24  ;;  %v385_v24 = vld [vmem:[#allocation5 + $0x2d0] sm:$0xff] }
  0xb3   : > { %1437 = vmatmul.mubr.bf16.gmra.mxu0 %v5332_v16  ;;  %1726 = vmatmul.mubr.bf16.gmra.mxu1 %v5334_v17  ;;  %v348_v16 = vld [vmem:[#allocation5 + $0x1a8] sm:$0xff]  ;;  %v350_v17 = vld [vmem:[#allocation5 + $0x1b8] sm:$0xff] }
  0xb4   : > { %1444 = vmatprep.mubr.bf16.mxu0 %v5337_v18  ;;  %1733 = vmatprep.mubr.bf16.mxu1 %v5339_v19  ;;  %v5364_v18 = vcombine.low %v343_v6, %v345_v7  ;;  %v5366_v19 = vcombine.low %v344_v8, %v346_v9  ;;  %v5371_v21 = vcombine.high %v348_v16, %v350_v17  ;;  %v375_v7 = vld [vmem:[#allocation5 + $0x280] sm:$0xff]  ;;  %v377_v8 = vld [vmem:[#allocation5 + $0x290] sm:$0xff]  ;;  %v376_v9 = vld [vmem:[#allocation5 + $0x288] sm:$0xff] }
  0xbb   : > { %1445 = vmatmul.mubr.bf16.gmra.mxu0 %v5336_v25  ;;  %1734 = vmatmul.mubr.bf16.gmra.mxu1 %v5338_v26  ;;  %v352_v25 = vld [vmem:[#allocation5 + $0x1c8] sm:$0xff]  ;;  %v354_v26 = vld [vmem:[#allocation5 + $0x1d8] sm:$0xff] }
  0xbc   : > { %1452 = vmatprep.mubr.bf16.mxu0 %v5341_v27  ;;  %1741 = vmatprep.mubr.bf16.mxu1 %v5343_v28  ;;  %v5368_v27 = vcombine.low %v347_v14, %v349_v15  ;;  %v5370_v28 = vcombine.low %v348_v16, %v350_v17  ;;  %v5375_v30 = vcombine.high %v352_v25, %v354_v26  ;;  %v379_v15 = vld [vmem:[#allocation5 + $0x2a0] sm:$0xff]  ;;  %v381_v16 = vld [vmem:[#allocation5 + $0x2b0] sm:$0xff]  ;;  %v380_v17 = vld [vmem:[#allocation5 + $0x2a8] sm:$0xff] }
  0xc3   : > { %1453 = vmatmul.mubr.bf16.gmra.mxu0 %v5340_v33  ;;  %1742 = vmatmul.mubr.bf16.gmra.mxu1 %v5342_v34  ;;  %v356_v33 = vld [vmem:[#allocation5 + $0x1e8] sm:$0xff]  ;;  %v358_v34 = vld [vmem:[#allocation5 + $0x1f8] sm:$0xff] }
  0xc4   : > { %1460 = vmatprep.mubr.bf16.mxu0 %v5345_v35  ;;  %1749 = vmatprep.mubr.bf16.mxu1 %v5347_v36  ;;  %v5372_v35 = vcombine.low %v351_v22, %v353_v23  ;;  %v5374_v36 = vcombine.low %v352_v25, %v354_v26  ;;  %v5379_v38 = vcombine.high %v356_v33, %v358_v34  ;;  %v383_v23 = vld [vmem:[#allocation5 + $0x2c0] sm:$0xff]  ;;  %v384_v25 = vld [vmem:[#allocation5 + $0x2c8] sm:$0xff]  ;;  %v386_v26 = vld [vmem:[#allocation5 + $0x2d8] sm:$0xff] }
  0xcb   : > { %1461 = vmatmul.mubr.bf16.gmra.mxu0 %v5344_v41  ;;  %1750 = vmatmul.mubr.bf16.gmra.mxu1 %v5346_v42  ;;  %v360_v41 = vld [vmem:[#allocation5 + $0x208] sm:$0xff]  ;;  %v362_v42 = vld [vmem:[#allocation5 + $0x218] sm:$0xff] }
  0xcc   : > { %1468 = vmatprep.mubr.bf16.mxu0 %v5349_v43  ;;  %1757 = vmatprep.mubr.bf16.mxu1 %v5351_v44  ;;  %v5376_v43 = vcombine.low %v355_v31, %v357_v32  ;;  %v5378_v44 = vcombine.low %v356_v33, %v358_v34  ;;  %v5383_v46 = vcombine.high %v360_v41, %v362_v42  ;;  %v387_v31 = vld [vmem:[#allocation5 + $0x2e0] sm:$0xff]  ;;  %v389_v32 = vld [vmem:[#allocation5 + $0x2f0] sm:$0xff]  ;;  %v388_v33 = vld [vmem:[#allocation5 + $0x2e8] sm:$0xff] }
  0xcd   : > { %v390_v34 = vld [vmem:[#allocation5 + $0x2f8] sm:$0xff] }
  0xd3   : > { %1469 = vmatmul.mubr.bf16.gmra.mxu0 %v5348_v49  ;;  %1758 = vmatmul.mubr.bf16.gmra.mxu1 %v5350_v50  ;;  %v364_v49 = vld [vmem:[#allocation5 + $0x228] sm:$0xff]  ;;  %v366_v50 = vld [vmem:[#allocation5 + $0x238] sm:$0xff] }
  0xd4   : > { %1476 = vmatprep.mubr.bf16.mxu0 %v5353_v51  ;;  %1765 = vmatprep.mubr.bf16.mxu1 %v5355_v52  ;;  %v5380_v51 = vcombine.low %v359_v39, %v361_v40  ;;  %v5382_v52 = vcombine.low %v360_v41, %v362_v42  ;;  %v5387_v54 = vcombine.high %v364_v49, %v366_v50  ;;  %v391_v39 = vld [vmem:[#allocation5 + $0x300] sm:$0xff]  ;;  %v393_v40 = vld [vmem:[#allocation5 + $0x310] sm:$0xff]  ;;  %v392_v41 = vld [vmem:[#allocation5 + $0x308] sm:$0xff] }
  0xd5   : > { %v394_v42 = vld [vmem:[#allocation5 + $0x318] sm:$0xff] }
  0xdb   : > { %1477 = vmatmul.mubr.bf16.gmra.mxu0 %v5352_v58  ;;  %1766 = vmatmul.mubr.bf16.gmra.mxu1 %v5354_v59  ;;  %v370_v58 = vld [vmem:[#allocation5 + $0x258] sm:$0xff]  ;;  %v5384_v59 = vcombine.low %v363_v47, %v365_v48  ;;  %v395_v47 = vld [vmem:[#allocation5 + $0x320] sm:$0xff]  ;;  %v397_v48 = vld [vmem:[#allocation5 + $0x330] sm:$0xff] }
  0xdc   : > { %1484 = vmatprep.mubr.bf16.mxu0 %v5357_v60  ;;  %1773 = vmatprep.mubr.bf16.mxu1 %v5359_v61  ;;  %v5386_v60 = vcombine.low %v364_v49, %v366_v50  ;;  %v5389_v61 = vcombine.high %v367_v55, %v369_v56  ;;  %v5391_v62 = vcombine.high %v368_v57, %v370_v58  ;;  %v396_v49 = vld [vmem:[#allocation5 + $0x328] sm:$0xff]  ;;  %v398_v50 = vld [vmem:[#allocation5 + $0x338] sm:$0xff] }
  0xe3   : > { %1485 = vmatmul.mubr.bf16.gmra.mxu0 %v5356_v2  ;;  %1774 = vmatmul.mubr.bf16.gmra.mxu1 %v5358_v3  ;;  %v374_v2 = vld [vmem:[#allocation5 + $0x278] sm:$0xff]  ;;  %v5388_v3 = vcombine.low %v367_v55, %v369_v56 }
  0xe4   : > { %1492 = vmatprep.mubr.bf16.mxu0 %v5361_v4  ;;  %1781 = vmatprep.mubr.bf16.mxu1 %v5363_v5  ;;  %v5390_v4 = vcombine.low %v368_v57, %v370_v58  ;;  %v5393_v5 = vcombine.high %v371_v63, %v373_v0  ;;  %v5395_v6 = vcombine.high %v372_v1, %v374_v2 }
  0xeb   : > { %1493 = vmatmul.mubr.bf16.gmra.mxu0 %v5360_v10  ;;  %1782 = vmatmul.mubr.bf16.gmra.mxu1 %v5362_v11  ;;  %v378_v10 = vld [vmem:[#allocation5 + $0x298] sm:$0xff]  ;;  %v5392_v11 = vcombine.low %v371_v63, %v373_v0 }
  0xec   : > { %1500 = vmatprep.mubr.bf16.mxu0 %v5365_v12  ;;  %1789 = vmatprep.mubr.bf16.mxu1 %v5367_v13  ;;  %v5394_v12 = vcombine.low %v372_v1, %v374_v2  ;;  %v5397_v13 = vcombine.high %v375_v7, %v377_v8  ;;  %v5399_v14 = vcombine.high %v376_v9, %v378_v10  ;;  %v402_v63 = vld [vmem:[#allocation5 + $0x358] sm:$0xff] }
  0xed   : > { %v5416_v1 = vcombine.low %v395_v47, %v397_v48 }
  0xf3   : > { %1501 = vmatmul.mubr.bf16.gmra.mxu0 %v5364_v18  ;;  %1790 = vmatmul.mubr.bf16.gmra.mxu1 %v5366_v19  ;;  %v382_v18 = vld [vmem:[#allocation5 + $0x2b8] sm:$0xff]  ;;  %v5396_v19 = vcombine.low %v375_v7, %v377_v8 }
  0xf4   : > { %1508 = vmatprep.mubr.bf16.mxu0 %v5369_v20  ;;  %1797 = vmatprep.mubr.bf16.mxu1 %v5371_v21  ;;  %v5398_v20 = vcombine.low %v376_v9, %v378_v10  ;;  %v5401_v21 = vcombine.high %v379_v15, %v381_v16  ;;  %v5403_v22 = vcombine.high %v380_v17, %v382_v18 }
  0xfb   : > { %1509 = vmatmul.mubr.bf16.gmra.mxu0 %v5368_v27  ;;  %1798 = vmatmul.mubr.bf16.gmra.mxu1 %v5370_v28  ;;  %v5400_v27 = vcombine.low %v379_v15, %v381_v16  ;;  %v5402_v28 = vcombine.low %v380_v17, %v382_v18  ;;  %v405_v15 = vld [vmem:[#allocation5 + $0x370] sm:$0xff]  ;;  %v404_v17 = vld [vmem:[#allocation5 + $0x368] sm:$0xff]  ;;  %v406_v18 = vld [vmem:[#allocation5 + $0x378] sm:$0xff] }
  0xfc   : > { %1516 = vmatprep.mubr.bf16.mxu0 %v5373_v29  ;;  %1805 = vmatprep.mubr.bf16.mxu1 %v5375_v30  ;;  %v5405_v29 = vcombine.high %v383_v23, %v385_v24  ;;  %v5407_v30 = vcombine.high %v384_v25, %v386_v26 }
 0x103   : > { %1517 = vmatmul.mubr.bf16.gmra.mxu0 %v5372_v35  ;;  %1806 = vmatmul.mubr.bf16.gmra.mxu1 %v5374_v36  ;;  %v5404_v35 = vcombine.low %v383_v23, %v385_v24  ;;  %v5406_v36 = vcombine.low %v384_v25, %v386_v26  ;;  %v5427_v26 = vcombine.high %v404_v17, %v406_v18 }
 0x104   : > { %1524 = vmatprep.mubr.bf16.mxu0 %v5377_v37  ;;  %1813 = vmatprep.mubr.bf16.mxu1 %v5379_v38  ;;  %v5409_v37 = vcombine.high %v387_v31, %v389_v32  ;;  %v5411_v38 = vcombine.high %v388_v33, %v390_v34 }
 0x10b   : > { %1525 = vmatmul.mubr.bf16.gmra.mxu0 %v5376_v43  ;;  %1814 = vmatmul.mubr.bf16.gmra.mxu1 %v5378_v44  ;;  %v5408_v43 = vcombine.low %v387_v31, %v389_v32  ;;  %v5410_v44 = vcombine.low %v388_v33, %v390_v34  ;;  %v407_v34 = vld [vmem:[#allocation5 + $0x380] sm:$0xff] }
 0x10c   : > { %1532 = vmatprep.mubr.bf16.mxu0 %v5381_v45  ;;  %1821 = vmatprep.mubr.bf16.mxu1 %v5383_v46  ;;  %v5413_v45 = vcombine.high %v391_v39, %v393_v40  ;;  %v5415_v46 = vcombine.high %v392_v41, %v394_v42 }
 0x113   : > { %1533 = vmatmul.mubr.bf16.gmra.mxu0 %v5380_v51  ;;  %1822 = vmatmul.mubr.bf16.gmra.mxu1 %v5382_v52  ;;  %v5412_v51 = vcombine.low %v391_v39, %v393_v40  ;;  %v5414_v52 = vcombine.low %v392_v41, %v394_v42  ;;  %v5426_v42 = vcombine.low %v404_v17, %v406_v18 }
 0x114   : > { %1540 = vmatprep.mubr.bf16.mxu0 %v5385_v53  ;;  %1829 = vmatprep.mubr.bf16.mxu1 %v5387_v54  ;;  %v5417_v53 = vcombine.high %v395_v47, %v397_v48  ;;  %v5419_v54 = vcombine.high %v396_v49, %v398_v50 }
 0x11b   : > { %1541 = vmatmul.mubr.bf16.gmra.mxu0 %v5384_v59  ;;  %1830 = vmatmul.mubr.bf16.gmra.mxu1 %v5386_v60  ;;  %v399_v59 = vld [vmem:[#allocation5 + $0x340] sm:$0xff]  ;;  %v401_v60 = vld [vmem:[#allocation5 + $0x350] sm:$0xff] }
 0x11c   : > { %1548 = vmatprep.mubr.bf16.mxu0 %v5389_v61  ;;  %1837 = vmatprep.mubr.bf16.mxu1 %v5391_v62  ;;  %v400_v62 = vld [vmem:[#allocation5 + $0x348] sm:$0xff] }
 0x11d   : > { %v5423_v7 = vcombine.high %v400_v62, %v402_v63 }
 0x123   : > { %1549 = vmatmul.mubr.bf16.gmra.mxu0 %v5388_v3  ;;  %1838 = vmatmul.mubr.bf16.gmra.mxu1 %v5390_v4  ;;  %v5418_v3 = vcombine.low %v396_v49, %v398_v50  ;;  %v5421_v4 = vcombine.high %v399_v59, %v401_v60 }
 0x124   : > { %1556 = vmatprep.mubr.bf16.mxu0 %v5393_v5  ;;  %1845 = vmatprep.mubr.bf16.mxu1 %v5395_v6 }
 0x12b   : > { %1557 = vmatmul.mubr.bf16.gmra.mxu0 %v5392_v11  ;;  %1846 = vmatmul.mubr.bf16.gmra.mxu1 %v5394_v12 }
 0x12c   : > { %1564 = vmatprep.mubr.bf16.mxu0 %v5397_v13  ;;  %1853 = vmatprep.mubr.bf16.mxu1 %v5399_v14  ;;  %v403_v14 = vld [vmem:[#allocation5 + $0x360] sm:$0xff] }
 0x12d   : > { %v5425_v23 = vcombine.high %v403_v14, %v405_v15  ;;  %v5424_v40 = vcombine.low %v403_v14, %v405_v15  ;;  %v416_v15 = vld [vmem:[#allocation5 + $0x3c8] sm:$0xff] }
 0x133   : > { %1565 = vmatmul.mubr.bf16.gmra.mxu0 %v5396_v19  ;;  %1854 = vmatmul.mubr.bf16.gmra.mxu1 %v5398_v20  ;;  %v5420_v20 = vcombine.low %v399_v59, %v401_v60 }
 0x134   : > { %1572 = vmatprep.mubr.bf16.mxu0 %v5401_v21  ;;  %1861 = vmatprep.mubr.bf16.mxu1 %v5403_v22  ;;  %v5422_v22 = vcombine.low %v400_v62, %v402_v63 }
 0x13b   : > { %1573 = vmatmul.mubr.bf16.gmra.mxu0 %v5400_v27  ;;  %1862 = vmatmul.mubr.bf16.gmra.mxu1 %v5402_v28  ;;  %v6325_v28 = vld [vmem:[#allocation5 + $0xd0] sm:$0xff] }
 0x13c   : > { %1580 = vmatprep.mubr.bf16.mxu0 %v5405_v29  ;;  %1869 = vmatprep.mubr.bf16.mxu1 %v5407_v30  ;;  %v6271_v30 = vld [vmem:[#allocation10 + $0x78] sm:$0xff]  }
 0x13d   : > { %5836 = vmatprep.subr.bf16.mxu1 %v6271_v30 }
 0x13e   : > { %5837 = vmatpush3.bf16.msra.mxu1 %v6271_v30 }
 0x143   : > { %1581 = vmatmul.mubr.bf16.gmra.mxu0 %v5404_v35  ;;  %1870 = vmatmul.mubr.bf16.gmra.mxu1 %v5406_v36  ;;  %v409_v35 = vld [vmem:[#allocation5 + $0x390] sm:$0xff] }
 0x144   : > { %1588 = vmatprep.mubr.bf16.mxu0 %v5409_v37  ;;  %1877 = vmatprep.mubr.bf16.mxu1 %v5411_v38  ;;  %v408_v37 = vld [vmem:[#allocation5 + $0x388] sm:$0xff]  ;;  %v410_v38 = vld [vmem:[#allocation5 + $0x398] sm:$0xff]  ;;  %v5428_v60 = vcombine.low %v407_v34, %v409_v35 }
 0x145   : > { %v5430_v62 = vcombine.low %v408_v37, %v410_v38 }
 0x14b   : > { %1589 = vmatmul.mubr.bf16.gmra.mxu0 %v5408_v43  ;;  %1878 = vmatmul.mubr.bf16.gmra.mxu1 %v5410_v44  ;;  %v5429_v43 = vcombine.high %v407_v34, %v409_v35  ;;  %v419_v34 = vld [vmem:[#allocation5 + $0x3e0] sm:$0xff]  ;;  %v421_v35 = vld [vmem:[#allocation5 + $0x3f0] sm:$0xff] }
 0x14c   : > { %1596 = vmatprep.mubr.bf16.mxu0 %v5413_v45  ;;  %1885 = vmatprep.mubr.bf16.mxu1 %v5415_v46  ;;  %v5431_v46 = vcombine.high %v408_v37, %v410_v38  ;;  %v420_v37 = vld [vmem:[#allocation5 + $0x3e8] sm:$0xff]  ;;  %v422_v38 = vld [vmem:[#allocation5 + $0x3f8] sm:$0xff] }
 0x153   : > { %v1406_v55 = vpop.f32.mrf.mxu0  ;;  %1597 = vmatmul.mubr.bf16.gmra.mxu0 %v5412_v51  ;;  %v1695_v56 = vpop.f32.mrf.mxu1  ;;  %1886 = vmatmul.mubr.bf16.gmra.mxu1 %v5414_v52 }
 0x154   : > { %1604 = vmatprep.mubr.bf16.mxu0 %v5417_v53  ;;  %v6769_v57 = vadd.f32 %v1695_v56, %v1406_v55  ;;  %1893 = vmatprep.mubr.bf16.mxu1 %v5419_v54  ;;  %v411_v53 = vld [vmem:[#allocation5 + $0x3a0] sm:$0xff]  ;;  %v413_v54 = vld [vmem:[#allocation5 + $0x3b0] sm:$0xff]  ;;  %v412_v56 = vld [vmem:[#allocation5 + $0x3a8] sm:$0xff] }
 0x155   : > { %v1408_v58 = vpop.f32.mrf.mxu0  ;;  %v1697_v61 = vpop.f32.mrf.mxu1  ;;  %v5433_v63 = vcombine.high %v411_v53, %v413_v54  ;;  %v5432_v18 = vcombine.low %v411_v53, %v413_v54  ;;  %v6280_v53 = vld [vmem:[#allocation10 + $0x70] sm:$0xff]  }
 0x156   : > { %v414_v58 = vld [vmem:[#allocation5 + $0x3b8] sm:$0xff]  ;;  %5838 = vmatprep.subr.bf16.mxu1 %v6280_v53 }
 0x157   : > { %v1409_v0 = vpop.f32.mrf.mxu0  ;;  %v1698_v2 = vpop.f32.mrf.mxu1  ;;  %5839 = vmatpush3.bf16.msra.mxu1 %v6280_v53  ;;  %v6256_v53 = vld [vmem:[#allocation8 + $0x28] sm:$0xff]  }
 0x158   : > { %v6771_v5 = vadd.f32 %v1698_v2, %v1409_v0  ;;  %v5435_v2 = vcombine.high %v412_v56, %v414_v58 }
 0x159   : > { %v1411_v6 = vpop.f32.mrf.mxu0  ;;  %v1700_v8 = vpop.f32.mrf.mxu1 }
 0x15b   : > { %v1414_v10 = vpop.f32.mrf.mxu0  ;;  %1605 = vmatmul.mubr.bf16.gmra.mxu0 %v5416_v1  ;;  %v1703_v11 = vpop.f32.mrf.mxu1  ;;  %1894 = vmatmul.mubr.bf16.gmra.mxu1 %v5418_v3 }
 0x15c   : > { %1612 = vmatprep.mubr.bf16.mxu0 %v5421_v4  ;;  %v6775_v12 = vadd.f32 %v1703_v11, %v1414_v10  ;;  %1901 = vmatprep.mubr.bf16.mxu1 %v5423_v7  ;;  %v415_v11 = vld [vmem:[#allocation5 + $0x3c0] sm:$0xff]  ;;  %v6317_v4 = vld [vmem:[#allocation5 + $0x90] sm:$0xff] }
 0x15d   : > { %v1416_v13 = vpop.f32.mrf.mxu0  ;;  %v1705_v16 = vpop.f32.mrf.mxu1  ;;  %v1986_v48 = vunpack.c.l.bf16 %v6317_v4 }
 0x15e   : > { %v417_v13 = vld [vmem:[#allocation5 + $0x3d0] sm:$0xff]  ;;  %v418_v16 = vld [vmem:[#allocation5 + $0x3d8] sm:$0xff] }
 0x15f   : > { %v1417_v19 = vpop.f32.mrf.mxu0  ;;  %v1706_v21 = vpop.f32.mrf.mxu1 }
 0x160   : > { %v6777_v24 = vadd.f32 %v1706_v21, %v1417_v19  ;;  %v5437_v21 = vcombine.high %v415_v11, %v417_v13 }
 0x161   : > { %v1419_v25 = vpop.f32.mrf.mxu0  ;;  %v1708_v27 = vpop.f32.mrf.mxu1 }
 0x162   : > { %v5439_v25 = vcombine.high %v416_v15, %v418_v16 }
 0x163   : > { %v1422_v29 = vpop.f32.mrf.mxu0  ;;  %1613 = vmatmul.mubr.bf16.gmra.mxu0 %v5420_v20  ;;  %v1711_v31 = vpop.f32.mrf.mxu1  ;;  %1902 = vmatmul.mubr.bf16.gmra.mxu1 %v5422_v22  ;;  %v5434_v20 = vcombine.low %v412_v56, %v414_v58 }
 0x164   : > { %1620 = vmatprep.mubr.bf16.mxu0 %v5425_v23  ;;  %v6781_v32 = vadd.f32 %v1711_v31, %v1422_v29  ;;  %1909 = vmatprep.mubr.bf16.mxu1 %v5427_v26 }
 0x165   : > { %v1424_v33 = vpop.f32.mrf.mxu0  ;;  %v1713_v36 = vpop.f32.mrf.mxu1 }
 0x167   : > { %v1425_v39 = vpop.f32.mrf.mxu0  ;;  %v1714_v41 = vpop.f32.mrf.mxu1 }
 0x168   : > { %v6783_v44 = vadd.f32 %v1714_v41, %v1425_v39 }
 0x169   : > { %v1427_v45 = vpop.f32.mrf.mxu0  ;;  %v1716_v47 = vpop.f32.mrf.mxu1 }
 0x16a   : > { %v5443_v47 = vcombine.high %v420_v37, %v422_v38 }
 0x16b   : > { %v1430_v49 = vpop.f32.mrf.mxu0  ;;  %1621 = vmatmul.mubr.bf16.gmra.mxu0 %v5424_v40  ;;  %v1719_v50 = vpop.f32.mrf.mxu1  ;;  %1910 = vmatmul.mubr.bf16.gmra.mxu1 %v5426_v42  ;;  %v5436_v40 = vcombine.low %v415_v11, %v417_v13  ;;  %v5438_v42 = vcombine.low %v416_v15, %v418_v16  ;;  %v6252_v16 = vld [vmem:[#allocation8 + $0x8] sm:$0xff]  }
 0x16c   : > { %1628 = vmatprep.mubr.bf16.mxu0 %v5429_v43  ;;  %v6787_v51 = vadd.f32 %v1719_v50, %v1430_v49  ;;  %1917 = vmatprep.mubr.bf16.mxu1 %v5431_v46  ;;  %v5441_v43 = vcombine.high %v419_v34, %v421_v35  ;;  %v6310_v50 = vld [vmem:[#allocation5 + $0x60] sm:$0xff] }
 0x16d   : > { %v1432_v52 = vpop.f32.mrf.mxu0  ;;  %v1721_v55 = vpop.f32.mrf.mxu1  ;;  %v1974_v27 = vunpack.c.l.bf16 %v6310_v50 }
 0x16f   : > { %v1433_v59 = vpop.f32.mrf.mxu0  ;;  %v1722_v61 = vpop.f32.mrf.mxu1 }
 0x170   : > { %v6789_v0 = vadd.f32 %v1722_v61, %v1433_v59 }
 0x171   : > { %v1435_v1 = vpop.f32.mrf.mxu0  ;;  %v1724_v3 = vpop.f32.mrf.mxu1 }
 0x173   : > { %v1438_v6 = vpop.f32.mrf.mxu0  ;;  %1629 = vmatmul.mubr.bf16.gmra.mxu0 %v5428_v60  ;;  %v1727_v7 = vpop.f32.mrf.mxu1  ;;  %1918 = vmatmul.mubr.bf16.gmra.mxu1 %v5430_v62  ;;  %v5440_v60 = vcombine.low %v419_v34, %v421_v35  ;;  %v5442_v62 = vcombine.low %v420_v37, %v422_v38  ;;  %v6254_v35 = vld [vmem:[#allocation8 + $0x18] sm:$0xff]   ;;  %v6255_v37 = vld [vmem:[#allocation8 + $0x20] sm:$0xff]  }
 0x174   : > { %1636 = vmatprep.mubr.bf16.mxu0 %v5433_v63  ;;  %v6793_v8 = vadd.f32 %v1727_v7, %v1438_v6  ;;  %1925 = vmatprep.mubr.bf16.mxu1 %v5435_v2  ;;  %v6251_v63 = vld [vmem:[#allocation8] sm:$0xff]  }
 0x175   : > { %v1440_v10 = vpop.f32.mrf.mxu0  ;;  %v1729_v14 = vpop.f32.mrf.mxu1 }
 0x177   : > { %v1441_v17 = vpop.f32.mrf.mxu0  ;;  %v1730_v19 = vpop.f32.mrf.mxu1 }
 0x178   : > { %v6795_v22 = vadd.f32 %v1730_v19, %v1441_v17 }
 0x179   : > { %v1443_v23 = vpop.f32.mrf.mxu0  ;;  %v1732_v26 = vpop.f32.mrf.mxu1 }
 0x17b   : > { %v1446_v29 = vpop.f32.mrf.mxu0  ;;  %1637 = vmatmul.mubr.bf16.gmra.mxu0 %v5432_v18  ;;  %v1735_v30 = vpop.f32.mrf.mxu1  ;;  %1926 = vmatmul.mubr.bf16.gmra.mxu1 %v5434_v20  ;;  %v6253_v18 = vld [vmem:[#allocation8 + $0x10] sm:$0xff]  }
 0x17c   : > { %1644 = vmatprep.mubr.bf16.mxu0 %v5437_v21  ;;  %v6799_v31 = vadd.f32 %v1735_v30, %v1446_v29  ;;  %1933 = vmatprep.mubr.bf16.mxu1 %v5439_v25 }
 0x17d   : > { %v1448_v33 = vpop.f32.mrf.mxu0  ;;  %v1737_v36 = vpop.f32.mrf.mxu1 }
 0x17f   : > { %v1449_v39 = vpop.f32.mrf.mxu0  ;;  %v1738_v41 = vpop.f32.mrf.mxu1 }
 0x180   : > { %v6801_v45 = vadd.f32 %v1738_v41, %v1449_v39 }
 0x181   : > { %v1451_v46 = vpop.f32.mrf.mxu0  ;;  %v1740_v49 = vpop.f32.mrf.mxu1 }
 0x183   : > { %v1454_v52 = vpop.f32.mrf.mxu0  ;;  %1645 = vmatmul.mubr.bf16.gmra.mxu0 %v5436_v40  ;;  %v1743_v54 = vpop.f32.mrf.mxu1  ;;  %1934 = vmatmul.mubr.bf16.gmra.mxu1 %v5438_v42 }
 0x184   : > { %1652 = vmatprep.mubr.bf16.mxu0 %v5441_v43  ;;  %v6805_v55 = vadd.f32 %v1743_v54, %v1454_v52  ;;  %1941 = vmatprep.mubr.bf16.mxu1 %v5443_v47 }
 0x185   : > { %v1456_v56 = vpop.f32.mrf.mxu0  ;;  %v1745_v58 = vpop.f32.mrf.mxu1 }
 0x186   : > { %v6257_v56 = vld [vmem:[#allocation8 + $0x30] sm:$0xff]  }
 0x187   : > { %v1457_v59 = vpop.f32.mrf.mxu0  ;;  %v1746_v61 = vpop.f32.mrf.mxu1 }
 0x188   : > { %v6807_v1 = vadd.f32 %v1746_v61, %v1457_v59 }
 0x189   : > { %v1459_v2 = vpop.f32.mrf.mxu0  ;;  %v1748_v3 = vpop.f32.mrf.mxu1 }
 0x18b   : > { %v1462_v7 = vpop.f32.mrf.mxu0  ;;  %1653 = vmatmul.mubr.bf16.gmra.mxu0 %v5440_v60  ;;  %v1751_v10 = vpop.f32.mrf.mxu1  ;;  %1942 = vmatmul.mubr.bf16.gmra.mxu1 %v5442_v62 }
 0x18c   : > { %5708 = vmatprep.mubr.bf16.mxu0 %v6251_v63  ;;  %v6811_v11 = vadd.f32 %v1751_v10, %v1462_v7  ;;  %v6285_v63 = vld [vmem:[#allocation10 + $0x68] sm:$0xff]  }
 0x18d   : > { %v1464_v13 = vpop.f32.mrf.mxu0  ;;  %v1753_v14 = vpop.f32.mrf.mxu1  ;;  %5840 = vmatprep.subr.bf16.mxu1 %v6285_v63 }
 0x18e   : > { %5841 = vmatpush3.bf16.msra.mxu1 %v6285_v63  ;;  %v6258_v14 = vld [vmem:[#allocation8 + $0x38] sm:$0xff]   ;;  %v6263_v63 = vld [vmem:[#allocation8 + $0x60] sm:$0xff]  }
 0x18f   : > { %v1465_v15 = vpop.f32.mrf.mxu0  ;;  %v1754_v17 = vpop.f32.mrf.mxu1 }
 0x190   : > { %v6813_v19 = vadd.f32 %v1754_v17, %v1465_v15 }
 0x191   : > { %v1467_v20 = vpop.f32.mrf.mxu0  ;;  %v1756_v21 = vpop.f32.mrf.mxu1 }
 0x192   : > { %v6306_v21 = vld [vmem:[#allocation5 + $0x40] sm:$0xff] }
 0x193   : > { %v1470_v25 = vpop.f32.mrf.mxu0  ;;  %5709 = vmatmul.mubr.bf16.vlgmr.msra.gmra.mxu0 %v6252_v16  ;;  %v1759_v26 = vpop.f32.mrf.mxu1  ;;  %v6259_v16 = vld [vmem:[#allocation8 + $0x40] sm:$0xff]   ;;  %v1966_v61 = vunpack.c.l.bf16 %v6306_v21 }
 0x194   : > { %5712 = vmatprep.mubr.bf16.mxu0 %v6253_v18  ;;  %v6817_v29 = vadd.f32 %v1759_v26, %v1470_v25 }
 0x195   : > { %v1472_v30 = vpop.f32.mrf.mxu0  ;;  %v1761_v33 = vpop.f32.mrf.mxu1 }
 0x197   : > { %v1473_v34 = vpop.f32.mrf.mxu0  ;;  %v1762_v36 = vpop.f32.mrf.mxu1 }
 0x198   : > { %v6819_v38 = vadd.f32 %v1762_v36, %v1473_v34  ;;  %v6260_v36 = vld [vmem:[#allocation8 + $0x48] sm:$0xff]  }
 0x199   : > { %v1475_v39 = vpop.f32.mrf.mxu0  ;;  %v1764_v40 = vpop.f32.mrf.mxu1 }
 0x19a   : > { %v6261_v39 = vld [vmem:[#allocation8 + $0x50] sm:$0xff]  }
 0x19b   : > { %v1478_v42 = vpop.f32.mrf.mxu0  ;;  %5713 = vmatmul.mubr.bf16.gmra.mxu0 %v6254_v35  ;;  %v1767_v43 = vpop.f32.mrf.mxu1 }
 0x19c   : > { %5716 = vmatprep.mubr.bf16.mxu0 %v6255_v37  ;;  %v6823_v46 = vadd.f32 %v1767_v43, %v1478_v42 }
 0x19d   : > { %v1480_v47 = vpop.f32.mrf.mxu0  ;;  %v1769_v49 = vpop.f32.mrf.mxu1 }
 0x19f   : > { %v1481_v52 = vpop.f32.mrf.mxu0  ;;  %v1770_v54 = vpop.f32.mrf.mxu1 }
 0x1a0   : > { %v6825_v58 = vadd.f32 %v1770_v54, %v1481_v52 }
 0x1a1   : > { %v1483_v59 = vpop.f32.mrf.mxu0  ;;  %v1772_v60 = vpop.f32.mrf.mxu1 }
 0x1a2   : > { %v6262_v60 = vld [vmem:[#allocation8 + $0x58] sm:$0xff]  }
 0x1a3   : > { %v1486_v62 = vpop.f32.mrf.mxu0  ;;  %5717 = vmatmul.mubr.bf16.gmra.mxu0 %v6256_v53  ;;  %v1775_v2 = vpop.f32.mrf.mxu1 }
 0x1a4   : > { %5720 = vmatprep.mubr.bf16.mxu0 %v6257_v56  ;;  %v6829_v3 = vadd.f32 %v1775_v2, %v1486_v62 }
 0x1a5   : > { %v1488_v7 = vpop.f32.mrf.mxu0  ;;  %v1777_v10 = vpop.f32.mrf.mxu1 }
 0x1a7   : > { %v1489_v13 = vpop.f32.mrf.mxu0  ;;  %v1778_v15 = vpop.f32.mrf.mxu1 }
 0x1a8   : > { %v6831_v17 = vadd.f32 %v1778_v15, %v1489_v13 }
 0x1a9   : > { %v1491_v18 = vpop.f32.mrf.mxu0  ;;  %v1780_v20 = vpop.f32.mrf.mxu1 }
 0x1aa   : > { %v6299_v20 = vld [vmem:[#allocation5] sm:$0xff] }
 0x1ab   : > { %v1494_v25 = vpop.f32.mrf.mxu0  ;;  %5721 = vmatmul.mubr.bf16.gmra.mxu0 %v6258_v14  ;;  %v1783_v26 = vpop.f32.mrf.mxu1 }
 0x1ac   : > { %5724 = vmatprep.mubr.bf16.mxu0 %v6259_v16  ;;  %v6835_v30 = vadd.f32 %v1783_v26, %v1494_v25  ;;  %v1950_v25 = vunpack.c.l.bf16 %v6299_v20  ;;  %v1951_v26 = vunpack.c.h.bf16 %v6299_v20  ;;  %v6286_v20 = vld [vmem:[#allocation10 + $0x60] sm:$0xff]  }
 0x1ad   : > { %v1496_v33 = vpop.f32.mrf.mxu0  ;;  %v1785_v34 = vpop.f32.mrf.mxu1  ;;  %5842 = vmatprep.subr.bf16.mxu1 %v6286_v20 }
 0x1ae   : > { %5843 = vmatpush3.bf16.msra.mxu1 %v6286_v20 }
 0x1af   : > { %v1497_v35 = vpop.f32.mrf.mxu0  ;;  %v1786_v37 = vpop.f32.mrf.mxu1 }
 0x1b0   : > { %v6837_v40 = vadd.f32 %v1786_v37, %v1497_v35  ;;  %v6264_v35 = vld [vmem:[#allocation8 + $0x68] sm:$0xff]  }
 0x1b1   : > { %v1499_v42 = vpop.f32.mrf.mxu0  ;;  %v1788_v43 = vpop.f32.mrf.mxu1 }
 0x1b2   : > { %v6265_v43 = vld [vmem:[#allocation8 + $0x70] sm:$0xff]  }
 0x1b3   : > { %v1502_v49 = vpop.f32.mrf.mxu0  ;;  %5725 = vmatmul.mubr.bf16.gmra.mxu0 %v6260_v36  ;;  %v1791_v52 = vpop.f32.mrf.mxu1  ;;  %v6300_v36 = vld [vmem:[#allocation5 + $0x8] sm:$0xff] }
 0x1b4   : > { %5728 = vmatprep.mubr.bf16.mxu0 %v6261_v39  ;;  %v6841_v53 = vadd.f32 %v1791_v52, %v1502_v49  ;;  %v1952_v37 = vunpack.c.l.bf16 %v6300_v36  ;;  %v2206_v39 = vadd.f32 %v1951_v26, %v1950_v25  ;;  %v6303_v26 = vld [vmem:[#allocation5 + $0x28] sm:$0xff] }
 0x1b5   : > { %v1504_v54 = vpop.f32.mrf.mxu0  ;;  %v1793_v56 = vpop.f32.mrf.mxu1 }
 0x1b6   : > { %v1953_v54 = vunpack.c.h.bf16 %v6300_v36  ;;  %v2207_v56 = vadd.f32 %v2206_v39, %v1952_v37 }
 0x1b7   : > { %v1505_v59 = vpop.f32.mrf.mxu0  ;;  %v1794_v62 = vpop.f32.mrf.mxu1 }
 0x1b8   : > { %v6843_v2 = vadd.f32 %v1794_v62, %v1505_v59  ;;  %v6301_v59 = vld [vmem:[#allocation5 + $0x20] sm:$0xff]  ;;  %v2208_v25 = vadd.f32 %v2207_v56, %v1953_v54 }
 0x1b9   : > { %v1507_v7 = vpop.f32.mrf.mxu0  ;;  %v1796_v10 = vpop.f32.mrf.mxu1 }
 0x1ba   : > { %v6302_v7 = vld [vmem:[#allocation5 + $0x10] sm:$0xff]  ;;  %2209 = vadd.xlane.f32.xlu0 %v2208_v25  ;;  %v6267_v25 = vld [vmem:[#allocation8 + $0x80] sm:$0xff]  }
 0x1bb   : > { %v1510_v14 = vpop.f32.mrf.mxu0  ;;  %5729 = vmatmul.mubr.bf16.gmra.mxu0 %v6262_v60  ;;  %v1799_v15 = vpop.f32.mrf.mxu1  ;;  %v1958_v60 = vunpack.c.l.bf16 %v6301_v59  ;;  %v1954_v10 = vunpack.c.l.bf16 %v6302_v7 }
 0x1bc   : > { %5732 = vmatprep.mubr.bf16.mxu0 %v6263_v63  ;;  %v6847_v16 = vadd.f32 %v1799_v15, %v1510_v14  ;;  %v1959_v63 = vunpack.c.h.bf16 %v6301_v59  ;;  %v1955_v14 = vunpack.c.h.bf16 %v6302_v7  ;;  %v6305_v15 = vld [vmem:[#allocation5 + $0x30] sm:$0xff] }
 0x1bd   : > { %v1512_v18 = vpop.f32.mrf.mxu0  ;;  %v1801_v33 = vpop.f32.mrf.mxu1  ;;  %v1962_v13 = vunpack.c.l.bf16 %v6305_v15  ;;  %v1963_v47 = vunpack.c.h.bf16 %v6305_v15 }
 0x1be   : > { %v1960_v33 = vunpack.c.l.bf16 %v6303_v26  ;;  %v2216_v37 = vadd.f32 %v1959_v63, %v1958_v60  ;;  %v2211_v39 = vadd.f32 %v1955_v14, %v1954_v10  ;;  %v6307_v60 = vld [vmem:[#allocation5 + $0x38] sm:$0xff]  ;;  %v1967_v10 = vunpack.c.h.bf16 %v6306_v21  ;;  %v6308_v14 = vld [vmem:[#allocation5 + $0x48] sm:$0xff] }
 0x1bf   : > { %v1513_v34 = vpop.f32.mrf.mxu0  ;;  %v1802_v42 = vpop.f32.mrf.mxu1  ;;  %v1964_v63 = vunpack.c.l.bf16 %v6307_v60 }
 0x1c0   : > { %v6849_v49 = vadd.f32 %v1802_v42, %v1513_v34  ;;  %v6304_v34 = vld [vmem:[#allocation5 + $0x18] sm:$0xff]  ;;  %v2217_v54 = vadd.f32 %v2216_v37, %v1960_v33  ;;  %v1965_v33 = vunpack.c.h.bf16 %v6307_v60  ;;  %v2226_v15 = vadd.f32 %v1967_v10, %v1966_v61  ;;  %v6312_v10 = vld [vmem:[#allocation5 + $0x68] sm:$0xff] }
 0x1c1   : > { %v1515_v52 = vpop.f32.mrf.mxu0  ;;  %v1804_v62 = vpop.f32.mrf.mxu1  ;;  %v1956_v42 = vunpack.c.l.bf16 %v6304_v34  ;;  %v1957_v7 = vunpack.c.h.bf16 %v6304_v34 }
 0x1c2   : > { %v1961_v62 = vunpack.c.h.bf16 %v6303_v26 }
 0x1c3   : > { %v1518_v18 = vpop.f32.mrf.mxu0  ;;  %5733 = vmatmul.mubr.bf16.gmra.mxu0 %v6264_v35  ;;  %v1807_v36 = vpop.f32.mrf.mxu1  ;;  %v2212_v56 = vadd.f32 %v2211_v39, %v1956_v42  ;;  %v1969_v42 = vunpack.c.h.bf16 %v6308_v14 }
 0x1c4   : > { %5736 = vmatprep.mubr.bf16.mxu0 %v6265_v43  ;;  %v6853_v52 = vadd.f32 %v1807_v36, %v1518_v18  ;;  %v6266_v43 = vld [vmem:[#allocation8 + $0x78] sm:$0xff]   ;;  %v1968_v18 = vunpack.c.l.bf16 %v6308_v14  ;;  %v2218_v26 = vadd.f32 %v2217_v54, %v1961_v62  ;;  %v1975_v54 = vunpack.c.h.bf16 %v6310_v50  ;;  %v6268_v62 = vld [vmem:[#allocation8 + $0x88] sm:$0xff]  }
 0x1c5   : > { %v1520_v59 = vpop.f32.mrf.mxu0  ;;  %v1809_v35 = vpop.f32.mrf.mxu1  ;;  %v2213_v34 = vadd.f32 %v2212_v56, %v1957_v7 }
 0x1c6   : > { %v2221_v59 = vadd.f32 %v1963_v47, %v1962_v13  ;;  %2219 = vadd.xlane.f32.xlu1 %v2218_v26  ;;  %v6309_v35 = vld [vmem:[#allocation5 + $0x50] sm:$0xff]  ;;  %v6311_v47 = vld [vmem:[#allocation5 + $0x58] sm:$0xff] }
 0x1c7   : > { %v1521_v41 = vpop.f32.mrf.mxu0  ;;  %v1810_v36 = vpop.f32.mrf.mxu1  ;;  %2214 = vadd.xlane.f32.xlu0 %v2213_v34  ;;  %v1970_v6 = vunpack.c.l.bf16 %v6309_v35  ;;  %v1971_v21 = vunpack.c.h.bf16 %v6309_v35  ;;  %v1972_v13 = vunpack.c.l.bf16 %v6311_v47  ;;  %v1973_v34 = vunpack.c.h.bf16 %v6311_v47 }
 0x1c8   : > { %v6855_v23 = vadd.f32 %v1810_v36, %v1521_v41  ;;  %v2222_v39 = vadd.f32 %v2221_v59, %v1964_v63  ;;  %v2227_v41 = vadd.f32 %v2226_v15, %v1968_v18  ;;  %v1976_v63 = vunpack.c.l.bf16 %v6312_v10  ;;  %v6313_v18 = vld [vmem:[#allocation5 + $0x70] sm:$0xff] }
 0x1c9   : > { %v1523_v20 = vpop.f32.mrf.mxu0  ;;  %v1812_v37 = vpop.f32.mrf.mxu1  ;;  %v2231_v60 = vadd.f32 %v1971_v21, %v1970_v6  ;;  %v1977_v59 = vunpack.c.h.bf16 %v6312_v10  ;;  %v1978_v15 = vunpack.c.l.bf16 %v6313_v18  ;;  %v1979_v35 = vunpack.c.h.bf16 %v6313_v18 }
 0x1ca   : > { %v2223_v61 = vadd.f32 %v2222_v39, %v1965_v33  ;;  %v2228_v26 = vadd.f32 %v2227_v41, %v1969_v42  ;;  %v6315_v33 = vld [vmem:[#allocation5 + $0x80] sm:$0xff]  ;;  %v6269_v41 = vld [vmem:[#allocation8 + $0x90] sm:$0xff]  }
 0x1cb   : > { %v1526_v7 = vpop.f32.mrf.mxu0  ;;  %5737 = vmatmul.mubr.bf16.gmra.mxu0 %v6266_v43  ;;  %v1815_v56 = vpop.f32.mrf.mxu1  ;;  %v2232_v37 = vadd.f32 %v2231_v60, %v1972_v13  ;;  %v2236_v43 = vadd.f32 %v1975_v54, %v1974_v27  ;;  %v1982_v39 = vunpack.c.l.bf16 %v6315_v33  ;;  %v1983_v21 = vunpack.c.h.bf16 %v6315_v33 }
 0x1cc   : > { %5740 = vmatprep.mubr.bf16.mxu0 %v6267_v25  ;;  %v6859_v14 = vadd.f32 %v1815_v56, %v1526_v7  ;;  %2224 = vadd.xlane.f32.xlu1 %v2223_v61  ;;  %v6314_v25 = vld [vmem:[#allocation5 + $0x78] sm:$0xff]  ;;  %v6316_v7 = vld [vmem:[#allocation5 + $0x88] sm:$0xff]  ;;  %v2241_v61 = vadd.f32 %v1979_v35, %v1978_v15  ;;  %v1987_v33 = vunpack.c.h.bf16 %v6317_v4 }
 0x1cd   : > { %v1528_v36 = vpop.f32.mrf.mxu0  ;;  %v1817_v20 = vpop.f32.mrf.mxu1  ;;  %2229 = vadd.xlane.f32.xlu0 %v2228_v26  ;;  %v1980_v6 = vunpack.c.l.bf16 %v6314_v25  ;;  %v1984_v56 = vunpack.c.l.bf16 %v6316_v7  ;;  %v2233_v47 = vadd.f32 %v2232_v37, %v1973_v34  ;;  %v2237_v10 = vadd.f32 %v2236_v43, %v1976_v63  ;;  %v6318_v34 = vld [vmem:[#allocation5 + $0x98] sm:$0xff]  ;;  %v6319_v43 = vld [vmem:[#allocation5 + $0xa0] sm:$0xff] }
 0x1ce   : > { %7624 = vst [vmem:[#allocation18_spill] sm:$0xff] %v6859_v14  ;;  %v1981_v54 = vunpack.c.h.bf16 %v6314_v25  ;;  %v1985_v60 = vunpack.c.h.bf16 %v6316_v7  ;;  %v2246_v36 = vadd.f32 %v1983_v21, %v1982_v39  ;;  %v1988_v37 = vunpack.c.l.bf16 %v6318_v34 }
 0x1cf   : > { %v1529_v50 = vpop.f32.mrf.mxu0  ;;  %v1818_v42 = vpop.f32.mrf.mxu1  ;;  %v2238_v26 = vadd.f32 %v2237_v10, %v1977_v59  ;;  %v2242_v18 = vadd.f32 %v2241_v61, %v1980_v6  ;;  %v1990_v15 = vunpack.c.l.bf16 %v6319_v43  ;;  %v2251_v25 = vadd.f32 %v1987_v33, %v1986_v48  ;;  %v6320_v6 = vld [vmem:[#allocation5 + $0xa8] sm:$0xff]  ;;  %v6321_v61 = vld [vmem:[#allocation5 + $0xb0] sm:$0xff] }
 0x1d0   : > { %v6861_v13 = vadd.f32 %v1818_v42, %v1529_v50  ;;  %2234 = vadd.xlane.f32.xlu1 %v2233_v47  ;;  %v2247_v63 = vadd.f32 %v2246_v36, %v1984_v56  ;;  %v1991_v59 = vunpack.c.h.bf16 %v6319_v43  ;;  %v1992_v39 = vunpack.c.l.bf16 %v6320_v6 }
 0x1d1   : > { %v1531_v27 = vpop.f32.mrf.mxu0  ;;  %v1820_v20 = vpop.f32.mrf.mxu1  ;;  %2239 = vadd.xlane.f32.xlu0 %v2238_v26  ;;  %v2243_v50 = vadd.f32 %v2242_v18, %v1981_v54  ;;  %v1989_v42 = vunpack.c.h.bf16 %v6318_v34  ;;  %v1993_v47 = vunpack.c.h.bf16 %v6320_v6  ;;  %v2252_v56 = vadd.f32 %v2251_v25, %v1988_v37  ;;  %v6322_v54 = vld [vmem:[#allocation5 + $0xb8] sm:$0xff]  ;;  %v6323_v26 = vld [vmem:[#allocation5 + $0xc0] sm:$0xff] }
 0x1d2   : > { %7625 = vst [vmem:[#allocation19_spill] sm:$0xff] %v6861_v13  ;;  %v2248_v7 = vadd.f32 %v2247_v63, %v1985_v60  ;;  %v2256_v10 = vadd.f32 %v1991_v59, %v1990_v15  ;;  %v1994_v27 = vunpack.c.l.bf16 %v6321_v61  ;;  %v1995_v36 = vunpack.c.h.bf16 %v6321_v61  ;;  %v6270_v20 = vld [vmem:[#allocation8 + $0x98] sm:$0xff]   ;;  %v6272_v60 = vld [vmem:[#allocation8 + $0xa0] sm:$0xff]  }
 0x1d3   : > { %v1534_v9 = vpop.f32.mrf.mxu0  ;;  %5741 = vmatmul.mubr.bf16.gmra.mxu0 %v6268_v62  ;;  %v1823_v35 = vpop.f32.mrf.mxu1  ;;  %v1996_v48 = vunpack.c.l.bf16 %v6322_v54  ;;  %v1998_v18 = vunpack.c.l.bf16 %v6323_v26  ;;  %v1999_v33 = vunpack.c.h.bf16 %v6323_v26  ;;  %v2253_v63 = vadd.f32 %v2252_v56, %v1989_v42  ;;  %v6326_v42 = vld [vmem:[#allocation5 + $0xd8] sm:$0xff] }
 0x1d4   : > { %5744 = vmatprep.mubr.bf16.mxu0 %v6269_v41  ;;  %v6865_v21 = vadd.f32 %v1823_v35, %v1534_v9  ;;  %2244 = vadd.xlane.f32.xlu1 %v2243_v50  ;;  %v6324_v9 = vld [vmem:[#allocation5 + $0xc8] sm:$0xff]  ;;  %v2257_v34 = vadd.f32 %v2256_v10, %v1992_v39  ;;  %v2261_v50 = vadd.f32 %v1995_v36, %v1994_v27  ;;  %v1997_v25 = vunpack.c.h.bf16 %v6322_v54  ;;  %v6327_v10 = vld [vmem:[#allocation5 + $0xe0] sm:$0xff] }
 0x1d5   : > { %v1536_v4 = vpop.f32.mrf.mxu0  ;;  %v1825_v62 = vpop.f32.mrf.mxu1  ;;  %v2000_v43 = vunpack.c.l.bf16 %v6324_v9  ;;  %2249 = vadd.xlane.f32.xlu0 %v2248_v7  ;;  %v2001_v59 = vunpack.c.h.bf16 %v6324_v9  ;;  %v2266_v6 = vadd.f32 %v1999_v33, %v1998_v18  ;;  %v2002_v26 = vunpack.c.l.bf16 %v6325_v28 }
 0x1d6   : > { %7626 = vst [vmem:[#allocation20_spill] sm:$0xff] %v6865_v21  ;;  %v2258_v62 = vadd.f32 %v2257_v34, %v1993_v47  ;;  %v2262_v61 = vadd.f32 %v2261_v50, %v1996_v48  ;;  %v2003_v14 = vunpack.c.h.bf16 %v6325_v28  ;;  %v2004_v56 = vunpack.c.l.bf16 %v6326_v42  ;;  %v6328_v48 = vld [vmem:[#allocation5 + $0xe8] sm:$0xff]  ;;  %v6329_v50 = vld [vmem:[#allocation5 + $0xf0] sm:$0xff] }
 0x1d7   : > { %v1537_v41 = vpop.f32.mrf.mxu0  ;;  %v1826_v35 = vpop.f32.mrf.mxu1  ;;  %v2267_v39 = vadd.f32 %v2266_v6, %v2000_v43  ;;  %v2006_v27 = vunpack.c.l.bf16 %v6327_v10  ;;  %v2007_v47 = vunpack.c.h.bf16 %v6327_v10  ;;  %v2008_v18 = vunpack.c.l.bf16 %v6328_v48 }
 0x1d8   : > { %v6867_v37 = vadd.f32 %v1826_v35, %v1537_v41  ;;  %2254 = vadd.xlane.f32.xlu1 %v2253_v63  ;;  %v2263_v41 = vadd.f32 %v2262_v61, %v1997_v25  ;;  %v2271_v54 = vadd.f32 %v2003_v14, %v2002_v26  ;;  %v2005_v35 = vunpack.c.h.bf16 %v6326_v42  ;;  %v6330_v25 = vld [vmem:[#allocation5 + $0xf8] sm:$0xff] }
 0x1d9   : > { %v1539_v15 = vpop.f32.mrf.mxu0  ;;  %v1828_v4 = vpop.f32.mrf.mxu1  ;;  %2259 = vadd.xlane.f32.xlu0 %v2258_v62  ;;  %v2268_v9 = vadd.f32 %v2267_v39, %v2001_v59  ;;  %v2009_v63 = vunpack.c.h.bf16 %v6328_v48  ;;  %v2276_v34 = vadd.f32 %v2007_v47, %v2006_v27  ;;  %v2011_v6 = vunpack.c.h.bf16 %v6329_v50  ;;  %v6331_v62 = vld [vmem:[#allocation5 + $0x100] sm:$0xff]  ;;  %v6274_v59 = vld [vmem:[#allocation8 + $0xb0] sm:$0xff]  }
 0x1da   : > { %7627 = vst [vmem:[#allocation21_spill] sm:$0xff] %v6867_v37  ;;  %v2272_v43 = vadd.f32 %v2271_v54, %v2004_v56  ;;  %v2010_v15 = vunpack.c.l.bf16 %v6329_v50  ;;  %v6273_v4 = vld [vmem:[#allocation8 + $0xa8] sm:$0xff]   ;;  %v2012_v14 = vunpack.c.l.bf16 %v6330_v25  ;;  %v2014_v61 = vunpack.c.l.bf16 %v6331_v62 }
 0x1db   : > { %v1542_v7 = vpop.f32.mrf.mxu0  ;;  %5745 = vmatmul.mubr.bf16.gmra.mxu0 %v6270_v20  ;;  %v1831_v36 = vpop.f32.mrf.mxu1  ;;  %v2015_v26 = vunpack.c.h.bf16 %v6331_v62  ;;  %v2277_v42 = vadd.f32 %v2276_v34, %v2008_v18  ;;  %v2013_v54 = vunpack.c.h.bf16 %v6330_v25  ;;  %v6333_v62 = vld [vmem:[#allocation5 + $0x110] sm:$0xff] }
 0x1dc   : > { %5748 = vmatprep.mubr.bf16.mxu0 %v6272_v60  ;;  %v6871_v33 = vadd.f32 %v1831_v36, %v1542_v7  ;;  %2264 = vadd.xlane.f32.xlu1 %v2263_v41  ;;  %v6332_v7 = vld [vmem:[#allocation5 + $0x108] sm:$0xff]  ;;  %v2273_v39 = vadd.f32 %v2272_v43, %v2005_v35  ;;  %v2281_v41 = vadd.f32 %v2011_v6, %v2010_v15  ;;  %v2018_v21 = vunpack.c.l.bf16 %v6333_v62  ;;  %v6334_v43 = vld [vmem:[#allocation5 + $0x118] sm:$0xff]  ;;  %v6335_v15 = vld [vmem:[#allocation5 + $0x120] sm:$0xff] }
 0x1dd   : > { %v1544_v28 = vpop.f32.mrf.mxu0  ;;  %v1833_v20 = vpop.f32.mrf.mxu1  ;;  %v2016_v10 = vunpack.c.l.bf16 %v6332_v7  ;;  %2269 = vadd.xlane.f32.xlu0 %v2268_v9  ;;  %v2017_v47 = vunpack.c.h.bf16 %v6332_v7  ;;  %v2286_v48 = vadd.f32 %v2015_v26, %v2014_v61  ;;  %v2278_v50 = vadd.f32 %v2277_v42, %v2009_v63  ;;  %v6341_v9 = vld [vmem:[#allocation5 + $0x150] sm:$0xff] }
 0x1de   : > { %7628 = vst [vmem:[#allocation22_spill] sm:$0xff] %v6871_v33  ;;  %v6287_v20 = vld [vmem:[#allocation10 + $0x58] sm:$0xff]   ;;  %v2282_v13 = vadd.f32 %v2281_v41, %v2012_v14  ;;  %v2019_v37 = vunpack.c.h.bf16 %v6333_v62  ;;  %v2020_v34 = vunpack.c.l.bf16 %v6334_v43  ;;  %v2022_v6 = vunpack.c.l.bf16 %v6335_v15  ;;  %v6336_v14 = vld [vmem:[#allocation5 + $0x128] sm:$0xff]  ;;  %v6339_v62 = vld [vmem:[#allocation5 + $0x140] sm:$0xff] }
 0x1df   : > { %v1545_v60 = vpop.f32.mrf.mxu0  ;;  %v1834_v36 = vpop.f32.mrf.mxu1  ;;  %v2287_v18 = vadd.f32 %v2286_v48, %v2016_v10  ;;  %5844 = vmatprep.subr.bf16.mxu1 %v6287_v20  ;;  %v2023_v63 = vunpack.c.h.bf16 %v6335_v15  ;;  %v2024_v26 = vunpack.c.l.bf16 %v6336_v14  ;;  %v2025_v10 = vunpack.c.h.bf16 %v6336_v14  ;;  %v6337_v48 = vld [vmem:[#allocation5 + $0x130] sm:$0xff] }
 0x1e0   : > { %v6873_v56 = vadd.f32 %v1834_v36, %v1545_v60  ;;  %2274 = vadd.xlane.f32.xlu1 %v2273_v39  ;;  %v2283_v25 = vadd.f32 %v2282_v13, %v2013_v54  ;;  %v2291_v61 = vadd.f32 %v2019_v37, %v2018_v21  ;;  %5845 = vmatpush3.bf16.msra.mxu1 %v6287_v20  ;;  %v6275_v21 = vld [vmem:[#allocation8 + $0xb8] sm:$0xff]   ;;  %v2031_v15 = vunpack.c.h.bf16 %v6339_v62 }
 0x1e1   : > { %v1547_v27 = vpop.f32.mrf.mxu0  ;;  %v1836_v28 = vpop.f32.mrf.mxu1  ;;  %2279 = vadd.xlane.f32.xlu0 %v2278_v50  ;;  %v2288_v39 = vadd.f32 %v2287_v18, %v2017_v47  ;;  %v6338_v37 = vld [vmem:[#allocation5 + $0x138] sm:$0xff]  ;;  %v6276_v47 = vld [vmem:[#allocation8 + $0xc0] sm:$0xff]   ;;  %v2035_v33 = vunpack.c.h.bf16 %v6341_v9 }
 0x1e2   : > { %7629 = vst [vmem:[#allocation23_spill] sm:$0xff] %v6873_v56  ;;  %v2292_v41 = vadd.f32 %v2291_v61, %v2020_v34  ;;  %v2296_v27 = vadd.f32 %v2023_v63, %v2022_v6  ;;  %v2027_v28 = vunpack.c.h.bf16 %v6337_v48  ;;  %v2028_v54 = vunpack.c.l.bf16 %v6338_v37  ;;  %v6349_v56 = vld [vmem:[#allocation5 + $0x190] sm:$0xff] }
 0x1e3   : > { %v1550_v35 = vpop.f32.mrf.mxu0  ;;  %5749 = vmatmul.mubr.bf16.gmra.mxu0 %v6273_v4  ;;  %v1839_v60 = vpop.f32.mrf.mxu1  ;;  %v2021_v4 = vunpack.c.h.bf16 %v6334_v43  ;;  %v2029_v6 = vunpack.c.h.bf16 %v6338_v37 }
 0x1e4   : > { %5752 = vmatprep.mubr.bf16.mxu0 %v6274_v59  ;;  %v6877_v7 = vadd.f32 %v1839_v60, %v1550_v35  ;;  %2284 = vadd.xlane.f32.xlu1 %v2283_v25  ;;  %v2026_v59 = vunpack.c.l.bf16 %v6337_v48  ;;  %v2030_v35 = vunpack.c.l.bf16 %v6339_v62  ;;  %v6340_v60 = vld [vmem:[#allocation5 + $0x148] sm:$0xff]  ;;  %v2297_v43 = vadd.f32 %v2296_v27, %v2024_v26 }
 0x1e5   : > { %v1552_v36 = vpop.f32.mrf.mxu0  ;;  %v1841_v42 = vpop.f32.mrf.mxu1  ;;  %v2032_v20 = vunpack.c.l.bf16 %v6340_v60  ;;  %v2293_v18 = vadd.f32 %v2292_v41, %v2021_v4  ;;  %2289 = vadd.xlane.f32.xlu0 %v2288_v39  ;;  %v2033_v61 = vunpack.c.h.bf16 %v6340_v60  ;;  %v2034_v62 = vunpack.c.l.bf16 %v6341_v9  ;;  %v6342_v41 = vld [vmem:[#allocation5 + $0x158] sm:$0xff] }
 0x1e6   : > { %7630 = vst [vmem:[#allocation24_spill] sm:$0xff] %v6877_v7  ;;  %v2301_v14 = vadd.f32 %v2027_v28, %v2026_v59  ;;  %v2306_v63 = vadd.f32 %v2031_v15, %v2030_v35  ;;  %v2298_v42 = vadd.f32 %v2297_v43, %v2025_v10  ;;  %v2036_v27 = vunpack.c.l.bf16 %v6342_v41  ;;  %v6343_v59 = vld [vmem:[#allocation5 + $0x160] sm:$0xff]  ;;  %v6344_v10 = vld [vmem:[#allocation5 + $0x168] sm:$0xff] }
 0x1e7   : > { %v1553_v13 = vpop.f32.mrf.mxu0  ;;  %v1842_v50 = vpop.f32.mrf.mxu1  ;;  %v2038_v39 = vunpack.c.l.bf16 %v6343_v59  ;;  %v2311_v37 = vadd.f32 %v2035_v33, %v2034_v62  ;;  %v2039_v35 = vunpack.c.h.bf16 %v6343_v59  ;;  %v6346_v33 = vld [vmem:[#allocation5 + $0x178] sm:$0xff]  ;;  %v6348_v59 = vld [vmem:[#allocation5 + $0x188] sm:$0xff]  ;;  %v2051_v7 = vunpack.c.h.bf16 %v6349_v56 }
 0x1e8   : > { %v6879_v25 = vadd.f32 %v1842_v50, %v1553_v13  ;;  %2294 = vadd.xlane.f32.xlu1 %v2293_v18  ;;  %v2302_v48 = vadd.f32 %v2301_v14, %v2028_v54  ;;  %v2307_v26 = vadd.f32 %v2306_v63, %v2032_v20  ;;  %v2040_v54 = vunpack.c.l.bf16 %v6344_v10  ;;  %v6345_v14 = vld [vmem:[#allocation5 + $0x170] sm:$0xff] }
 0x1e9   : > { %v1555_v34 = vpop.f32.mrf.mxu0  ;;  %v1844_v36 = vpop.f32.mrf.mxu1  ;;  %2299 = vadd.xlane.f32.xlu0 %v2298_v42  ;;  %v2037_v50 = vunpack.c.h.bf16 %v6342_v41  ;;  %v2041_v18 = vunpack.c.h.bf16 %v6344_v10  ;;  %v2312_v20 = vadd.f32 %v2311_v37, %v2036_v27  ;;  %v2316_v43 = vadd.f32 %v2039_v35, %v2038_v39 }
 0x1ea   : > { %7631 = vst [vmem:[#allocation25_spill] sm:$0xff] %v6879_v25  ;;  %v2303_v13 = vadd.f32 %v2302_v48, %v2029_v6  ;;  %v2308_v60 = vadd.f32 %v2307_v26, %v2033_v61  ;;  %v2042_v34 = vunpack.c.l.bf16 %v6345_v14  ;;  %v2043_v63 = vunpack.c.h.bf16 %v6345_v14  ;;  %v6277_v6 = vld [vmem:[#allocation8 + $0xc8] sm:$0xff]   ;;  %v6347_v48 = vld [vmem:[#allocation5 + $0x180] sm:$0xff]  ;;  %v6278_v61 = vld [vmem:[#allocation8 + $0xd0] sm:$0xff]  }
 0x1eb   : > { %v1558_v4 = vpop.f32.mrf.mxu0  ;;  %5753 = vmatmul.mubr.bf16.gmra.mxu0 %v6275_v21  ;;  %v1847_v28 = vpop.f32.mrf.mxu1  ;;  %v2044_v36 = vunpack.c.l.bf16 %v6346_v33  ;;  %v2046_v62 = vunpack.c.l.bf16 %v6347_v48  ;;  %v2313_v26 = vadd.f32 %v2312_v20, %v2037_v50  ;;  %v2317_v41 = vadd.f32 %v2316_v43, %v2040_v54  ;;  %v6350_v20 = vld [vmem:[#allocation5 + $0x198] sm:$0xff]  ;;  %v6357_v25 = vld [vmem:[#allocation5 + $0x1d0] sm:$0xff] }
 0x1ec   : > { %5756 = vmatprep.mubr.bf16.mxu0 %v6276_v47  ;;  %v6883_v15 = vadd.f32 %v1847_v28, %v1558_v4  ;;  %2304 = vadd.xlane.f32.xlu1 %v2303_v13  ;;  %v2047_v4 = vunpack.c.h.bf16 %v6347_v48  ;;  %v2048_v28 = vunpack.c.l.bf16 %v6348_v59  ;;  %v2321_v10 = vadd.f32 %v2043_v63, %v2042_v34  ;;  %v6351_v34 = vld [vmem:[#allocation5 + $0x1a0] sm:$0xff] }
 0x1ed   : > { %v1560_v9 = vpop.f32.mrf.mxu0  ;;  %v1849_v21 = vpop.f32.mrf.mxu1  ;;  %2309 = vadd.xlane.f32.xlu0 %v2308_v60  ;;  %v2045_v39 = vunpack.c.h.bf16 %v6346_v33  ;;  %v2049_v37 = vunpack.c.h.bf16 %v6348_v59  ;;  %v2050_v48 = vunpack.c.l.bf16 %v6349_v56  ;;  %v2052_v43 = vunpack.c.l.bf16 %v6350_v20 }
 0x1ee   : > { %7632 = vst [vmem:[#allocation26_spill] sm:$0xff] %v6883_v15  ;;  %v2326_v35 = vadd.f32 %v2047_v4, %v2046_v62  ;;  %v2318_v21 = vadd.f32 %v2317_v41, %v2041_v18  ;;  %v2322_v14 = vadd.f32 %v2321_v10, %v2044_v36  ;;  %v2054_v60 = vunpack.c.l.bf16 %v6351_v34  ;;  %v6352_v18 = vld [vmem:[#allocation5 + $0x1a8] sm:$0xff]  ;;  %v6353_v10 = vld [vmem:[#allocation5 + $0x1b0] sm:$0xff] }
 0x1ef   : > { %v1561_v47 = vpop.f32.mrf.mxu0  ;;  %v1850_v42 = vpop.f32.mrf.mxu1  ;;  %v2331_v33 = vadd.f32 %v2051_v7, %v2050_v48  ;;  %v2055_v62 = vunpack.c.h.bf16 %v6351_v34  ;;  %v2056_v36 = vunpack.c.l.bf16 %v6352_v18  ;;  %v6354_v7 = vld [vmem:[#allocation5 + $0x1b8] sm:$0xff]  ;;  %v6356_v34 = vld [vmem:[#allocation5 + $0x1c8] sm:$0xff]  ;;  %v2067_v15 = vunpack.c.h.bf16 %v6357_v25 }
 0x1f0   : > { %v6885_v13 = vadd.f32 %v1850_v42, %v1561_v47  ;;  %2314 = vadd.xlane.f32.xlu1 %v2313_v26  ;;  %v2327_v54 = vadd.f32 %v2326_v35, %v2048_v28  ;;  %v2323_v47 = vadd.f32 %v2322_v14, %v2045_v39  ;;  %v2053_v42 = vunpack.c.h.bf16 %v6350_v20  ;;  %v6279_v39 = vld [vmem:[#allocation8 + $0xd8] sm:$0xff]   ;;  %v6355_v14 = vld [vmem:[#allocation5 + $0x1c0] sm:$0xff] }
 0x1f1   : > { %v1563_v27 = vpop.f32.mrf.mxu0  ;;  %v1852_v9 = vpop.f32.mrf.mxu1  ;;  %2319 = vadd.xlane.f32.xlu0 %v2318_v21  ;;  %v2057_v26 = vunpack.c.h.bf16 %v6352_v18  ;;  %v2332_v28 = vadd.f32 %v2331_v33, %v2052_v43  ;;  %v2336_v41 = vadd.f32 %v2055_v62, %v2054_v60  ;;  %v2059_v35 = vunpack.c.h.bf16 %v6353_v10 }
 0x1f2   : > { %7633 = vst [vmem:[#allocation27_spill] sm:$0xff] %v6885_v13  ;;  %v2328_v59 = vadd.f32 %v2327_v54, %v2049_v37  ;;  %v2058_v27 = vunpack.c.l.bf16 %v6353_v10  ;;  %v2060_v9 = vunpack.c.l.bf16 %v6354_v7  ;;  %v2062_v48 = vunpack.c.l.bf16 %v6355_v14  ;;  %v6281_v37 = vld [vmem:[#allocation8 + $0xe0] sm:$0xff]  }
 0x1f3   : > { %v1566_v50 = vpop.f32.mrf.mxu0  ;;  %5757 = vmatmul.mubr.bf16.gmra.mxu0 %v6277_v6  ;;  %v1855_v63 = vpop.f32.mrf.mxu1  ;;  %v2333_v54 = vadd.f32 %v2332_v28, %v2053_v42  ;;  %v2337_v20 = vadd.f32 %v2336_v41, %v2056_v36  ;;  %v2061_v60 = vunpack.c.h.bf16 %v6354_v7  ;;  %v2065_v33 = vunpack.c.h.bf16 %v6356_v34  ;;  %v6358_v28 = vld [vmem:[#allocation5 + $0x1d8] sm:$0xff] }
 0x1f4   : > { %5760 = vmatprep.mubr.bf16.mxu0 %v6278_v61  ;;  %v6889_v4 = vadd.f32 %v1855_v63, %v1566_v50  ;;  %2324 = vadd.xlane.f32.xlu1 %v2323_v47  ;;  %v2063_v50 = vunpack.c.h.bf16 %v6355_v14  ;;  %v2064_v63 = vunpack.c.l.bf16 %v6356_v34  ;;  %v2341_v18 = vadd.f32 %v2059_v35, %v2058_v27  ;;  %v6359_v27 = vld [vmem:[#allocation5 + $0x1e0] sm:$0xff] }
 0x1f5   : > { %v1568_v56 = vpop.f32.mrf.mxu0  ;;  %v1857_v6 = vpop.f32.mrf.mxu1  ;;  %2329 = vadd.xlane.f32.xlu0 %v2328_v59  ;;  %v2066_v14 = vunpack.c.l.bf16 %v6357_v25  ;;  %v2068_v41 = vunpack.c.l.bf16 %v6358_v28  ;;  %v2070_v59 = vunpack.c.l.bf16 %v6359_v27 }
 0x1f6   : > { %7634 = vst [vmem:[#allocation28_spill] sm:$0xff] %v6889_v4  ;;  %v2346_v62 = vadd.f32 %v2063_v50, %v2062_v48  ;;  %v2338_v6 = vadd.f32 %v2337_v20, %v2057_v26  ;;  %v2342_v10 = vadd.f32 %v2341_v18, %v2060_v9  ;;  %v2071_v48 = vunpack.c.h.bf16 %v6359_v27  ;;  %v6360_v26 = vld [vmem:[#allocation5 + $0x1e8] sm:$0xff]  ;;  %v6361_v18 = vld [vmem:[#allocation5 + $0x1f0] sm:$0xff] }
 0x1f7   : > { %v1569_v61 = vpop.f32.mrf.mxu0  ;;  %v1858_v21 = vpop.f32.mrf.mxu1  ;;  %v2351_v7 = vadd.f32 %v2067_v15, %v2066_v14  ;;  %v2072_v9 = vunpack.c.l.bf16 %v6360_v26  ;;  %v6362_v15 = vld [vmem:[#allocation5 + $0x1f8] sm:$0xff]  ;;  %v6364_v27 = vld [vmem:[#allocation5 + $0x208] sm:$0xff] }
 0x1f8   : > { %v6891_v47 = vadd.f32 %v1858_v21, %v1569_v61  ;;  %2334 = vadd.xlane.f32.xlu1 %v2333_v54  ;;  %v2347_v36 = vadd.f32 %v2346_v62, %v2064_v63  ;;  %v2343_v61 = vadd.f32 %v2342_v10, %v2061_v60  ;;  %v2069_v21 = vunpack.c.h.bf16 %v6358_v28  ;;  %v6282_v60 = vld [vmem:[#allocation8 + $0xe8] sm:$0xff]   ;;  %v6363_v10 = vld [vmem:[#allocation5 + $0x200] sm:$0xff] }
 0x1f9   : > { %v1571_v43 = vpop.f32.mrf.mxu0  ;;  %v1860_v56 = vpop.f32.mrf.mxu1  ;;  %2339 = vadd.xlane.f32.xlu0 %v2338_v6  ;;  %v2073_v54 = vunpack.c.h.bf16 %v6360_v26  ;;  %v2352_v63 = vadd.f32 %v2351_v7, %v2068_v41  ;;  %v2356_v20 = vadd.f32 %v2071_v48, %v2070_v59  ;;  %v2075_v62 = vunpack.c.h.bf16 %v6361_v18 }
 0x1fa   : > { %7635 = vst [vmem:[#allocation29_spill] sm:$0xff] %v6891_v47  ;;  %v2348_v34 = vadd.f32 %v2347_v36, %v2065_v33  ;;  %v2074_v43 = vunpack.c.l.bf16 %v6361_v18  ;;  %v2076_v56 = vunpack.c.l.bf16 %v6362_v15  ;;  %v2078_v14 = vunpack.c.l.bf16 %v6363_v10  ;;  %v6283_v33 = vld [vmem:[#allocation8 + $0xf0] sm:$0xff]  }
 0x1fb   : > { %v1574_v42 = vpop.f32.mrf.mxu0  ;;  %5761 = vmatmul.mubr.bf16.gmra.mxu0 %v6279_v39  ;;  %v1863_v35 = vpop.f32.mrf.mxu1  ;;  %v2353_v36 = vadd.f32 %v2352_v63, %v2069_v21  ;;  %v2357_v28 = vadd.f32 %v2356_v20, %v2072_v9  ;;  %v2077_v59 = vunpack.c.h.bf16 %v6362_v15  ;;  %v2081_v7 = vunpack.c.h.bf16 %v6364_v27  ;;  %v6366_v20 = vld [vmem:[#allocation5 + $0x218] sm:$0xff] }
 0x1fc   : > { %5764 = vmatprep.mubr.bf16.mxu0 %v6281_v37  ;;  %v6895_v50 = vadd.f32 %v1863_v35, %v1574_v42  ;;  %2344 = vadd.xlane.f32.xlu1 %v2343_v61  ;;  %v2079_v42 = vunpack.c.h.bf16 %v6363_v10  ;;  %v2080_v35 = vunpack.c.l.bf16 %v6364_v27  ;;  %v2361_v26 = vadd.f32 %v2075_v62, %v2074_v43  ;;  %v6365_v10 = vld [vmem:[#allocation5 + $0x210] sm:$0xff] }
 0x1fd   : > { %v1576_v25 = vpop.f32.mrf.mxu0  ;;  %v1865_v39 = vpop.f32.mrf.mxu1  ;;  %2349 = vadd.xlane.f32.xlu0 %v2348_v34  ;;  %v2358_v18 = vadd.f32 %v2357_v28, %v2073_v54  ;;  %v2082_v4 = vunpack.c.l.bf16 %v6365_v10  ;;  %v2083_v47 = vunpack.c.h.bf16 %v6365_v10  ;;  %v2084_v43 = vunpack.c.l.bf16 %v6366_v20  ;;  %v6367_v34 = vld [vmem:[#allocation5 + $0x220] sm:$0xff] }
 0x1fe   : > { %7636 = vst [vmem:[#allocation30_spill] sm:$0xff] %v6895_v50  ;;  %v2366_v48 = vadd.f32 %v2079_v42, %v2078_v14  ;;  %v6288_v39 = vld [vmem:[#allocation10 + $0x50] sm:$0xff]   ;;  %v2362_v13 = vadd.f32 %v2361_v26, %v2076_v56  ;;  %v2086_v62 = vunpack.c.l.bf16 %v6367_v34  ;;  %v2087_v54 = vunpack.c.h.bf16 %v6367_v34  ;;  %v6368_v56 = vld [vmem:[#allocation5 + $0x228] sm:$0xff]  ;;  %v6371_v10 = vld [vmem:[#allocation5 + $0x240] sm:$0xff] }
 0x1ff   : > { %v1577_v37 = vpop.f32.mrf.mxu0  ;;  %v1866_v6 = vpop.f32.mrf.mxu1  ;;  %5846 = vmatprep.subr.bf16.mxu1 %v6288_v39  ;;  %v2371_v14 = vadd.f32 %v2083_v47, %v2082_v4  ;;  %v2088_v42 = vunpack.c.l.bf16 %v6368_v56  ;;  %v6284_v4 = vld [vmem:[#allocation8 + $0xf8] sm:$0xff]   ;;  %v2095_v34 = vunpack.c.h.bf16 %v6371_v10 }
 0x200   : > { %v6897_v61 = vadd.f32 %v1866_v6, %v1577_v37  ;;  %2354 = vadd.xlane.f32.xlu1 %v2353_v36  ;;  %v2367_v63 = vadd.f32 %v2366_v48, %v2080_v35  ;;  %v2363_v15 = vadd.f32 %v2362_v13, %v2077_v59  ;;  %5847 = vmatpush3.bf16.msra.mxu1 %v6288_v39  ;;  %v2089_v35 = vunpack.c.h.bf16 %v6368_v56  ;;  %v6369_v48 = vld [vmem:[#allocation5 + $0x230] sm:$0xff]  ;;  %v6370_v47 = vld [vmem:[#allocation5 + $0x238] sm:$0xff] }
 0x201   : > { %v1579_v41 = vpop.f32.mrf.mxu0  ;;  %v1868_v25 = vpop.f32.mrf.mxu1  ;;  %2359 = vadd.xlane.f32.xlu0 %v2358_v18  ;;  %v2372_v26 = vadd.f32 %v2371_v14, %v2084_v43  ;;  %v2092_v59 = vunpack.c.l.bf16 %v6370_v47 }
 0x202   : > { %v2368_v36 = vadd.f32 %v2367_v63, %v2081_v7  ;;  %v2376_v41 = vadd.f32 %v2087_v54, %v2086_v62  ;;  %v2091_v25 = vunpack.c.h.bf16 %v6369_v48  ;;  %v2093_v62 = vunpack.c.h.bf16 %v6370_v47 }
 0x203   : > { %v1582_v9 = vpop.f32.mrf.mxu0  ;;  %5765 = vmatmul.mubr.bf16.gmra.mxu0 %v6282_v60  ;;  %v1871_v37 = vpop.f32.mrf.mxu1  ;;  %v2085_v60 = vunpack.c.h.bf16 %v6366_v20 }
 0x204   : > { %5768 = vmatprep.mubr.bf16.mxu0 %v6283_v33  ;;  %v6901_v27 = vadd.f32 %v1871_v37, %v1582_v9  ;;  %2364 = vadd.xlane.f32.xlu1 %v2363_v15  ;;  %v2090_v33 = vunpack.c.l.bf16 %v6369_v48  ;;  %v2094_v9 = vunpack.c.l.bf16 %v6371_v10  ;;  %v6372_v37 = vld [vmem:[#allocation5 + $0x248] sm:$0xff]  ;;  %v2377_v63 = vadd.f32 %v2376_v41, %v2088_v42  ;;  %v6373_v48 = vld [vmem:[#allocation5 + $0x250] sm:$0xff] }
 0x205   : > { %v1584_v6 = vpop.f32.mrf.mxu0  ;;  %v1873_v28 = vpop.f32.mrf.mxu1  ;;  %v2096_v39 = vunpack.c.l.bf16 %v6372_v37  ;;  %v2373_v7 = vadd.f32 %v2372_v26, %v2085_v60  ;;  %2369 = vadd.xlane.f32.xlu0 %v2368_v36  ;;  %v2097_v15 = vunpack.c.h.bf16 %v6372_v37  ;;  %v2098_v21 = vunpack.c.l.bf16 %v6373_v48  ;;  %v6374_v26 = vld [vmem:[#allocation5 + $0x258] sm:$0xff] }
 0x206   : > { %v2381_v20 = vadd.f32 %v2091_v25, %v2090_v33  ;;  %v2386_v14 = vadd.f32 %v2095_v34, %v2094_v9  ;;  %v2378_v6 = vadd.f32 %v2377_v63, %v2089_v35  ;;  %v2099_v10 = vunpack.c.h.bf16 %v6373_v48  ;;  %v6375_v33 = vld [vmem:[#allocation5 + $0x260] sm:$0xff]  ;;  %v6376_v9 = vld [vmem:[#allocation5 + $0x268] sm:$0xff] }
 0x207   : > { %v1585_v13 = vpop.f32.mrf.mxu0  ;;  %v1874_v18 = vpop.f32.mrf.mxu1  ;;  %v2100_v41 = vunpack.c.l.bf16 %v6374_v26  ;;  %v2102_v36 = vunpack.c.l.bf16 %v6375_v33  ;;  %v2104_v34 = vunpack.c.l.bf16 %v6376_v9 }
 0x208   : > { %v6903_v56 = vadd.f32 %v1874_v18, %v1585_v13  ;;  %2374 = vadd.xlane.f32.xlu1 %v2373_v7  ;;  %v2382_v28 = vadd.f32 %v2381_v20, %v2092_v59  ;;  %v2387_v42 = vadd.f32 %v2386_v14, %v2096_v39  ;;  %v7637_v13 = vpack.c.bf16 %v6771_v5, %v6769_v57  ;;  %v6377_v14 = vld [vmem:[#allocation5 + $0x270] sm:$0xff] }
 0x209   : > { %v1587_v43 = vpop.f32.mrf.mxu0  ;;  %v1876_v54 = vpop.f32.mrf.mxu1  ;;  %v2391_v47 = vadd.f32 %v2099_v10, %v2098_v21  ;;  %v2103_v59 = vunpack.c.h.bf16 %v6375_v33  ;;  %2379 = vadd.xlane.f32.xlu0 %v2378_v6  ;;  %v2101_v39 = vunpack.c.h.bf16 %v6374_v26  ;;  %v2105_v7 = vunpack.c.h.bf16 %v6376_v9 }
 0x20a   : > { %v2616_v50 = vpack.c.bf16 %v6903_v56, %v6901_v27  ;;  %v2383_v35 = vadd.f32 %v2382_v28, %v2093_v62  ;;  %v2106_v54 = vunpack.c.l.bf16 %v6377_v14  ;;  %v2107_v57 = vunpack.c.h.bf16 %v6377_v14  ;;  %v6378_v62 = vld [vmem:[#allocation5 + $0x278] sm:$0xff]  ;;  %v6379_v28 = vld [vmem:[#allocation5 + $0x280] sm:$0xff] }
 0x20b   : > { %v1590_v60 = vpop.f32.mrf.mxu0  ;;  %5769 = vmatmul.mubr.bf16.gmra.mxu0 %v6284_v4  ;;  %v1879_v25 = vpop.f32.mrf.mxu1  ;;  %v2388_v4 = vadd.f32 %v2387_v42, %v2097_v15  ;;  %v2392_v20 = vadd.f32 %v2391_v47, %v2100_v41  ;;  %v2396_v43 = vadd.f32 %v2103_v59, %v2102_v36  ;;  %v2108_v21 = vunpack.c.l.bf16 %v6378_v62 }
 0x20c   : > { %5772 = vmatprep.mubr.bf16.mxu0 %v7637_v13  ;;  %v6910_v37 = vadd.f32 %v1879_v25, %v1590_v60  ;;  %2384 = vadd.xlane.f32.xlu1 %v2383_v35  ;;  %v2110_v48 = vunpack.c.l.bf16 %v6379_v28  ;;  %v2111_v10 = vunpack.c.h.bf16 %v6379_v28  ;;  %v6380_v60 = vld [vmem:[#allocation5 + $0x288] sm:$0xff]  ;;  %v2401_v42 = vadd.f32 %v2107_v57, %v2106_v54  ;;  %v6383_v54 = vld [vmem:[#allocation5 + $0x2a0] sm:$0xff] }
 0x20d   : > { %v1592_v18 = vpop.f32.mrf.mxu0  ;;  %v1881_v63 = vpop.f32.mrf.mxu1  ;;  %v2112_v33 = vunpack.c.l.bf16 %v6380_v60  ;;  %v2393_v6 = vadd.f32 %v2392_v20, %v2101_v39  ;;  %v2397_v15 = vadd.f32 %v2396_v43, %v2104_v34  ;;  %2389 = vadd.xlane.f32.xlu0 %v2388_v4  ;;  %v2109_v41 = vunpack.c.h.bf16 %v6378_v62  ;;  %v6382_v4 = vld [vmem:[#allocation5 + $0x298] sm:$0xff] }
 0x20e   : > { %v2113_v36 = vunpack.c.h.bf16 %v6380_v60  ;;  %v2406_v35 = vadd.f32 %v2111_v10, %v2110_v48  ;;  %v2402_v9 = vadd.f32 %v2401_v42, %v2108_v21  ;;  %v6381_v18 = vld [vmem:[#allocation5 + $0x290] sm:$0xff]  ;;  %v7638_v34 = vpack.c.bf16 %v6777_v24, %v6775_v12  ;;  %v6384_v10 = vld [vmem:[#allocation5 + $0x2a8] sm:$0xff] }
 0x20f   : > { %v1593_v5 = vpop.f32.mrf.mxu0  ;;  %v1882_v25 = vpop.f32.mrf.mxu1  ;;  %v2398_v59 = vadd.f32 %v2397_v15, %v2105_v7  ;;  %v2114_v63 = vunpack.c.l.bf16 %v6381_v18  ;;  %v2115_v14 = vunpack.c.h.bf16 %v6381_v18  ;;  %v2116_v43 = vunpack.c.l.bf16 %v6382_v4  ;;  %v6387_v18 = vld [vmem:[#allocation5 + $0x2c0] sm:$0xff] }
 0x210   : > { %v6912_v26 = vadd.f32 %v1882_v25, %v1593_v5  ;;  %2394 = vadd.xlane.f32.xlu1 %v2393_v6  ;;  %v2407_v20 = vadd.f32 %v2406_v35, %v2112_v33  ;;  %v2118_v57 = vunpack.c.l.bf16 %v6383_v54  ;;  %v7639_v7 = vpack.c.bf16 %v6783_v44, %v6781_v32  ;;  %v6385_v35 = vld [vmem:[#allocation5 + $0x2b0] sm:$0xff] }
 0x211   : > { %v1595_v13 = vpop.f32.mrf.mxu0  ;;  %v1884_v47 = vpop.f32.mrf.mxu1  ;;  %v2403_v62 = vadd.f32 %v2402_v9, %v2109_v41  ;;  %v2411_v21 = vadd.f32 %v2115_v14, %v2114_v63  ;;  %v2119_v48 = vunpack.c.h.bf16 %v6383_v54  ;;  %v2120_v60 = vunpack.c.l.bf16 %v6384_v10  ;;  %2399 = vadd.xlane.f32.xlu0 %v2398_v59  ;;  %v6386_v41 = vld [vmem:[#allocation5 + $0x2b8] sm:$0xff] }
 0x212   : > { %v2617_v28 = vpack.c.bf16 %v6912_v26, %v6910_v37  ;;  %v2408_v12 = vadd.f32 %v2407_v20, %v2113_v36  ;;  %v2117_v24 = vunpack.c.h.bf16 %v6382_v4  ;;  %v2121_v33 = vunpack.c.h.bf16 %v6384_v10  ;;  %v6389_v10 = vld [vmem:[#allocation5 + $0x2d0] sm:$0xff] }
 0x213   : > { %v1598_v39 = vpop.f32.mrf.mxu0  ;;  %5773 = vmatmul.mubr.bf16.gmra.mxu0 %v7638_v34  ;;  %v1887_v5 = vpop.f32.mrf.mxu1  ;;  %v2412_v42 = vadd.f32 %v2411_v21, %v2116_v43  ;;  %v2416_v13 = vadd.f32 %v2119_v48, %v2118_v57  ;;  %v2122_v47 = vunpack.c.l.bf16 %v6385_v35  ;;  %v2123_v32 = vunpack.c.h.bf16 %v6385_v35 }
 0x214   : > { %5776 = vmatprep.mubr.bf16.mxu0 %v7639_v7  ;;  %v6922_v25 = vadd.f32 %v1887_v5, %v1598_v39  ;;  %2404 = vadd.xlane.f32.xlu1 %v2403_v62  ;;  %v2124_v9 = vunpack.c.l.bf16 %v6386_v41  ;;  %v2126_v63 = vunpack.c.l.bf16 %v6387_v18  ;;  %v2127_v14 = vunpack.c.h.bf16 %v6387_v18  ;;  %v6388_v39 = vld [vmem:[#allocation5 + $0x2c8] sm:$0xff] }
 0x215   : > { %v1600_v6 = vpop.f32.mrf.mxu0  ;;  %v1889_v15 = vpop.f32.mrf.mxu1  ;;  %v2128_v34 = vunpack.c.l.bf16 %v6388_v39  ;;  %v2413_v59 = vadd.f32 %v2412_v42, %v2117_v24  ;;  %v2417_v36 = vadd.f32 %v2416_v13, %v2120_v60  ;;  %v2421_v20 = vadd.f32 %v2123_v32, %v2122_v47  ;;  %2409 = vadd.xlane.f32.xlu0 %v2408_v12  ;;  %v6390_v12 = vld [vmem:[#allocation5 + $0x2d8] sm:$0xff]  ;;  %v6391_v47 = vld [vmem:[#allocation5 + $0x2e0] sm:$0xff] }
 0x216   : > { %v2125_v43 = vunpack.c.h.bf16 %v6386_v41  ;;  %v2129_v57 = vunpack.c.h.bf16 %v6388_v39  ;;  %v2426_v7 = vadd.f32 %v2127_v14, %v2126_v63  ;;  %v2130_v6 = vunpack.c.l.bf16 %v6389_v10  ;;  %v6392_v63 = vld [vmem:[#allocation5 + $0x2e8] sm:$0xff] }
 0x217   : > { %v1601_v44 = vpop.f32.mrf.mxu0  ;;  %v1890_v54 = vpop.f32.mrf.mxu1  ;;  %v2418_v21 = vadd.f32 %v2417_v36, %v2121_v33  ;;  %v2422_v48 = vadd.f32 %v2421_v20, %v2124_v9  ;;  %v2131_v15 = vunpack.c.h.bf16 %v6389_v10  ;;  %v7640_v60 = vpack.c.bf16 %v6789_v0, %v6787_v51 }
 0x218   : > { %v6924_v4 = vadd.f32 %v1890_v54, %v1601_v44  ;;  %2414 = vadd.xlane.f32.xlu1 %v2413_v59  ;;  %v2427_v42 = vadd.f32 %v2426_v7, %v2128_v34  ;;  %v2132_v13 = vunpack.c.l.bf16 %v6390_v12  ;;  %v2134_v32 = vunpack.c.l.bf16 %v6391_v47 }
 0x219   : > { %v1603_v5 = vpop.f32.mrf.mxu0  ;;  %v1892_v62 = vpop.f32.mrf.mxu1  ;;  %v7641_v33 = vpack.c.bf16 %v6795_v22, %v6793_v8  ;;  %v2423_v41 = vadd.f32 %v2422_v48, %v2125_v43  ;;  %v2431_v9 = vadd.f32 %v2131_v15, %v2130_v6  ;;  %v2135_v18 = vunpack.c.h.bf16 %v6391_v47  ;;  %2419 = vadd.xlane.f32.xlu0 %v2418_v21  ;;  %v6394_v43 = vld [vmem:[#allocation5 + $0x2f8] sm:$0xff]  ;;  %v6395_v48 = vld [vmem:[#allocation5 + $0x300] sm:$0xff]  ;;  %v6396_v15 = vld [vmem:[#allocation5 + $0x308] sm:$0xff] }
 0x21a   : > { %v2618_v35 = vpack.c.bf16 %v6924_v4, %v6922_v25  ;;  %v2136_v14 = vunpack.c.l.bf16 %v6392_v63  ;;  %v2428_v51 = vadd.f32 %v2427_v42, %v2129_v57  ;;  %v2133_v0 = vunpack.c.h.bf16 %v6390_v12  ;;  %v6393_v5 = vld [vmem:[#allocation5 + $0x2f0] sm:$0xff] }
 0x21b   : > { %v1606_v24 = vpop.f32.mrf.mxu0  ;;  %5777 = vmatmul.mubr.bf16.gmra.mxu0 %v7640_v60  ;;  %v1895_v44 = vpop.f32.mrf.mxu1  ;;  %v2137_v34 = vunpack.c.h.bf16 %v6392_v63  ;;  %v2432_v36 = vadd.f32 %v2431_v9, %v2132_v13  ;;  %v2436_v20 = vadd.f32 %v2135_v18, %v2134_v32  ;;  %v2138_v7 = vunpack.c.l.bf16 %v6393_v5  ;;  %v6397_v63 = vld [vmem:[#allocation5 + $0x310] sm:$0xff] }
 0x21c   : > { %5780 = vmatprep.mubr.bf16.mxu0 %v7641_v33  ;;  %v6934_v39 = vadd.f32 %v1895_v44, %v1606_v24  ;;  %2424 = vadd.xlane.f32.xlu1 %v2423_v41  ;;  %v2139_v8 = vunpack.c.h.bf16 %v6393_v5  ;;  %v2140_v62 = vunpack.c.l.bf16 %v6394_v43  ;;  %v2142_v10 = vunpack.c.l.bf16 %v6395_v48  ;;  %v6289_v41 = vld [vmem:[#allocation10 + $0x48] sm:$0xff]  }
 0x21d   : > { %v1608_v54 = vpop.f32.mrf.mxu0  ;;  %v1897_v59 = vpop.f32.mrf.mxu1  ;;  %v2143_v6 = vunpack.c.h.bf16 %v6395_v48  ;;  %v2144_v24 = vunpack.c.l.bf16 %v6396_v15  ;;  %v2433_v21 = vadd.f32 %v2432_v36, %v2133_v0  ;;  %v2437_v57 = vadd.f32 %v2436_v20, %v2136_v14  ;;  %2429 = vadd.xlane.f32.xlu0 %v2428_v51  ;;  %v6398_v20 = vld [vmem:[#allocation5 + $0x318] sm:$0xff]  ;;  %5848 = vmatprep.subr.bf16.mxu1 %v6289_v41 }
 0x21e   : > { %v2441_v42 = vadd.f32 %v2139_v8, %v2138_v7  ;;  %v2141_v13 = vunpack.c.h.bf16 %v6394_v43  ;;  %v2145_v32 = vunpack.c.h.bf16 %v6396_v15  ;;  %v2146_v54 = vunpack.c.l.bf16 %v6397_v63  ;;  %v6399_v7 = vld [vmem:[#allocation5 + $0x320] sm:$0xff]  ;;  %5849 = vmatpush3.bf16.msra.mxu1 %v6289_v41 }
 0x21f   : > { %v1609_v22 = vpop.f32.mrf.mxu0  ;;  %v1898_v60 = vpop.f32.mrf.mxu1  ;;  %v2446_v44 = vadd.f32 %v2143_v6, %v2142_v10  ;;  %v2438_v9 = vadd.f32 %v2437_v57, %v2137_v34  ;;  %v2147_v59 = vunpack.c.h.bf16 %v6397_v63  ;;  %v7642_v36 = vpack.c.bf16 %v6801_v45, %v6799_v31  ;;  %v6400_v10 = vld [vmem:[#allocation5 + $0x328] sm:$0xff] }
 0x220   : > { %v6936_v12 = vadd.f32 %v1898_v60, %v1609_v22  ;;  %2434 = vadd.xlane.f32.xlu1 %v2433_v21  ;;  %v2442_v18 = vadd.f32 %v2441_v42, %v2140_v62  ;;  %v2148_v5 = vunpack.c.l.bf16 %v6398_v20  ;;  %v2150_v8 = vunpack.c.l.bf16 %v6399_v7 }
 0x221   : > { %v1611_v47 = vpop.f32.mrf.mxu0  ;;  %v1900_v33 = vpop.f32.mrf.mxu1  ;;  %v2447_v51 = vadd.f32 %v2446_v44, %v2144_v24  ;;  %v7643_v34 = vpack.c.bf16 %v6807_v1, %v6805_v55  ;;  %v2451_v62 = vadd.f32 %v2147_v59, %v2146_v54  ;;  %v2151_v48 = vunpack.c.h.bf16 %v6399_v7  ;;  %2439 = vadd.xlane.f32.xlu0 %v2438_v9  ;;  %v6401_v55 = vld [vmem:[#allocation5 + $0x330] sm:$0xff]  ;;  %v6402_v44 = vld [vmem:[#allocation5 + $0x338] sm:$0xff]  ;;  %v6404_v59 = vld [vmem:[#allocation5 + $0x348] sm:$0xff] }
 0x222   : > { %v2619_v0 = vpack.c.bf16 %v6936_v12, %v6934_v39  ;;  %v2443_v43 = vadd.f32 %v2442_v18, %v2141_v13  ;;  %v2152_v6 = vunpack.c.l.bf16 %v6400_v10  ;;  %v2149_v24 = vunpack.c.h.bf16 %v6398_v20  ;;  %v6403_v18 = vld [vmem:[#allocation5 + $0x340] sm:$0xff] }
 0x223   : > { %v1614_v14 = vpop.f32.mrf.mxu0  ;;  %5781 = vmatmul.mubr.bf16.gmra.mxu0 %v7642_v36  ;;  %v1903_v22 = vpop.f32.mrf.mxu1  ;;  %v2448_v45 = vadd.f32 %v2447_v51, %v2145_v32  ;;  %v2153_v60 = vunpack.c.h.bf16 %v6400_v10  ;;  %v2452_v57 = vadd.f32 %v2451_v62, %v2148_v5  ;;  %v2456_v42 = vadd.f32 %v2151_v48, %v2150_v8  ;;  %v6405_v62 = vld [vmem:[#allocation5 + $0x350] sm:$0xff] }
 0x224   : > { %5784 = vmatprep.mubr.bf16.mxu0 %v7643_v34  ;;  %v6946_v15 = vadd.f32 %v1903_v22, %v1614_v14  ;;  %2444 = vadd.xlane.f32.xlu1 %v2443_v43  ;;  %v2154_v1 = vunpack.c.l.bf16 %v6401_v55  ;;  %v2155_v47 = vunpack.c.h.bf16 %v6401_v55  ;;  %v2156_v33 = vunpack.c.l.bf16 %v6402_v44 }
 0x225   : > { %v1616_v31 = vpop.f32.mrf.mxu0  ;;  %v1905_v21 = vpop.f32.mrf.mxu1  ;;  %v2158_v63 = vunpack.c.l.bf16 %v6403_v18  ;;  %v2159_v54 = vunpack.c.h.bf16 %v6403_v18  ;;  %v2160_v14 = vunpack.c.l.bf16 %v6404_v59  ;;  %v2453_v9 = vadd.f32 %v2452_v57, %v2149_v24  ;;  %2449 = vadd.xlane.f32.xlu0 %v2448_v45  ;;  %v6406_v45 = vld [vmem:[#allocation5 + $0x358] sm:$0xff] }
 0x226   : > { %v2457_v32 = vadd.f32 %v2456_v42, %v2152_v6  ;;  %v2461_v36 = vadd.f32 %v2155_v47, %v2154_v1  ;;  %v2157_v5 = vunpack.c.h.bf16 %v6402_v44  ;;  %v2161_v7 = vunpack.c.h.bf16 %v6404_v59  ;;  %v6407_v42 = vld [vmem:[#allocation5 + $0x360] sm:$0xff] }
 0x227   : > { %v1617_v13 = vpop.f32.mrf.mxu0  ;;  %v1906_v41 = vpop.f32.mrf.mxu1  ;;  %v2466_v8 = vadd.f32 %v2159_v54, %v2158_v63  ;;  %v2162_v48 = vunpack.c.l.bf16 %v6405_v62  ;;  %v2163_v10 = vunpack.c.h.bf16 %v6405_v62  ;;  %v7644_v6 = vpack.c.bf16 %v6813_v19, %v6811_v11  ;;  %v6412_v62 = vld [vmem:[#allocation5 + $0x388] sm:$0xff] }
 0x228   : > { %v6948_v51 = vadd.f32 %v1906_v41, %v1617_v13  ;;  %2454 = vadd.xlane.f32.xlu1 %v2453_v9  ;;  %v2458_v34 = vadd.f32 %v2457_v32, %v2153_v60  ;;  %v2462_v43 = vadd.f32 %v2461_v36, %v2156_v33  ;;  %v2164_v57 = vunpack.c.l.bf16 %v6406_v45  ;;  %v6408_v33 = vld [vmem:[#allocation5 + $0x368] sm:$0xff]  ;;  %v6409_v32 = vld [vmem:[#allocation5 + $0x370] sm:$0xff] }
 0x229   : > { %v1619_v20 = vpop.f32.mrf.mxu0  ;;  %v1908_v22 = vpop.f32.mrf.mxu1  ;;  %v2467_v21 = vadd.f32 %v2466_v8, %v2160_v14  ;;  %v2166_v55 = vunpack.c.l.bf16 %v6407_v42  ;;  %v7645_v60 = vpack.c.bf16 %v6819_v38, %v6817_v29  ;;  %v2471_v13 = vadd.f32 %v2163_v10, %v2162_v48  ;;  %v6411_v8 = vld [vmem:[#allocation5 + $0x380] sm:$0xff] }
 0x22a   : > { %v2620_v31 = vpack.c.bf16 %v6948_v51, %v6946_v15  ;;  %v2463_v47 = vadd.f32 %v2462_v43, %v2157_v5  ;;  %v2167_v44 = vunpack.c.h.bf16 %v6407_v42  ;;  %v2168_v18 = vunpack.c.l.bf16 %v6408_v33  ;;  %2459 = vadd.xlane.f32.xlu0 %v2458_v34  ;;  %v6410_v20 = vld [vmem:[#allocation5 + $0x378] sm:$0xff] }
 0x22b   : > { %v1622_v24 = vpop.f32.mrf.mxu0  ;;  %5785 = vmatmul.mubr.bf16.gmra.mxu0 %v7644_v6  ;;  %v1911_v1 = vpop.f32.mrf.mxu1  ;;  %v2468_v11 = vadd.f32 %v2467_v21, %v2161_v7  ;;  %v2165_v19 = vunpack.c.h.bf16 %v6406_v45  ;;  %v2169_v59 = vunpack.c.h.bf16 %v6408_v33  ;;  %v2472_v41 = vadd.f32 %v2471_v13, %v2164_v57 }
 0x22c   : > { %5788 = vmatprep.mubr.bf16.mxu0 %v7645_v60  ;;  %v6958_v63 = vadd.f32 %v1911_v1, %v1622_v24  ;;  %2464 = vadd.xlane.f32.xlu1 %v2463_v47  ;;  %v2476_v9 = vadd.f32 %v2167_v44, %v2166_v55  ;;  %v2170_v36 = vunpack.c.l.bf16 %v6409_v32  ;;  %v2171_v29 = vunpack.c.h.bf16 %v6409_v32  ;;  %v6413_v47 = vld [vmem:[#allocation5 + $0x390] sm:$0xff] }
 0x22d   : > { %v1624_v54 = vpop.f32.mrf.mxu0  ;;  %v1913_v14 = vpop.f32.mrf.mxu1  ;;  %v2172_v5 = vunpack.c.l.bf16 %v6410_v20  ;;  %v2174_v22 = vunpack.c.l.bf16 %v6411_v8  ;;  %v2175_v43 = vunpack.c.h.bf16 %v6411_v8  ;;  %v2176_v48 = vunpack.c.l.bf16 %v6412_v62 }
 0x22e   : > { %v2473_v34 = vadd.f32 %v2472_v41, %v2165_v19  ;;  %v2477_v7 = vadd.f32 %v2476_v9, %v2168_v18  ;;  %v2481_v24 = vadd.f32 %v2171_v29, %v2170_v36  ;;  %2469 = vadd.xlane.f32.xlu0 %v2468_v11  ;;  %v2173_v45 = vunpack.c.h.bf16 %v6410_v20  ;;  %v6414_v11 = vld [vmem:[#allocation5 + $0x398] sm:$0xff]  ;;  %v6415_v41 = vld [vmem:[#allocation5 + $0x3a0] sm:$0xff]  ;;  %v6416_v20 = vld [vmem:[#allocation5 + $0x3a8] sm:$0xff] }
 0x22f   : > { %v1625_v38 = vpop.f32.mrf.mxu0  ;;  %v1914_v10 = vpop.f32.mrf.mxu1  ;;  %v2177_v57 = vunpack.c.h.bf16 %v6412_v62  ;;  %v2486_v42 = vadd.f32 %v2175_v43, %v2174_v22  ;;  %v2178_v13 = vunpack.c.l.bf16 %v6413_v47  ;;  %v2179_v44 = vunpack.c.h.bf16 %v6413_v47 }
 0x230   : > { %v6960_v6 = vadd.f32 %v1914_v10, %v1625_v38  ;;  %2474 = vadd.xlane.f32.xlu1 %v2473_v34  ;;  %v2478_v1 = vadd.f32 %v2477_v7, %v2169_v59  ;;  %v2482_v60 = vadd.f32 %v2481_v24, %v2172_v5  ;;  %v7646_v18 = vpack.c.bf16 %v6825_v58, %v6823_v46  ;;  %v6417_v34 = vld [vmem:[#allocation5 + $0x3b0] sm:$0xff]  ;;  %v6418_v24 = vld [vmem:[#allocation5 + $0x3b8] sm:$0xff] }
 0x231   : > { %v1627_v21 = vpop.f32.mrf.mxu0  ;;  %v1916_v55 = vpop.f32.mrf.mxu1  ;;  %v2487_v19 = vadd.f32 %v2486_v42, %v2176_v48  ;;  %v2180_v14 = vunpack.c.l.bf16 %v6414_v11  ;;  %v2182_v9 = vunpack.c.l.bf16 %v6415_v41  ;;  %v7647_v59 = vpack.c.bf16 %v6831_v17, %v6829_v3 }
 0x232   : > { %v2621_v33 = vpack.c.bf16 %v6960_v6, %v6958_v63  ;;  %v2483_v36 = vadd.f32 %v2482_v60, %v2173_v45  ;;  %v2491_v29 = vadd.f32 %v2179_v44, %v2178_v13  ;;  %v2183_v38 = vunpack.c.h.bf16 %v6415_v41  ;;  %2479 = vadd.xlane.f32.xlu0 %v2478_v1  ;;  %v6419_v45 = vld [vmem:[#allocation5 + $0x3c0] sm:$0xff]  ;;  %v6420_v60 = vld [vmem:[#allocation5 + $0x3c8] sm:$0xff] }
 0x233   : > { %v1630_v54 = vpop.f32.mrf.mxu0  ;;  %5789 = vmatmul.mubr.bf16.gmra.mxu0 %v7646_v18  ;;  %v1919_v32 = vpop.f32.mrf.mxu1  ;;  %v2184_v5 = vunpack.c.l.bf16 %v6416_v20  ;;  %v2488_v46 = vadd.f32 %v2487_v19, %v2177_v57  ;;  %v2181_v58 = vunpack.c.h.bf16 %v6414_v11  ;;  %v2185_v43 = vunpack.c.h.bf16 %v6416_v20 }
 0x234   : > { %5792 = vmatprep.mubr.bf16.mxu0 %v7647_v59  ;;  %v6970_v8 = vadd.f32 %v1919_v32, %v1630_v54  ;;  %2484 = vadd.xlane.f32.xlu1 %v2483_v36  ;;  %v2492_v48 = vadd.f32 %v2491_v29, %v2180_v14  ;;  %v2496_v10 = vadd.f32 %v2183_v38, %v2182_v9  ;;  %v2186_v7 = vunpack.c.l.bf16 %v6417_v34  ;;  %v6421_v59 = vld [vmem:[#allocation5 + $0x3d0] sm:$0xff] }
 0x235   : > { %v1632_v22 = vpop.f32.mrf.mxu0  ;;  %v1921_v62 = vpop.f32.mrf.mxu1  ;;  %v2187_v3 = vunpack.c.h.bf16 %v6417_v34  ;;  %v2188_v21 = vunpack.c.l.bf16 %v6418_v24  ;;  %v2190_v42 = vunpack.c.l.bf16 %v6419_v45  ;;  %v2191_v55 = vunpack.c.h.bf16 %v6419_v45 }
 0x236   : > { %v2192_v47 = vunpack.c.l.bf16 %v6420_v60  ;;  %v2493_v1 = vadd.f32 %v2492_v48, %v2181_v58  ;;  %v2497_v57 = vadd.f32 %v2496_v10, %v2184_v5  ;;  %2489 = vadd.xlane.f32.xlu0 %v2488_v46  ;;  %v2189_v19 = vunpack.c.h.bf16 %v6418_v24  ;;  %v6422_v46 = vld [vmem:[#allocation5 + $0x3d8] sm:$0xff]  ;;  %v6423_v62 = vld [vmem:[#allocation5 + $0x3e0] sm:$0xff] }
 0x237   : > { %v1633_v17 = vpop.f32.mrf.mxu0  ;;  %v1922_v13 = vpop.f32.mrf.mxu1  ;;  %v2501_v44 = vadd.f32 %v2187_v3, %v2186_v7  ;;  %v2193_v11 = vunpack.c.h.bf16 %v6420_v60  ;;  %v2506_v14 = vadd.f32 %v2191_v55, %v2190_v42  ;;  %v2194_v36 = vunpack.c.l.bf16 %v6421_v59 }
 0x238   : > { %v6972_v54 = vadd.f32 %v1922_v13, %v1633_v17  ;;  %2494 = vadd.xlane.f32.xlu1 %v2493_v1  ;;  %v2498_v9 = vadd.f32 %v2497_v57, %v2185_v43  ;;  %v2195_v29 = vunpack.c.h.bf16 %v6421_v59  ;;  %v7648_v5 = vpack.c.bf16 %v6837_v40, %v6835_v30  ;;  %v6424_v17 = vld [vmem:[#allocation5 + $0x3e8] sm:$0xff]  ;;  %v6425_v13 = vld [vmem:[#allocation5 + $0x3f0] sm:$0xff]  ;;  %v6426_v57 = vld [vmem:[#allocation5 + $0x3f8] sm:$0xff] }
 0x239   : > { %v1635_v18 = vpop.f32.mrf.mxu0  ;;  %v1924_v41 = vpop.f32.mrf.mxu1  ;;  %v2502_v32 = vadd.f32 %v2501_v44, %v2188_v21  ;;  %v2507_v22 = vadd.f32 %v2506_v14, %v2192_v47  ;;  %v2196_v58 = vunpack.c.l.bf16 %v6422_v46  ;;  %v2198_v48 = vunpack.c.l.bf16 %v6423_v62  ;;  %v6290_v59 = vld [vmem:[#allocation10 + $0x40] sm:$0xff]  }
 0x23a   : > { %v2622_v38 = vpack.c.bf16 %v6972_v54, %v6970_v8  ;;  %v7649_v43 = vpack.c.bf16 %v6843_v2, %v6841_v53  ;;  %v2511_v7 = vadd.f32 %v2195_v29, %v2194_v36  ;;  %v2199_v3 = vunpack.c.h.bf16 %v6423_v62  ;;  %2499 = vadd.xlane.f32.xlu0 %v2498_v9  ;;  %5850 = vmatprep.subr.bf16.mxu1 %v6290_v59 }
 0x23b   : > { %v1638_v20 = vpop.f32.mrf.mxu0  ;;  %5793 = vmatmul.mubr.bf16.gmra.mxu0 %v7648_v5  ;;  %v1927_v10 = vpop.f32.mrf.mxu1  ;;  %v2503_v34 = vadd.f32 %v2502_v32, %v2189_v19  ;;  %v2200_v24 = vunpack.c.l.bf16 %v6424_v17  ;;  %v2508_v30 = vadd.f32 %v2507_v22, %v2193_v11  ;;  %v2197_v40 = vunpack.c.h.bf16 %v6422_v46  ;;  %5851 = vmatpush3.bf16.msra.mxu1 %v6290_v59 }
 0x23c   : > { %5796 = vmatprep.mubr.bf16.mxu0 %v7649_v43  ;;  %v6982_v21 = vadd.f32 %v1927_v10, %v1638_v20  ;;  %v2201_v42 = vunpack.c.h.bf16 %v6424_v17  ;;  %v2512_v60 = vadd.f32 %v2511_v7, %v2196_v58  ;;  %v2516_v47 = vadd.f32 %v2199_v3, %v2198_v48  ;;  %v7652_v7 = vld [vmem:[#allocation19_spill] sm:$0xff]  ;;  %v7653_v3 = vld [vmem:[#allocation18_spill] sm:$0xff] }
 0x23d   : > { %v1640_v45 = vpop.f32.mrf.mxu0  ;;  %v1929_v55 = vpop.f32.mrf.mxu1  ;;  %2504 = vadd.xlane.f32.xlu1 %v2503_v34  ;;  %v2202_v1 = vunpack.c.l.bf16 %v6425_v13  ;;  %v2203_v53 = vunpack.c.h.bf16 %v6425_v13  ;;  %v2204_v44 = vunpack.c.l.bf16 %v6426_v57  ;;  %v2205_v11 = vunpack.c.h.bf16 %v6426_v57  ;;  %v7659_v57 = vld [vmem:[#allocation22_spill] sm:$0xff] }
 0x23e   : > { %v2513_v19 = vadd.f32 %v2512_v60, %v2197_v40  ;;  %v2517_v14 = vadd.f32 %v2516_v47, %v2200_v24  ;;  %2509 = vadd.xlane.f32.xlu0 %v2508_v30  ;;  %v7650_v5 = vpack.c.bf16 %v6849_v49, %v6847_v16  ;;  %v7651_v46 = vpack.c.bf16 %v6855_v23, %v6853_v52  ;;  %v7655_v52 = vld [vmem:[#allocation21_spill] sm:$0xff]  ;;  %v7656_v24 = vld [vmem:[#allocation20_spill] sm:$0xff] }
 0x23f   : > { %v6984_v2 = vpop.f32.mrf.mxu0  ;;  %v6986_v18 = vpop.f32.mrf.mxu1  ;;  %v2521_v41 = vadd.f32 %v2203_v53, %v2202_v1  ;;  %v7654_v17 = vpack.c.bf16 %v7652_v7, %v7653_v3  ;;  %v7657_v45 = vpack.c.bf16 %v7655_v52, %v7656_v24  ;;  %v7016_v47 = vld [vmem:[#allocation11] ss:$0 sm:$0xff]  ;;  %v7658_v53 = vld [vmem:[#allocation23_spill] sm:$0xff]  ;;  %v7668_v7 = vld [vmem:[#allocation28_spill] sm:$0xff] }
 0x240   : > { %v2518_v36 = vadd.f32 %v2517_v14, %v2201_v42  ;;  %v7661_v14 = vld [vmem:[#allocation25_spill] sm:$0xff]  ;;  %v1931_v15 = vadd.f32 %v6986_v18, %v6984_v2 }
 0x241   : > { %v1643_v9 = vpop.f32.mrf.mxu0  ;;  %v1932_v32 = vpop.f32.mrf.mxu1  ;;  %2514 = vadd.xlane.f32.xlu1 %v2513_v19  ;;  %v2522_v29 = vadd.f32 %v2521_v41, %v2204_v44  ;;  %v7660_v44 = vpack.c.bf16 %v7658_v53, %v7659_v57  ;;  %v7662_v41 = vld [vmem:[#allocation24_spill] sm:$0xff] }
 0x242   : > { %2519 = vadd.xlane.f32.xlu0 %v2518_v36  ;;  %v7663_v9 = vpack.c.bf16 %v7661_v14, %v7662_v41 }
 0x243   : > { %v6988_v20 = vpop.f32.mrf.mxu0  ;;  %5797 = vmatmul.mubr.bf16.gmra.mxu0 %v7650_v5  ;;  %v6993_v22 = vpop.f32.mrf.mxu1  ;;  %v2523_v58 = vadd.f32 %v2522_v29, %v2205_v11 }
 0x244   : > { %5800 = vmatprep.mubr.bf16.mxu0 %v7651_v46  ;;  %v1936_v63 = vadd.f32 %v6993_v22, %v6988_v20 }
 0x245   : > { %v1648_v62 = vpop.f32.mrf.mxu0  ;;  %v1937_v48 = vpop.f32.mrf.mxu1  ;;  %2524 = vadd.xlane.f32.xlu1 %v2523_v58  ;;  %v7664_v58 = vld [vmem:[#allocation27_spill] sm:$0xff] }
 0x246   : > { %v7665_v62 = vld [vmem:[#allocation26_spill] sm:$0xff] }
 0x247   : > { %v6998_v10 = vpop.f32.mrf.mxu0  ;;  %v7000_v43 = vpop.f32.mrf.mxu1  ;;  %v7666_v48 = vpack.c.bf16 %v7664_v58, %v7665_v62 }
 0x249   : > { %v1651_v34 = vpop.f32.mrf.mxu0  ;;  %v1940_v16 = vpop.f32.mrf.mxu1 }
 0x24a   : > { %v7667_v16 = vld [vmem:[#allocation29_spill] sm:$0xff] }
 0x24b   : > { %v7002_v49 = vpop.f32.mrf.mxu0  ;;  %5801 = vmatmul.mubr.bf16.gmra.mxu0 %v7654_v17  ;;  %v7007_v23 = vpop.f32.mrf.mxu1  ;;  %v7669_v3 = vpack.c.bf16 %v7667_v16, %v7668_v7 }
 0x24c   : > { %5804 = vmatprep.mubr.bf16.mxu0 %v7657_v45 }
 0x24d   : > { %v1656_v30 = vpop.f32.mrf.mxu0  ;;  %v1945_v40 = vpop.f32.mrf.mxu1 }
 0x24f   : > { %v7012_v42 = vpop.f32.mrf.mxu0  ;;  %v7014_v55 = vpop.f32.mrf.mxu1 }
 0x251   : > { %v1659_v60 = vpop.f32.mrf.mxu0  ;;  %v1948_v13 = vpop.f32.mrf.mxu1 }
 0x252   : > { %v7670_v13 = vld [vmem:[#allocation30_spill] sm:$0xff] }
 0x253   : > { %v5710_v1 = vpop.f32.mrf.mxu0  ;;  %5805 = vmatmul.mubr.bf16.gmra.mxu0 %v7660_v44 }
 0x254   : > { %v3417_v19 = vadd.f32 %v5710_v1, %v7016_v47  ;;  %5808 = vmatprep.mubr.bf16.mxu0 %v7663_v9  ;;  %v7671_v1 = vpack.c.bf16 %v6897_v61, %v7670_v13 }
 0x255   : > { %v2900_v11 = vpop.f32.mrf.mxu0 }
 0x256   : > { %4420 = vst [vmem:[#allocation2 + $0xd8] sm:$0xff] %v3417_v19  ;;  %v3415_v32 = vadd.f32 %v7016_v47, %v2900_v11 }
 0x257   : > { %v5711_v59 = vpop.f32.mrf.mxu0 }
 0x258   : > { %4418 = vst [vmem:[#allocation2 + $0xb0] sm:$0xff] %v3415_v32  ;;  %v3418_v36 = vadd.f32 %v5711_v59, %v7016_v47 }
 0x259   : > { %v2903_v29 = vpop.f32.mrf.mxu0 }
 0x25a   : > { %4421 = vst [vmem:[#allocation2 + $0x18] sm:$0xff] %v3418_v36  ;;  %v3416_v5 = vadd.f32 %v7016_v47, %v2903_v29 }
 0x25b   : > { %v5714_v46 = vpop.f32.mrf.mxu0  ;;  %5809 = vmatmul.mubr.bf16.gmra.mxu0 %v7666_v48 }
 0x25c   : > { %4419 = vst [vmem:[#allocation2 + $0x1b0] sm:$0xff] %v3416_v5  ;;  %v3421_v34 = vadd.f32 %v5714_v46, %v7016_v47  ;;  %5812 = vmatprep.mubr.bf16.mxu0 %v7669_v3 }
 0x25d   : > { %v2916_v17 = vpop.f32.mrf.mxu0 }
 0x25e   : > { %4424 = vst [vmem:[#allocation2 + $0x130] sm:$0xff] %v3421_v34  ;;  %v3419_v52 = vadd.f32 %v7016_v47, %v2916_v17 }
 0x25f   : > { %v5715_v24 = vpop.f32.mrf.mxu0 }
 0x260   : > { %4422 = vst [vmem:[#allocation2 + $0x50] sm:$0xff] %v3419_v52  ;;  %v3422_v45 = vadd.f32 %v5715_v24, %v7016_v47  ;;  %v7099_v24 = vpop.xlane.xlu0 %2209 }
 0x261   : > { %v2919_v30 = vpop.f32.mrf.mxu0 }
 0x262   : > { %4425 = vst [vmem:[#allocation2 + $0x48] sm:$0xff] %v3422_v45  ;;  %v3420_v40 = vadd.f32 %v7016_v47, %v2919_v30 }
 0x263   : > { %v5718_v60 = vpop.f32.mrf.mxu0  ;;  %5813 = vmatmul.mubr.bf16.gmra.mxu0 %v7671_v1 }
 0x264   : > { %4423 = vst [vmem:[#allocation2 + $0x168] sm:$0xff] %v3420_v40  ;;  %v3425_v53 = vadd.f32 %v5718_v60, %v7016_v47  ;;  %5816 = vmatprep.mubr.bf16.mxu0 %v2616_v50 }
 0x265   : > { %v2932_v57 = vpop.f32.mrf.mxu0 }
 0x266   : > { %4428 = vst [vmem:[#allocation2 + $0x118] sm:$0xff] %v3425_v53  ;;  %v3423_v44 = vadd.f32 %v7016_v47, %v2932_v57  ;;  %v7106_v57 = vpop.xlane.xlu0 %2214 }
 0x267   : > { %v5719_v19 = vpop.f32.mrf.mxu0 }
 0x268   : > { %4426 = vst [vmem:[#allocation2 + $0x180] sm:$0xff] %v3423_v44  ;;  %v3426_v14 = vadd.f32 %v5719_v19, %v7016_v47 }
 0x269   : > { %v2935_v41 = vpop.f32.mrf.mxu0 }
 0x26a   : > { %4429 = vst [vmem:[#allocation2 + $0x98] sm:$0xff] %v3426_v14  ;;  %v3424_v61 = vadd.f32 %v7016_v47, %v2935_v41 }
 0x26b   : > { %v5722_v9 = vpop.f32.mrf.mxu0  ;;  %5817 = vmatmul.mubr.bf16.gmra.mxu0 %v2617_v28 }
 0x26c   : > { %4427 = vst [vmem:[#allocation2 + $0x110] sm:$0xff] %v3424_v61  ;;  %v3429_v50 = vadd.f32 %v5722_v9, %v7016_v47  ;;  %5820 = vmatprep.mubr.bf16.mxu0 %v2618_v35 }
 0x26d   : > { %v2948_v27 = vpop.f32.mrf.mxu0 }
 0x26e   : > { %4432 = vst [vmem:[#allocation2 + $0x108] sm:$0xff] %v3429_v50  ;;  %v3427_v56 = vadd.f32 %v7016_v47, %v2948_v27  ;;  %v7113_v27 = vpop.xlane.xlu0 %2229 }
 0x26f   : > { %v5723_v11 = vpop.f32.mrf.mxu0 }
 0x270   : > { %4430 = vst [vmem:[#allocation2 + $0x120] sm:$0xff] %v3427_v56  ;;  %v3430_v32 = vadd.f32 %v5723_v11, %v7016_v47 }
 0x271   : > { %v2951_v59 = vpop.f32.mrf.mxu0 }
 0x272   : > { %4433 = vst [vmem:[#allocation2 + $0x60] sm:$0xff] %v3430_v32  ;;  %v3428_v37 = vadd.f32 %v7016_v47, %v2951_v59 }
 0x273   : > { %v5726_v26 = vpop.f32.mrf.mxu0  ;;  %5821 = vmatmul.mubr.bf16.gmra.mxu0 %v2619_v0 }
 0x274   : > { %4431 = vst [vmem:[#allocation2 + $0x150] sm:$0xff] %v3428_v37  ;;  %v3433_v28 = vadd.f32 %v5726_v26, %v7016_v47  ;;  %5824 = vmatprep.mubr.bf16.mxu0 %v2620_v31  ;;  %v1939_v31 = vadd.f32 %v7000_v43, %v6998_v10  ;;  %v1947_v10 = vadd.f32 %v7014_v55, %v7012_v42 }
 0x275   : > { %v2964_v25 = vpop.f32.mrf.mxu0 }
 0x276   : > { %4436 = vst [vmem:[#allocation2 + $0x138] sm:$0xff] %v3433_v28  ;;  %v3431_v4 = vadd.f32 %v7016_v47, %v2964_v25  ;;  %v2624_v54 = vpack.c.bf16 %v1939_v31, %v1936_v63  ;;  %v7120_v25 = vpop.xlane.xlu0 %2239 }
 0x277   : > { %v5727_v35 = vpop.f32.mrf.mxu0 }
 0x278   : > { %4434 = vst [vmem:[#allocation2 + $0xe0] sm:$0xff] %v3431_v4  ;;  %v3434_v36 = vadd.f32 %v5727_v35, %v7016_v47 }
 0x279   : > { %v2967_v29 = vpop.f32.mrf.mxu0 }
 0x27a   : > { %4437 = vst [vmem:[#allocation2 + $0x140] sm:$0xff] %v3434_v36  ;;  %v3432_v39 = vadd.f32 %v7016_v47, %v2967_v29 }
 0x27b   : > { %v5730_v12 = vpop.f32.mrf.mxu0  ;;  %5825 = vmatmul.mubr.bf16.gmra.mxu0 %v2621_v33  ;;  %v2623_v33 = vpack.c.bf16 %v1931_v15, %v6982_v21  ;;  %v1944_v21 = vadd.f32 %v7007_v23, %v7002_v49  ;;  %v7096_v23 = vpop.xlane.xlu1 %2219 }
 0x27c   : > { %4435 = vst [vmem:[#allocation2 + $0x188] sm:$0xff] %v3432_v39  ;;  %v3437_v0 = vadd.f32 %v5730_v12, %v7016_v47  ;;  %5828 = vmatprep.mubr.bf16.mxu0 %v2622_v38  ;;  %v7127_v15 = vpop.xlane.xlu0 %2249 }
 0x27d   : > { %v2980_v51 = vpop.f32.mrf.mxu0  ;;  %v2625_v62 = vpack.c.bf16 %v1947_v10, %v1944_v21 }
 0x27e   : > { %4440 = vst [vmem:[#allocation2 + $0x1b8] sm:$0xff] %v3437_v0  ;;  %v3435_v5 = vadd.f32 %v7016_v47, %v2980_v51 }
 0x27f   : > { %v5731_v46 = vpop.f32.mrf.mxu0  ;;  %v7103_v13 = vpop.xlane.xlu1 %2224 }
 0x280   : > { %4438 = vst [vmem:[#allocation2 + $0x80] sm:$0xff] %v3435_v5  ;;  %v3438_v6 = vadd.f32 %v5731_v46, %v7016_v47  ;;  %v7130_v5 = vld [vmem:[#allocation10 + $0xb8] sm:$0xff]  }
 0x281   : > { %v2983_v8 = vpop.f32.mrf.mxu0  ;;  %5916 = vmatprep.subr.bf16.mxu1 %v7130_v5 }
 0x282   : > { %4441 = vst [vmem:[#allocation2 + $0x28] sm:$0xff] %v3438_v6  ;;  %v3436_v38 = vadd.f32 %v7016_v47, %v2983_v8 }
 0x283   : > { %v5734_v2 = vpop.f32.mrf.mxu0  ;;  %5829 = vmatmul.mubr.bf16.gmra.mxu0 %v2623_v33  ;;  %v7110_v61 = vpop.xlane.xlu1 %2234 }
 0x284   : > { %4439 = vst [vmem:[#allocation2 + $0x1a8] sm:$0xff] %v3436_v38  ;;  %v3441_v18 = vadd.f32 %v5734_v2, %v7016_v47  ;;  %5832 = vmatprep.mubr.bf16.mxu0 %v2624_v54  ;;  %v7137_v54 = vpop.xlane.xlu0 %2259 }
 0x285   : > { %v2996_v20 = vpop.f32.mrf.mxu0 }
 0x286   : > { %4444 = vst [vmem:[#allocation2 + $0x160] sm:$0xff] %v3441_v18  ;;  %v3439_v22 = vadd.f32 %v7016_v47, %v2996_v20 }
 0x287   : > { %v5735_v43 = vpop.f32.mrf.mxu0  ;;  %v7117_v37 = vpop.xlane.xlu1 %2244 }
 0x288   : > { %4442 = vst [vmem:[#allocation2 + $0x1e8] sm:$0xff] %v3439_v22  ;;  %v3442_v58 = vadd.f32 %v5735_v43, %v7016_v47  ;;  %v7144_v43 = vpop.xlane.xlu0 %2269 }
 0x289   : > { %v2999_v48 = vpop.f32.mrf.mxu0 }
 0x28a   : > { %4445 = vst [vmem:[#allocation2 + $0x30] sm:$0xff] %v3442_v58  ;;  %v3440_v34 = vadd.f32 %v7016_v47, %v2999_v48 }
 0x28b   : > { %v5738_v16 = vpop.f32.mrf.mxu0  ;;  %5833 = vmatmul.mubr.bf16.gmra.mxu0 %v2625_v62  ;;  %v7124_v39 = vpop.xlane.xlu1 %2254 }
 0x28c   : > { %4443 = vst [vmem:[#allocation2 + $0xf8] sm:$0xff] %v3440_v34  ;;  %v3445_v42 = vadd.f32 %v5738_v16, %v7016_v47 }
 0x28d   : > { %v3012_v55 = vpop.f32.mrf.mxu0 }
 0x28e   : > { %4448 = vst [vmem:[#allocation2 + $0xf0] sm:$0xff] %v3445_v42  ;;  %v3443_v7 = vadd.f32 %v7016_v47, %v3012_v55 }
 0x28f   : > { %v5739_v3 = vpop.f32.mrf.mxu0  ;;  %v7133_v6 = vpop.xlane.xlu1 %2264 }
 0x290   : > { %4446 = vst [vmem:[#allocation2 + $0x1e0] sm:$0xff] %v3443_v7  ;;  %v3446_v49 = vadd.f32 %v5739_v3, %v7016_v47  ;;  %v7151_v7 = vpop.xlane.xlu0 %2279 }
 0x291   : > { %v3015_v17 = vpop.f32.mrf.mxu0 }
 0x292   : > { %4449 = vst [vmem:[#allocation2 + $0x8] sm:$0xff] %v3446_v49  ;;  %v3444_v52 = vadd.f32 %v7016_v47, %v3015_v17 }
 0x293   : > { %v5742_v45 = vpop.f32.mrf.mxu0  ;;  %v7141_v20 = vpop.xlane.xlu1 %2274 }
 0x294   : > { %4447 = vst [vmem:[#allocation2] sm:$0xff] %v3444_v52  ;;  %v3449_v30 = vadd.f32 %v5742_v45, %v7016_v47 }
 0x295   : > { %v3028_v40 = vpop.f32.mrf.mxu0 }
 0x296   : > { %4452 = vst [vmem:[#allocation2 + $0x100] sm:$0xff] %v3449_v30  ;;  %v3447_v60 = vadd.f32 %v7016_v47, %v3028_v40 }
 0x297   : > { %v5743_v1 = vpop.f32.mrf.mxu0  ;;  %v7148_v16 = vpop.xlane.xlu1 %2284 }
 0x298   : > { %4450 = vst [vmem:[#allocation2 + $0x148] sm:$0xff] %v3447_v60  ;;  %v3450_v53 = vadd.f32 %v5743_v1, %v7016_v47  ;;  %v7158_v60 = vpop.xlane.xlu0 %2289 }
 0x299   : > { %v3031_v44 = vpop.f32.mrf.mxu0 }
 0x29a   : > { %4453 = vst [vmem:[#allocation2 + $0xc8] sm:$0xff] %v3450_v53  ;;  %v3448_v19 = vadd.f32 %v7016_v47, %v3031_v44 }
 0x29b   : > { %v5746_v14 = vpop.f32.mrf.mxu0  ;;  %v7155_v45 = vpop.xlane.xlu1 %2294 }
 0x29c   : > { %4451 = vst [vmem:[#allocation2 + $0x1d0] sm:$0xff] %v3448_v19  ;;  %v3453_v41 = vadd.f32 %v5746_v14, %v7016_v47 }
 0x29d   : > { %v3044_v9 = vpop.f32.mrf.mxu0 }
 0x29e   : > { %4456 = vst [vmem:[#allocation2 + $0x20] sm:$0xff] %v3453_v41  ;;  %v3451_v50 = vadd.f32 %v7016_v47, %v3044_v9 }
 0x29f   : > { %v5747_v56 = vpop.f32.mrf.mxu0  ;;  %v7162_v14 = vpop.xlane.xlu1 %2304 }
 0x2a0   : > { %4454 = vst [vmem:[#allocation2 + $0x40] sm:$0xff] %v3451_v50  ;;  %v3454_v11 = vadd.f32 %v5747_v56, %v7016_v47  ;;  %v7165_v50 = vpop.xlane.xlu0 %2299 }
 0x2a1   : > { %v3047_v32 = vpop.f32.mrf.mxu0 }
 0x2a2   : > { %4457 = vst [vmem:[#allocation2 + $0x128] sm:$0xff] %v3454_v11  ;;  %v3452_v59 = vadd.f32 %v7016_v47, %v3047_v32 }
 0x2a3   : > { %v5750_v26 = vpop.f32.mrf.mxu0 }
 0x2a4   : > { %4455 = vst [vmem:[#allocation2 + $0x1f8] sm:$0xff] %v3452_v59  ;;  %v3457_v28 = vadd.f32 %v5750_v26, %v7016_v47  ;;  %v7169_v26 = vpop.xlane.xlu1 %2314 }
 0x2a5   : > { %v3060_v4 = vpop.f32.mrf.mxu0 }
 0x2a6   : > { %4460 = vst [vmem:[#allocation2 + $0xe8] sm:$0xff] %v3457_v28  ;;  %v3455_v35 = vadd.f32 %v7016_v47, %v3060_v4 }
 0x2a7   : > { %v5751_v36 = vpop.f32.mrf.mxu0 }
 0x2a8   : > { %4458 = vst [vmem:[#allocation2 + $0x1a0] sm:$0xff] %v3455_v35  ;;  %v3458_v29 = vadd.f32 %v5751_v36, %v7016_v47  ;;  %v7172_v35 = vpop.xlane.xlu0 %2309 }
 0x2a9   : > { %v3063_v12 = vpop.f32.mrf.mxu0 }
 0x2aa   : > { %4461 = vst [vmem:[#allocation2 + $0x78] sm:$0xff] %v3458_v29  ;;  %v3456_v0 = vadd.f32 %v7016_v47, %v3063_v12 }
 0x2ab   : > { %v5754_v51 = vpop.f32.mrf.mxu0 }
 0x2ac   : > { %4459 = vst [vmem:[#allocation2 + $0x1f0] sm:$0xff] %v3456_v0  ;;  %v3461_v31 = vadd.f32 %v5754_v51, %v7016_v47  ;;  %v7176_v51 = vpop.xlane.xlu1 %2324 }
 0x2ad   : > { %v3076_v46 = vpop.f32.mrf.mxu0 }
 0x2ae   : > { %4464 = vst [vmem:[#allocation2 + $0x1d8] sm:$0xff] %v3461_v31  ;;  %v3459_v63 = vadd.f32 %v7016_v47, %v3076_v46  ;;  %v7178_v46 = vpop.xlane.xlu0 %2319 }
 0x2af   : > { %v5755_v33 = vpop.f32.mrf.mxu0 }
 0x2b0   : > { %4462 = vst [vmem:[#allocation2 + $0x70] sm:$0xff] %v3459_v63  ;;  %v3462_v8 = vadd.f32 %v5755_v33, %v7016_v47  ;;  %v3482_v63 = vmul.f32 %v7016_v47, %v7103_v13 }
 0x2b1   : > { %v3079_v38 = vpop.f32.mrf.mxu0 }
 0x2b2   : > { %4465 = vst [vmem:[#allocation2 + $0xd0] sm:$0xff] %v3462_v8  ;;  %v3460_v2 = vadd.f32 %v7016_v47, %v3079_v38  ;;  %v3479_v8 = vmul.f32 %v7016_v47, %v7099_v24  ;;  %v3480_v38 = vmul.f32 %v7016_v47, %v7106_v57  ;;  %v3486_v24 = vmul.f32 %v7016_v47, %v7117_v37 }
 0x2b3   : > { %v5758_v18 = vpop.f32.mrf.mxu0 }
 0x2b4   : > { %4463 = vst [vmem:[#allocation2 + $0x90] sm:$0xff] %v3460_v2  ;;  %v3465_v10 = vadd.f32 %v5758_v18, %v7016_v47  ;;  %v3481_v2 = vmul.f32 %v7016_v47, %v7096_v23  ;;  %v3483_v23 = vmul.f32 %v7016_v47, %v7113_v27 }
 0x2b5   : > { %v3092_v22 = vpop.f32.mrf.mxu0 }
 0x2b6   : > { %4468 = vst [vmem:[#allocation2 + $0xa8] sm:$0xff] %v3465_v10  ;;  %v3463_v21 = vadd.f32 %v7016_v47, %v3092_v22  ;;  %v7188_v10 = vpop.xlane.xlu1 %2334 }
 0x2b7   : > { %v5759_v58 = vpop.f32.mrf.mxu0 }
 0x2b8   : > { %4466 = vst [vmem:[#allocation2 + $0xb8] sm:$0xff] %v3463_v21  ;;  %v3466_v62 = vadd.f32 %v5759_v58, %v7016_v47 }
 0x2b9   : > { %v3095_v48 = vpop.f32.mrf.mxu0 }
 0x2ba   : > { %4469 = vst [vmem:[#allocation2 + $0x1c8] sm:$0xff] %v3466_v62  ;;  %v3464_v34 = vadd.f32 %v7016_v47, %v3095_v48  ;;  %v7190_v48 = vpop.xlane.xlu0 %2329 }
 0x2bb   : > { %v5762_v42 = vpop.f32.mrf.mxu0 }
 0x2bc   : > { %4467 = vst [vmem:[#allocation2 + $0x88] sm:$0xff] %v3464_v34  ;;  %v3469_v55 = vadd.f32 %v5762_v42, %v7016_v47 }
 0x2bd   : > { %v3108_v3 = vpop.f32.mrf.mxu0 }
 0x2be   : > { %4472 = vst [vmem:[#allocation2 + $0x68] sm:$0xff] %v3469_v55  ;;  %v3467_v49 = vadd.f32 %v7016_v47, %v3108_v3  ;;  %v6292_v3 = vld [vmem:[#allocation10 + $0xb0] sm:$0xff]  }
 0x2bf   : > { %v5763_v17 = vpop.f32.mrf.mxu0 }
 0x2c0   : > { %4470 = vst [vmem:[#allocation2 + $0x170] sm:$0xff] %v3467_v49  ;;  %v3470_v52 = vadd.f32 %v5763_v17, %v7016_v47  ;;  %v7196_v49 = vpop.xlane.xlu1 %2344  ;;  %v3485_v17 = vmul.f32 %v7016_v47, %v7120_v25 }
 0x2c1   : > { %v3111_v30 = vpop.f32.mrf.mxu0 }
 0x2c2   : > { %4473 = vst [vmem:[#allocation2 + $0x190] sm:$0xff] %v3470_v52  ;;  %v3468_v40 = vadd.f32 %v7016_v47, %v3111_v30  ;;  %v3484_v30 = vmul.f32 %v7016_v47, %v7110_v61  ;;  %v3490_v61 = vmul.f32 %v7016_v47, %v7133_v6 }
 0x2c3   : > { %v5766_v1 = vpop.f32.mrf.mxu0 }
 0x2c4   : > { %4471 = vst [vmem:[#allocation2 + $0x178] sm:$0xff] %v3468_v40  ;;  %v3473_v53 = vadd.f32 %v5766_v1, %v7016_v47  ;;  %v7202_v40 = vpop.xlane.xlu0 %2339 }
 0x2c5   : > { %v3124_v44 = vpop.f32.mrf.mxu0 }
 0x2c6   : > { %4476 = vst [vmem:[#allocation2 + $0xc0] sm:$0xff] %v3473_v53  ;;  %v3471_v19 = vadd.f32 %v7016_v47, %v3124_v44  ;;  %v6293_v53 = vld [vmem:[#allocation10 + $0xa8] sm:$0xff]  }
 0x2c7   : > { %v5767_v41 = vpop.f32.mrf.mxu0 }
 0x2c8   : > { %4474 = vst [vmem:[#allocation2 + $0x198] sm:$0xff] %v3471_v19  ;;  %v3474_v9 = vadd.f32 %v5767_v41, %v7016_v47 }
 0x2c9   : > { %v3127_v56 = vpop.f32.mrf.mxu0 }
 0x2ca   : > { %4477 = vst [vmem:[#allocation2 + $0x1c0] sm:$0xff] %v3474_v9  ;;  %v3472_v11 = vadd.f32 %v7016_v47, %v3127_v56  ;;  %v7205_v56 = vpop.xlane.xlu1 %2354 }
 0x2cb   : > { %v5770_v32 = vpop.f32.mrf.mxu0 }
 0x2cc   : > { %4475 = vst [vmem:[#allocation2 + $0x38] sm:$0xff] %v3472_v11  ;;  %v3477_v59 = vadd.f32 %v5770_v32, %v7016_v47  ;;  %v6294_v32 = vld [vmem:[#allocation10 + $0xa0] sm:$0xff]  }
 0x2cd   : > { %v3140_v28 = vpop.f32.mrf.mxu0 }
 0x2ce   : > { %4480 = vst [vmem:[#allocation2 + $0x58] sm:$0xff] %v3477_v59  ;;  %v3475_v4 = vadd.f32 %v7016_v47, %v3140_v28  ;;  %v7211_v59 = vpop.xlane.xlu0 %2349  ;;  %v3489_v28 = vmul.f32 %v7016_v47, %v7137_v54 }
 0x2cf   : > { %v5771_v36 = vpop.f32.mrf.mxu0 }
 0x2d0   : > { %4478 = vst [vmem:[#allocation2 + $0x158] sm:$0xff] %v3475_v4  ;;  %v3478_v29 = vadd.f32 %v5771_v36, %v7016_v47  ;;  %v3488_v36 = vmul.f32 %v7016_v47, %v7124_v39 }
 0x2d1   : > { %v3143_v12 = vpop.f32.mrf.mxu0 }
 0x2d2   : > { %4481 = vst [vmem:[#allocation2 + $0xa0] sm:$0xff] %v3478_v29  ;;  %v3476_v0 = vadd.f32 %v7016_v47, %v3143_v12  ;;  %v6295_v12 = vld [vmem:[#allocation10 + $0x98] sm:$0xff]  }
 0x2d3   : > { %v5774_v31 = vpop.f32.mrf.mxu0 }
 0x2d4   : > { %4479 = vst [vmem:[#allocation2 + $0x10] sm:$0xff] %v3476_v0  ;;  %v3545_v13 = vadd.f32 %v5774_v31, %v3481_v2  ;;  %v3494_v2 = vmul.f32 %v7016_v47, %v7148_v16 }
 0x2d5   : > { %v3156_v33 = vpop.f32.mrf.mxu0 }
 0x2d6   : > { %v3543_v58 = vadd.f32 %v3479_v8, %v3156_v33 }
 0x2d7   : > { %v5775_v18 = vpop.f32.mrf.mxu0 }
 0x2d8   : > { %v3546_v22 = vadd.f32 %v5775_v18, %v3482_v63  ;;  %v7217_v63 = vpop.xlane.xlu1 %2364  ;;  %v6296_v18 = vld [vmem:[#allocation10 + $0x90] sm:$0xff]  }
 0x2d9   : > { %v3159_v21 = vpop.f32.mrf.mxu0 }
 0x2da   : > { %v3544_v62 = vadd.f32 %v3480_v38, %v3159_v21  ;;  %v3608_v55 = vpack.c.bf16 %v3546_v22, %v3545_v13  ;;  %v7219_v38 = vpop.xlane.xlu0 %2359  ;;  %v3491_v22 = vmul.f32 %v7016_v47, %v7144_v43  ;;  %v3493_v21 = vmul.f32 %v7016_v47, %v7151_v7 }
 0x2db   : > { %v5778_v34 = vpop.f32.mrf.mxu0 }
 0x2dc   : > { %v3607_v42 = vpack.c.bf16 %v3544_v62, %v3543_v58  ;;  %v3549_v19 = vadd.f32 %v5778_v34, %v3485_v17  ;;  %v3492_v62 = vmul.f32 %v7016_v47, %v7141_v20  ;;  %v7229_v13 = vpop.xlane.xlu1 %2374  ;;  %v3498_v17 = vmul.f32 %v7016_v47, %v7162_v14 }
 0x2dd   : > { %v3172_v57 = vpop.f32.mrf.mxu0 }
 0x2de   : > { %5852 = vmatprep.mubr.bf16.mxu1 %v3607_v42  ;;  %v3547_v27 = vadd.f32 %v3483_v23, %v3172_v57  ;;  %v6297_v42 = vld [vmem:[#allocation10 + $0x88] sm:$0xff]   ;;  %v7231_v57 = vpop.xlane.xlu0 %2369 }
 0x2df   : > { %v5779_v52 = vpop.f32.mrf.mxu0  ;;  %5853 = vmatmul.mubr.bf16.vlgmr.msra.gmra.mxu1 %v3608_v55 }
 0x2e0   : > { %5917 = vmatpush3.bf16.msra.mxu1 %v7130_v5  ;;  %v3550_v37 = vadd.f32 %v5779_v52, %v3486_v24  ;;  %v3487_v5 = vmul.f32 %v7016_v47, %v7127_v15  ;;  %v6298_v52 = vld [vmem:[#allocation10 + $0x80] sm:$0xff]  }
 0x2e1   : > { %v3175_v1 = vpop.f32.mrf.mxu0  ;;  %5918 = vmatprep.subr.bf16.mxu1 %v6292_v3 }
 0x2e2   : > { %v3548_v44 = vadd.f32 %v3484_v30, %v3175_v1  ;;  %v3610_v25 = vpack.c.bf16 %v3550_v37, %v3549_v19  ;;  %v3495_v30 = vmul.f32 %v7016_v47, %v7158_v60  ;;  %v7237_v37 = vpop.xlane.xlu1 %2384  ;;  %v3497_v1 = vmul.f32 %v7016_v47, %v7165_v50 }
 0x2e3   : > { %v5782_v41 = vpop.f32.mrf.mxu0 }
 0x2e4   : > { %v3609_v9 = vpack.c.bf16 %v3548_v44, %v3547_v27  ;;  %5919 = vmatpush3.bf16.msra.mxu1 %v6292_v3  ;;  %v3553_v15 = vadd.f32 %v5782_v41, %v3489_v28  ;;  %v3496_v27 = vmul.f32 %v7016_v47, %v7155_v45  ;;  %v7243_v44 = vpop.xlane.xlu0 %2379  ;;  %v3499_v45 = vmul.f32 %v7016_v47, %v7172_v35 }
 0x2e5   : > { %v3188_v11 = vpop.f32.mrf.mxu0  ;;  %5920 = vmatprep.subr.bf16.mxu1 %v6293_v53 }
 0x2e6   : > { %5856 = vmatprep.mubr.bf16.mxu1 %v3609_v9  ;;  %v3551_v0 = vadd.f32 %v3487_v5, %v3188_v11  ;;  %v7245_v11 = vpop.xlane.xlu1 %2394 }
 0x2e7   : > { %v5783_v4 = vpop.f32.mrf.mxu0  ;;  %5857 = vmatmul.mubr.bf16.gmra.mxu1 %v3610_v25 }
 0x2e8   : > { %5921 = vmatpush3.bf16.msra.mxu1 %v6293_v53  ;;  %v3554_v29 = vadd.f32 %v5783_v4, %v3490_v61  ;;  %v7251_v28 = vpop.xlane.xlu0 %2389  ;;  %v3501_v4 = vmul.f32 %v7016_v47, %v7178_v46  ;;  %v3503_v46 = vmul.f32 %v7016_v47, %v7190_v48 }
 0x2e9   : > { %v3191_v6 = vpop.f32.mrf.mxu0  ;;  %5922 = vmatprep.subr.bf16.mxu1 %v6294_v32 }
 0x2ea   : > { %v3552_v31 = vadd.f32 %v3488_v36, %v3191_v6  ;;  %v3612_v54 = vpack.c.bf16 %v3554_v29, %v3553_v15  ;;  %v3500_v29 = vmul.f32 %v7016_v47, %v7169_v26  ;;  %v3505_v26 = vmul.f32 %v7016_v47, %v7202_v40 }
 0x2eb   : > { %v5786_v33 = vpop.f32.mrf.mxu0  ;;  %v3510_v40 = vmul.f32 %v7016_v47, %v7217_v63 }
 0x2ec   : > { %v3611_v8 = vpack.c.bf16 %v3552_v31, %v3551_v0  ;;  %5923 = vmatpush3.bf16.msra.mxu1 %v6294_v32  ;;  %v3557_v43 = vadd.f32 %v5786_v33, %v3493_v21  ;;  %v3502_v32 = vmul.f32 %v7016_v47, %v7176_v51  ;;  %v2405_v51 = vpop.xlane.xlu1 %2404  ;;  %v2400_v35 = vpop.xlane.xlu0 %2399 }
 0x2ed   : > { %v3204_v39 = vpop.f32.mrf.mxu0  ;;  %5924 = vmatprep.subr.bf16.mxu1 %v6295_v12 }
 0x2ee   : > { %5860 = vmatprep.mubr.bf16.mxu1 %v3611_v8  ;;  %v3555_v55 = vadd.f32 %v3491_v22, %v3204_v39  ;;  %v3504_v22 = vmul.f32 %v7016_v47, %v7188_v10 }
 0x2ef   : > { %v5787_v58 = vpop.f32.mrf.mxu0  ;;  %5861 = vmatmul.mubr.bf16.gmra.mxu1 %v3612_v54 }
 0x2f0   : > { %5925 = vmatpush3.bf16.msra.mxu1 %v6295_v12  ;;  %v3558_v34 = vadd.f32 %v5787_v58, %v3494_v2  ;;  %v3506_v2 = vmul.f32 %v7016_v47, %v7196_v49  ;;  %v7265_v21 = vpop.xlane.xlu1 %2414  ;;  %v7267_v49 = vpop.xlane.xlu0 %2409 }
 0x2f1   : > { %v3207_v16 = vpop.f32.mrf.mxu0  ;;  %5926 = vmatprep.subr.bf16.mxu1 %v6296_v18 }
 0x2f2   : > { %v3556_v24 = vadd.f32 %v3492_v62, %v3207_v16  ;;  %v3614_v7 = vpack.c.bf16 %v3558_v34, %v3557_v43 }
 0x2f3   : > { %v5790_v3 = vpop.f32.mrf.mxu0 }
 0x2f4   : > { %v3613_v23 = vpack.c.bf16 %v3556_v24, %v3555_v55  ;;  %5927 = vmatpush3.bf16.msra.mxu1 %v6296_v18  ;;  %v3561_v60 = vadd.f32 %v5790_v3, %v3497_v1  ;;  %v3507_v3 = vmul.f32 %v7016_v47, %v7211_v59  ;;  %v2425_v10 = vpop.xlane.xlu1 %2424 }
 0x2f5   : > { %v3220_v20 = vpop.f32.mrf.mxu0  ;;  %5928 = vmatprep.subr.bf16.mxu1 %v6297_v42 }
 0x2f6   : > { %5864 = vmatprep.mubr.bf16.mxu1 %v3613_v23  ;;  %v3559_v41 = vadd.f32 %v3495_v30, %v3220_v20  ;;  %v3509_v23 = vmul.f32 %v7016_v47, %v7219_v38  ;;  %v2420_v20 = vpop.xlane.xlu0 %2419 }
 0x2f7   : > { %v5791_v53 = vpop.f32.mrf.mxu0  ;;  %5865 = vmatmul.mubr.bf16.gmra.mxu1 %v3614_v7 }
 0x2f8   : > { %5929 = vmatpush3.bf16.msra.mxu1 %v6297_v42  ;;  %v3562_v14 = vadd.f32 %v5791_v53, %v3498_v17  ;;  %v3508_v17 = vmul.f32 %v7016_v47, %v7205_v56 }
 0x2f9   : > { %v3223_v19 = vpop.f32.mrf.mxu0  ;;  %5930 = vmatprep.subr.bf16.mxu1 %v6298_v52 }
 0x2fa   : > { %v3560_v9 = vadd.f32 %v3496_v27, %v3223_v19  ;;  %v3616_v50 = vpack.c.bf16 %v3562_v14, %v3561_v60  ;;  %v7277_v19 = vpop.xlane.xlu1 %2434  ;;  %v2430_v56 = vpop.xlane.xlu0 %2429  ;;  %v3513_v60 = vmul.f32 %v7016_v47, %v7243_v44  ;;  %v3515_v44 = vmul.f32 %v7016_v47, %v7251_v28 }
 0x2fb   : > { %v5794_v25 = vpop.f32.mrf.mxu0  ;;  %v3522_v28 = vmul.f32 %v7016_v47, %v2425_v10 }
 0x2fc   : > { %v3615_v61 = vpack.c.bf16 %v3560_v9, %v3559_v41  ;;  %5931 = vmatpush3.bf16.msra.mxu1 %v6298_v52  ;;  %v3565_v15 = vadd.f32 %v5794_v25, %v3501_v4  ;;  %v3514_v41 = vmul.f32 %v7016_v47, %v7237_v37  ;;  %v3511_v9 = vmul.f32 %v7016_v47, %v7231_v57 }
 0x2fd   : > { %v3236_v5 = vpop.f32.mrf.mxu0 }
 0x2fe   : > { %5868 = vmatprep.mubr.bf16.mxu1 %v3615_v61  ;;  %v3563_v0 = vadd.f32 %v3499_v45, %v3236_v5  ;;  %v3512_v61 = vmul.f32 %v7016_v47, %v7229_v13  ;;  %v2445_v4 = vpop.xlane.xlu1 %2444 }
 0x2ff   : > { %v5795_v36 = vpop.f32.mrf.mxu0  ;;  %5869 = vmatmul.mubr.bf16.gmra.mxu1 %v3616_v50 }
 0x300   : > { %v3566_v6 = vadd.f32 %v5795_v36, %v3502_v32 }
 0x301   : > { %v3239_v12 = vpop.f32.mrf.mxu0 }
 0x302   : > { %v3564_v31 = vadd.f32 %v3500_v29, %v3239_v12  ;;  %v3618_v54 = vpack.c.bf16 %v3566_v6, %v3565_v15  ;;  %v2440_v6 = vpop.xlane.xlu0 %2439  ;;  %v3518_v12 = vmul.f32 %v7016_v47, %v2405_v51  ;;  %v3516_v15 = vmul.f32 %v7016_v47, %v7245_v11 }
 0x303   : > { %v5798_v33 = vpop.f32.mrf.mxu0  ;;  %v3521_v11 = vmul.f32 %v7016_v47, %v2420_v20  ;;  %v3523_v20 = vmul.f32 %v7016_v47, %v2430_v56 }
 0x304   : > { %v3617_v8 = vpack.c.bf16 %v3564_v31, %v3563_v0  ;;  %v3569_v42 = vadd.f32 %v5798_v33, %v3505_v26  ;;  %v3517_v31 = vmul.f32 %v7016_v47, %v2400_v35  ;;  %v2455_v33 = vpop.xlane.xlu1 %2454  ;;  %v3519_v35 = vmul.f32 %v7016_v47, %v7267_v49 }
 0x305   : > { %v3252_v39 = vpop.f32.mrf.mxu0  ;;  %v3526_v49 = vmul.f32 %v7016_v47, %v2445_v4 }
 0x306   : > { %5872 = vmatprep.mubr.bf16.mxu1 %v3617_v8  ;;  %v3567_v34 = vadd.f32 %v3503_v46, %v3252_v39  ;;  %v2450_v46 = vpop.xlane.xlu0 %2449 }
 0x307   : > { %v5799_v18 = vpop.f32.mrf.mxu0  ;;  %5873 = vmatmul.mubr.bf16.gmra.mxu1 %v3618_v54 }
 0x308   : > { %v3570_v58 = vadd.f32 %v5799_v18, %v3506_v2 }
 0x309   : > { %v3255_v62 = vpop.f32.mrf.mxu0 }
 0x30a   : > { %v3568_v16 = vadd.f32 %v3504_v22, %v3255_v62  ;;  %v3620_v24 = vpack.c.bf16 %v3570_v58, %v3569_v42  ;;  %v2465_v62 = vpop.xlane.xlu1 %2464  ;;  %v2460_v42 = vpop.xlane.xlu0 %2459 }
 0x30b   : > { %v5802_v55 = vpop.f32.mrf.mxu0  ;;  %v3530_v56 = vmul.f32 %v7016_v47, %v2465_v62 }
 0x30c   : > { %v3619_v48 = vpack.c.bf16 %v3568_v16, %v3567_v34  ;;  %v3573_v63 = vadd.f32 %v5802_v55, %v3509_v23  ;;  %v3520_v16 = vmul.f32 %v7016_v47, %v7265_v21 }
 0x30d   : > { %v3268_v43 = vpop.f32.mrf.mxu0 }
 0x30e   : > { %5876 = vmatprep.mubr.bf16.mxu1 %v3619_v48  ;;  %v3571_v1 = vadd.f32 %v3507_v3, %v3268_v43  ;;  %v2475_v23 = vpop.xlane.xlu1 %2474 }
 0x30f   : > { %v5803_v7 = vpop.f32.mrf.mxu0  ;;  %5877 = vmatmul.mubr.bf16.gmra.mxu1 %v3620_v24 }
 0x310   : > { %v3574_v52 = vadd.f32 %v5803_v7, %v3510_v40 }
 0x311   : > { %v3271_v30 = vpop.f32.mrf.mxu0 }
 0x312   : > { %v3572_v53 = vadd.f32 %v3508_v17, %v3271_v30  ;;  %v3622_v59 = vpack.c.bf16 %v3574_v52, %v3573_v63  ;;  %v2470_v52 = vpop.xlane.xlu0 %2469  ;;  %v3525_v30 = vmul.f32 %v7016_v47, %v2440_v6 }
 0x313   : > { %v5806_v27 = vpop.f32.mrf.mxu0 }
 0x314   : > { %v3621_v14 = vpack.c.bf16 %v3572_v53, %v3571_v1  ;;  %v3577_v37 = vadd.f32 %v5806_v27, %v3513_v60  ;;  %v3524_v1 = vmul.f32 %v7016_v47, %v7277_v19  ;;  %v3528_v19 = vmul.f32 %v7016_v47, %v2455_v33 }
 0x315   : > { %v3284_v38 = vpop.f32.mrf.mxu0 }
 0x316   : > { %5880 = vmatprep.mubr.bf16.mxu1 %v3621_v14  ;;  %v3575_v5 = vadd.f32 %v3511_v9, %v3284_v38  ;;  %v2480_v60 = vpop.xlane.xlu0 %2479 }
 0x317   : > { %v5807_v25 = vpop.f32.mrf.mxu0  ;;  %5881 = vmatmul.mubr.bf16.gmra.mxu1 %v3622_v59  ;;  %v2485_v59 = vpop.xlane.xlu1 %2484 }
 0x318   : > { %v3578_v50 = vadd.f32 %v5807_v25, %v3514_v41 }
 0x319   : > { %v3287_v32 = vpop.f32.mrf.mxu0 }
 0x31a   : > { %v3576_v45 = vadd.f32 %v3512_v61, %v3287_v32  ;;  %v3624_v57 = vpack.c.bf16 %v3578_v50, %v3577_v37  ;;  %v3527_v50 = vmul.f32 %v7016_v47, %v2450_v46  ;;  %v3529_v32 = vmul.f32 %v7016_v47, %v2460_v42  ;;  %v2490_v6 = vpop.xlane.xlu0 %2489 }
 0x31b   : > { %v5810_v36 = vpop.f32.mrf.mxu0 }
 0x31c   : > { %v3623_v29 = vpack.c.bf16 %v3576_v45, %v3575_v5  ;;  %v3581_v26 = vadd.f32 %v5810_v36, %v3517_v31  ;;  %v2495_v45 = vpop.xlane.xlu1 %2494  ;;  %v3534_v31 = vmul.f32 %v7016_v47, %v2485_v59 }
 0x31d   : > { %v3300_v0 = vpop.f32.mrf.mxu0 }
 0x31e   : > { %5884 = vmatprep.mubr.bf16.mxu1 %v3623_v29  ;;  %v3579_v2 = vadd.f32 %v3515_v44, %v3300_v0  ;;  %v2500_v46 = vpop.xlane.xlu0 %2499 }
 0x31f   : > { %v5811_v13 = vpop.f32.mrf.mxu0  ;;  %5885 = vmatmul.mubr.bf16.gmra.mxu1 %v3624_v57 }
 0x320   : > { %v3582_v8 = vadd.f32 %v5811_v13, %v3518_v12 }
 0x321   : > { %v3303_v54 = vpop.f32.mrf.mxu0 }
 0x322   : > { %v3580_v39 = vadd.f32 %v3516_v15, %v3303_v54  ;;  %v3626_v22 = vpack.c.bf16 %v3582_v8, %v3581_v26  ;;  %v3531_v15 = vmul.f32 %v7016_v47, %v2470_v52  ;;  %v2505_v8 = vpop.xlane.xlu1 %2504  ;;  %v3533_v54 = vmul.f32 %v7016_v47, %v2480_v60 }
 0x323   : > { %v5814_v51 = vpop.f32.mrf.mxu0 }
 0x324   : > { %v3625_v18 = vpack.c.bf16 %v3580_v39, %v3579_v2  ;;  %v3585_v43 = vadd.f32 %v5814_v51, %v3521_v11  ;;  %v6427_v2 = vld [vmem:[#allocation11] ss:$0 sm:$0xff] }
 0x325   : > { %v3316_v58 = vpop.f32.mrf.mxu0  ;;  %v3532_v39 = vmul.f32 %v6427_v2, %v2475_v23  ;;  %v3535_v42 = vmul.f32 %v6427_v2, %v2490_v6  ;;  %v3537_v47 = vmul.f32 %v6427_v2, %v2500_v46 }
 0x326   : > { %5888 = vmatprep.mubr.bf16.mxu1 %v3625_v18  ;;  %v3583_v24 = vadd.f32 %v3519_v35, %v3316_v58  ;;  %v2515_v62 = vpop.xlane.xlu1 %2514 }
 0x327   : > { %v5815_v34 = vpop.f32.mrf.mxu0  ;;  %5889 = vmatmul.mubr.bf16.gmra.mxu1 %v3626_v22 }
 0x328   : > { %v3586_v55 = vadd.f32 %v5815_v34, %v3522_v28  ;;  %v3538_v34 = vmul.f32 %v6427_v2, %v2505_v8 }
 0x329   : > { %v3319_v48 = vpop.f32.mrf.mxu0 }
 0x32a   : > { %v3584_v40 = vadd.f32 %v3520_v16, %v3319_v48  ;;  %v3628_v7 = vpack.c.bf16 %v3586_v55, %v3585_v43  ;;  %v2510_v55 = vpop.xlane.xlu0 %2509  ;;  %v2525_v23 = vpop.xlane.xlu1 %2524 }
 0x32b   : > { %v5818_v3 = vpop.f32.mrf.mxu0 }
 0x32c   : > { %v3627_v10 = vpack.c.bf16 %v3584_v40, %v3583_v24  ;;  %v3589_v41 = vadd.f32 %v5818_v3, %v3525_v30  ;;  %v3536_v24 = vmul.f32 %v6427_v2, %v2495_v45  ;;  %v3542_v30 = vmul.f32 %v6427_v2, %v2525_v23 }
 0x32d   : > { %v3332_v17 = vpop.f32.mrf.mxu0 }
 0x32e   : > { %5892 = vmatprep.mubr.bf16.mxu1 %v3627_v10  ;;  %v3587_v27 = vadd.f32 %v3523_v20, %v3332_v17  ;;  %v2520_v17 = vpop.xlane.xlu0 %2519 }
 0x32f   : > { %v5819_v21 = vpop.f32.mrf.mxu0  ;;  %5893 = vmatmul.mubr.bf16.gmra.mxu1 %v3628_v7 }
 0x330   : > { %v3590_v53 = vadd.f32 %v5819_v21, %v3526_v49 }
 0x331   : > { %v3335_v63 = vpop.f32.mrf.mxu0 }
 0x332   : > { %v3588_v14 = vadd.f32 %v3524_v1, %v3335_v63  ;;  %v3630_v25 = vpack.c.bf16 %v3590_v53, %v3589_v41  ;;  %v3539_v1 = vmul.f32 %v6427_v2, %v2510_v55  ;;  %v3541_v53 = vmul.f32 %v6427_v2, %v2520_v17 }
 0x333   : > { %v5822_v38 = vpop.f32.mrf.mxu0 }
 0x334   : > { %v3629_v9 = vpack.c.bf16 %v3588_v14, %v3587_v27  ;;  %v3593_v57 = vadd.f32 %v5822_v38, %v3529_v32  ;;  %v3540_v27 = vmul.f32 %v6427_v2, %v2515_v62 }
 0x335   : > { %v3348_v61 = vpop.f32.mrf.mxu0 }
 0x336   : > { %5896 = vmatprep.mubr.bf16.mxu1 %v3629_v9  ;;  %v3591_v36 = vadd.f32 %v3527_v50, %v3348_v61  ;;  %v7311_v50 = vld [vmem:[#allocation11 + $0x1] ss:$0 sm:$0xff] }
 0x337   : > { %v5823_v5 = vpop.f32.mrf.mxu0  ;;  %5897 = vmatmul.mubr.bf16.gmra.mxu1 %v3630_v25 }
 0x338   : > { %v3594_v4 = vadd.f32 %v5823_v5, %v3530_v56 }
 0x339   : > { %v3351_v37 = vpop.f32.mrf.mxu0 }
 0x33a   : > { %v3592_v29 = vadd.f32 %v3528_v19, %v3351_v37  ;;  %v3632_v44 = vpack.c.bf16 %v3594_v4, %v3593_v57 }
 0x33b   : > { %v5826_v12 = vpop.f32.mrf.mxu0 }
 0x33c   : > { %v3631_v0 = vpack.c.bf16 %v3592_v29, %v3591_v36  ;;  %v3597_v28 = vadd.f32 %v5826_v12, %v3533_v54 }
 0x33d   : > { %v3364_v13 = vpop.f32.mrf.mxu0 }
 0x33e   : > { %5900 = vmatprep.mubr.bf16.mxu1 %v3631_v0  ;;  %v3595_v18 = vadd.f32 %v3531_v15, %v3364_v13 }
 0x33f   : > { %v5827_v33 = vpop.f32.mrf.mxu0  ;;  %5901 = vmatmul.mubr.bf16.gmra.mxu1 %v3632_v44 }
 0x340   : > { %v3598_v26 = vadd.f32 %v5827_v33, %v3534_v31 }
 0x341   : > { %v3367_v51 = vpop.f32.mrf.mxu0 }
 0x342   : > { %v3596_v22 = vadd.f32 %v3532_v39, %v3367_v51  ;;  %v3634_v11 = vpack.c.bf16 %v3598_v26, %v3597_v28 }
 0x343   : > { %v5830_v58 = vpop.f32.mrf.mxu0 }
 0x344   : > { %v3633_v35 = vpack.c.bf16 %v3596_v22, %v3595_v18  ;;  %v3601_v7 = vadd.f32 %v5830_v58, %v3537_v47 }
 0x345   : > { %v3380_v16 = vpop.f32.mrf.mxu0 }
 0x346   : > { %5904 = vmatprep.mubr.bf16.mxu1 %v3633_v35  ;;  %v3599_v3 = vadd.f32 %v3535_v42, %v3380_v16 }
 0x347   : > { %v5831_v48 = vpop.f32.mrf.mxu0  ;;  %5905 = vmatmul.mubr.bf16.gmra.mxu1 %v3634_v11 }
 0x348   : > { %v3602_v40 = vadd.f32 %v5831_v48, %v3538_v34 }
 0x349   : > { %v3383_v43 = vpop.f32.mrf.mxu0 }
 0x34a   : > { %v3600_v10 = vadd.f32 %v3536_v24, %v3383_v43  ;;  %v3636_v52 = vpack.c.bf16 %v3602_v40, %v3601_v7 }
 0x34b   : > { %v5834_v49 = vpop.f32.mrf.mxu0 }
 0x34c   : > { %v3635_v20 = vpack.c.bf16 %v3600_v10, %v3599_v3  ;;  %v3605_v9 = vadd.f32 %v5834_v49, %v3541_v53 }
 0x34d   : > { %v3396_v21 = vpop.f32.mrf.mxu0 }
 0x34e   : > { %5908 = vmatprep.mubr.bf16.mxu1 %v3635_v20  ;;  %v3603_v41 = vadd.f32 %v3539_v1, %v3396_v21 }
 0x34f   : > { %v5835_v63 = vpop.f32.mrf.mxu0  ;;  %5909 = vmatmul.mubr.bf16.gmra.mxu1 %v3636_v52 }
 0x350   : > { %v3606_v14 = vadd.f32 %v5835_v63, %v3542_v30 }
 0x351   : > { %v3399_v59 = vpop.f32.mrf.mxu0 }
 0x352   : > { %v3604_v38 = vadd.f32 %v3540_v27, %v3399_v59  ;;  %v3638_v25 = vpack.c.bf16 %v3606_v14, %v3605_v9 }
 0x354   : > { %v3637_v60 = vpack.c.bf16 %v3604_v38, %v3603_v41 }
 0x356   : > { %5912 = vmatprep.mubr.bf16.mxu1 %v3637_v60 }
 0x357   : > { %5913 = vmatmul.mubr.bf16.gmra.mxu1 %v3638_v25 }
 0x39f   : > { %v5854_v56 = vpop.f32.mrf.mxu1 }
 0x3a0   : > { %v3734_v45 = vadd.f32 %v5854_v56, %v7311_v50 }
 0x3a1   : > { %v3725_v61 = vpop.f32.mrf.mxu1 }
 0x3a2   : > { %v3726_v5 = vadd.f32 %v7311_v50, %v3725_v61  ;;  %v3982_v12 = vmax.f32 %v3734_v45, 0.0 }
 0x3a3   : > { %v5855_v32 = vpop.f32.mrf.mxu1 }
 0x3a4   : > { %v3737_v19 = vadd.f32 %v5855_v32, %v7311_v50  ;;  %v3980_v6 = vmax.f32 %v3726_v5, 0.0 }
 0x3a5   : > { %v3728_v4 = vpop.f32.mrf.mxu1 }
 0x3a6   : > { %v3729_v37 = vadd.f32 %v7311_v50, %v3728_v4  ;;  %v3983_v36 = vmax.f32 %v3737_v19, 0.0 }
 0x3a7   : > { %v5858_v29 = vpop.f32.mrf.mxu1 }
 0x3a8   : > { %v3981_v57 = vmax.f32 %v3729_v37, 0.0  ;;  %v4045_v31 = vpack.c.bf16 %v3983_v36, %v3982_v12  ;;  %v3750_v54 = vadd.f32 %v5858_v29, %v7311_v50 }
 0x3a9   : > { %v3741_v0 = vpop.f32.mrf.mxu1 }
 0x3aa   : > { %v4044_v44 = vpack.c.bf16 %v3981_v57, %v3980_v6  ;;  %v3742_v15 = vadd.f32 %v7311_v50, %v3741_v0  ;;  %v3986_v18 = vmax.f32 %v3750_v54, 0.0 }
 0x3ab   : > { %v5859_v13 = vpop.f32.mrf.mxu1 }
 0x3ac   : > { %v3753_v8 = vadd.f32 %v5859_v13, %v7311_v50  ;;  %5932 = vmatprep.mubr.bf16.mxu1 %v4044_v44  ;;  %v3984_v26 = vmax.f32 %v3742_v15, 0.0 }
 0x3ad   : > { %v3744_v33 = vpop.f32.mrf.mxu1  ;;  %5933 = vmatmul.mubr.bf16.vlgmr.msra.gmra.mxu1 %v4045_v31 }
 0x3ae   : > { %v3745_v2 = vadd.f32 %v7311_v50, %v3744_v33  ;;  %v3987_v39 = vmax.f32 %v3753_v8, 0.0 }
 0x3af   : > { %v5862_v46 = vpop.f32.mrf.mxu1 }
 0x3b0   : > { %v3985_v51 = vmax.f32 %v3745_v2, 0.0  ;;  %v4047_v58 = vpack.c.bf16 %v3987_v39, %v3986_v18  ;;  %v3766_v34 = vadd.f32 %v5862_v46, %v7311_v50 }
 0x3b1   : > { %v3757_v22 = vpop.f32.mrf.mxu1 }
 0x3b2   : > { %v4046_v28 = vpack.c.bf16 %v3985_v51, %v3984_v26  ;;  %v3758_v62 = vadd.f32 %v7311_v50, %v3757_v22  ;;  %v3990_v40 = vmax.f32 %v3766_v34, 0.0 }
 0x3b3   : > { %v5863_v35 = vpop.f32.mrf.mxu1 }
 0x3b4   : > { %v3769_v11 = vadd.f32 %v5863_v35, %v7311_v50  ;;  %5936 = vmatprep.mubr.bf16.mxu1 %v4046_v28  ;;  %v3988_v48 = vmax.f32 %v3758_v62, 0.0 }
 0x3b5   : > { %v3760_v16 = vpop.f32.mrf.mxu1  ;;  %5937 = vmatmul.mubr.bf16.gmra.mxu1 %v4047_v58 }
 0x3b6   : > { %v3761_v42 = vadd.f32 %v7311_v50, %v3760_v16  ;;  %v3991_v55 = vmax.f32 %v3769_v11, 0.0 }
 0x3b7   : > { %v5866_v47 = vpop.f32.mrf.mxu1 }
 0x3b8   : > { %v3989_v24 = vmax.f32 %v3761_v42, 0.0  ;;  %v4049_v10 = vpack.c.bf16 %v3991_v55, %v3990_v40  ;;  %v3782_v17 = vadd.f32 %v5866_v47, %v7311_v50 }
 0x3b9   : > { %v3773_v43 = vpop.f32.mrf.mxu1 }
 0x3ba   : > { %v4048_v3 = vpack.c.bf16 %v3989_v24, %v3988_v48  ;;  %v3774_v7 = vadd.f32 %v7311_v50, %v3773_v43  ;;  %v3994_v63 = vmax.f32 %v3782_v17, 0.0 }
 0x3bb   : > { %v5867_v23 = vpop.f32.mrf.mxu1 }
 0x3bc   : > { %v3785_v49 = vadd.f32 %v5867_v23, %v7311_v50  ;;  %5940 = vmatprep.mubr.bf16.mxu1 %v4048_v3  ;;  %v3992_v1 = vmax.f32 %v3774_v7, 0.0 }
 0x3bd   : > { %v3776_v20 = vpop.f32.mrf.mxu1  ;;  %5941 = vmatmul.mubr.bf16.gmra.mxu1 %v4049_v10 }
 0x3be   : > { %v3777_v52 = vadd.f32 %v7311_v50, %v3776_v20  ;;  %v3995_v30 = vmax.f32 %v3785_v49, 0.0 }
 0x3bf   : > { %v5870_v21 = vpop.f32.mrf.mxu1 }
 0x3c0   : > { %v3993_v53 = vmax.f32 %v3777_v52, 0.0  ;;  %v4051_v59 = vpack.c.bf16 %v3995_v30, %v3994_v63  ;;  %v3798_v60 = vadd.f32 %v5870_v21, %v7311_v50 }
 0x3c1   : > { %v3789_v27 = vpop.f32.mrf.mxu1 }
 0x3c2   : > { %v4050_v14 = vpack.c.bf16 %v3993_v53, %v3992_v1  ;;  %v3790_v38 = vadd.f32 %v7311_v50, %v3789_v27  ;;  %v3998_v45 = vmax.f32 %v3798_v60, 0.0 }
 0x3c3   : > { %v5871_v41 = vpop.f32.mrf.mxu1 }
 0x3c4   : > { %v3801_v9 = vadd.f32 %v5871_v41, %v7311_v50  ;;  %5944 = vmatprep.mubr.bf16.mxu1 %v4050_v14  ;;  %v3996_v5 = vmax.f32 %v3790_v38, 0.0 }
 0x3c5   : > { %v3792_v25 = vpop.f32.mrf.mxu1  ;;  %5945 = vmatmul.mubr.bf16.gmra.mxu1 %v4051_v59 }
 0x3c6   : > { %v3793_v56 = vadd.f32 %v7311_v50, %v3792_v25  ;;  %v3999_v61 = vmax.f32 %v3801_v9, 0.0 }
 0x3c7   : > { %v5874_v32 = vpop.f32.mrf.mxu1 }
 0x3c8   : > { %v3997_v19 = vmax.f32 %v3793_v56, 0.0  ;;  %v4053_v36 = vpack.c.bf16 %v3999_v61, %v3998_v45  ;;  %v3814_v12 = vadd.f32 %v5874_v32, %v7311_v50 }
 0x3c9   : > { %v3805_v4 = vpop.f32.mrf.mxu1 }
 0x3ca   : > { %v4052_v37 = vpack.c.bf16 %v3997_v19, %v3996_v5  ;;  %v3806_v6 = vadd.f32 %v7311_v50, %v3805_v4  ;;  %v4002_v54 = vmax.f32 %v3814_v12, 0.0 }
 0x3cb   : > { %v5875_v29 = vpop.f32.mrf.mxu1 }
 0x3cc   : > { %v3817_v57 = vadd.f32 %v5875_v29, %v7311_v50  ;;  %5948 = vmatprep.mubr.bf16.mxu1 %v4052_v37  ;;  %v4000_v15 = vmax.f32 %v3806_v6, 0.0 }
 0x3cd   : > { %v3808_v0 = vpop.f32.mrf.mxu1  ;;  %5949 = vmatmul.mubr.bf16.gmra.mxu1 %v4053_v36 }
 0x3ce   : > { %v3809_v44 = vadd.f32 %v7311_v50, %v3808_v0  ;;  %v4003_v31 = vmax.f32 %v3817_v57, 0.0 }
 0x3cf   : > { %v5878_v13 = vpop.f32.mrf.mxu1 }
 0x3d0   : > { %v4001_v8 = vmax.f32 %v3809_v44, 0.0  ;;  %v4055_v39 = vpack.c.bf16 %v4003_v31, %v4002_v54  ;;  %v3830_v18 = vadd.f32 %v5878_v13, %v7311_v50 }
 0x3d1   : > { %v3821_v33 = vpop.f32.mrf.mxu1 }
 0x3d2   : > { %v4054_v2 = vpack.c.bf16 %v4001_v8, %v4000_v15  ;;  %v3822_v26 = vadd.f32 %v7311_v50, %v3821_v33  ;;  %v4006_v34 = vmax.f32 %v3830_v18, 0.0 }
 0x3d3   : > { %v5879_v46 = vpop.f32.mrf.mxu1 }
 0x3d4   : > { %v3833_v51 = vadd.f32 %v5879_v46, %v7311_v50  ;;  %5952 = vmatprep.mubr.bf16.mxu1 %v4054_v2  ;;  %v4004_v62 = vmax.f32 %v3822_v26, 0.0 }
 0x3d5   : > { %v3824_v22 = vpop.f32.mrf.mxu1  ;;  %5953 = vmatmul.mubr.bf16.gmra.mxu1 %v4055_v39 }
 0x3d6   : > { %v3825_v28 = vadd.f32 %v7311_v50, %v3824_v22  ;;  %v4007_v58 = vmax.f32 %v3833_v51, 0.0 }
 0x3d7   : > { %v5882_v35 = vpop.f32.mrf.mxu1 }
 0x3d8   : > { %v4005_v11 = vmax.f32 %v3825_v28, 0.0  ;;  %v4057_v55 = vpack.c.bf16 %v4007_v58, %v4006_v34  ;;  %v3846_v40 = vadd.f32 %v5882_v35, %v7311_v50 }
 0x3d9   : > { %v3837_v16 = vpop.f32.mrf.mxu1 }
 0x3da   : > { %v4056_v42 = vpack.c.bf16 %v4005_v11, %v4004_v62  ;;  %v3838_v48 = vadd.f32 %v7311_v50, %v3837_v16  ;;  %v4010_v17 = vmax.f32 %v3846_v40, 0.0 }
 0x3db   : > { %v5883_v47 = vpop.f32.mrf.mxu1 }
 0x3dc   : > { %v3849_v24 = vadd.f32 %v5883_v47, %v7311_v50  ;;  %5956 = vmatprep.mubr.bf16.mxu1 %v4056_v42  ;;  %v4008_v7 = vmax.f32 %v3838_v48, 0.0 }
 0x3dd   : > { %v3840_v43 = vpop.f32.mrf.mxu1  ;;  %5957 = vmatmul.mubr.bf16.gmra.mxu1 %v4057_v55 }
 0x3de   : > { %v3841_v3 = vadd.f32 %v7311_v50, %v3840_v43  ;;  %v4011_v10 = vmax.f32 %v3849_v24, 0.0 }
 0x3df   : > { %v5886_v23 = vpop.f32.mrf.mxu1 }
 0x3e0   : > { %v4009_v49 = vmax.f32 %v3841_v3, 0.0  ;;  %v4059_v30 = vpack.c.bf16 %v4011_v10, %v4010_v17  ;;  %v3862_v63 = vadd.f32 %v5886_v23, %v7311_v50 }
 0x3e1   : > { %v3853_v20 = vpop.f32.mrf.mxu1 }
 0x3e2   : > { %v4058_v52 = vpack.c.bf16 %v4009_v49, %v4008_v7  ;;  %v3854_v1 = vadd.f32 %v7311_v50, %v3853_v20  ;;  %v4014_v60 = vmax.f32 %v3862_v63, 0.0 }
 0x3e3   : > { %v5887_v21 = vpop.f32.mrf.mxu1 }
 0x3e4   : > { %v3865_v53 = vadd.f32 %v5887_v21, %v7311_v50  ;;  %5960 = vmatprep.mubr.bf16.mxu1 %v4058_v52  ;;  %v4012_v38 = vmax.f32 %v3854_v1, 0.0 }
 0x3e5   : > { %v3856_v27 = vpop.f32.mrf.mxu1  ;;  %5961 = vmatmul.mubr.bf16.gmra.mxu1 %v4059_v30 }
 0x3e6   : > { %v3857_v14 = vadd.f32 %v7311_v50, %v3856_v27  ;;  %v4015_v59 = vmax.f32 %v3865_v53, 0.0 }
 0x3e7   : > { %v5890_v41 = vpop.f32.mrf.mxu1 }
 0x3e8   : > { %v4013_v9 = vmax.f32 %v3857_v14, 0.0  ;;  %v4061_v61 = vpack.c.bf16 %v4015_v59, %v4014_v60  ;;  %v3878_v45 = vadd.f32 %v5890_v41, %v7311_v50 }
 0x3e9   : > { %v3869_v25 = vpop.f32.mrf.mxu1 }
 0x3ea   : > { %v4060_v56 = vpack.c.bf16 %v4013_v9, %v4012_v38  ;;  %v3870_v5 = vadd.f32 %v7311_v50, %v3869_v25  ;;  %v4018_v12 = vmax.f32 %v3878_v45, 0.0 }
 0x3eb   : > { %v5891_v32 = vpop.f32.mrf.mxu1 }
 0x3ec   : > { %v3881_v19 = vadd.f32 %v5891_v32, %v7311_v50  ;;  %5964 = vmatprep.mubr.bf16.mxu1 %v4060_v56  ;;  %v4016_v6 = vmax.f32 %v3870_v5, 0.0 }
 0x3ed   : > { %v3872_v4 = vpop.f32.mrf.mxu1  ;;  %5965 = vmatmul.mubr.bf16.gmra.mxu1 %v4061_v61 }
 0x3ee   : > { %v3873_v37 = vadd.f32 %v7311_v50, %v3872_v4  ;;  %v4019_v36 = vmax.f32 %v3881_v19, 0.0 }
 0x3ef   : > { %v5894_v29 = vpop.f32.mrf.mxu1 }
 0x3f0   : > { %v4017_v57 = vmax.f32 %v3873_v37, 0.0  ;;  %v4063_v31 = vpack.c.bf16 %v4019_v36, %v4018_v12  ;;  %v3894_v54 = vadd.f32 %v5894_v29, %v7311_v50 }
 0x3f1   : > { %v3885_v0 = vpop.f32.mrf.mxu1 }
 0x3f2   : > { %v4062_v44 = vpack.c.bf16 %v4017_v57, %v4016_v6  ;;  %v3886_v15 = vadd.f32 %v7311_v50, %v3885_v0  ;;  %v4022_v18 = vmax.f32 %v3894_v54, 0.0 }
 0x3f3   : > { %v5895_v13 = vpop.f32.mrf.mxu1 }
 0x3f4   : > { %v3897_v8 = vadd.f32 %v5895_v13, %v7311_v50  ;;  %5968 = vmatprep.mubr.bf16.mxu1 %v4062_v44  ;;  %v4020_v26 = vmax.f32 %v3886_v15, 0.0 }
 0x3f5   : > { %v3888_v33 = vpop.f32.mrf.mxu1  ;;  %5969 = vmatmul.mubr.bf16.gmra.mxu1 %v4063_v31 }
 0x3f6   : > { %v3889_v2 = vadd.f32 %v7311_v50, %v3888_v33  ;;  %v4023_v39 = vmax.f32 %v3897_v8, 0.0 }
 0x3f7   : > { %v5898_v46 = vpop.f32.mrf.mxu1 }
 0x3f8   : > { %v4021_v51 = vmax.f32 %v3889_v2, 0.0  ;;  %v4065_v58 = vpack.c.bf16 %v4023_v39, %v4022_v18  ;;  %v3910_v34 = vadd.f32 %v5898_v46, %v7311_v50 }
 0x3f9   : > { %v3901_v22 = vpop.f32.mrf.mxu1 }
 0x3fa   : > { %v4064_v28 = vpack.c.bf16 %v4021_v51, %v4020_v26  ;;  %v3902_v62 = vadd.f32 %v7311_v50, %v3901_v22  ;;  %v4026_v40 = vmax.f32 %v3910_v34, 0.0 }
 0x3fb   : > { %v5899_v35 = vpop.f32.mrf.mxu1 }
 0x3fc   : > { %v3913_v11 = vadd.f32 %v5899_v35, %v7311_v50  ;;  %5972 = vmatprep.mubr.bf16.mxu1 %v4064_v28  ;;  %v4024_v48 = vmax.f32 %v3902_v62, 0.0 }
 0x3fd   : > { %v3904_v16 = vpop.f32.mrf.mxu1  ;;  %5973 = vmatmul.mubr.bf16.gmra.mxu1 %v4065_v58 }
 0x3fe   : > { %v3905_v42 = vadd.f32 %v7311_v50, %v3904_v16  ;;  %v4027_v55 = vmax.f32 %v3913_v11, 0.0 }
 0x3ff   : > { %v5902_v47 = vpop.f32.mrf.mxu1 }
 0x400   : > { %v4025_v24 = vmax.f32 %v3905_v42, 0.0  ;;  %v4067_v10 = vpack.c.bf16 %v4027_v55, %v4026_v40  ;;  %v3926_v17 = vadd.f32 %v5902_v47, %v7311_v50  ;;  %v7377_v42 = vld [vmem:[#allocation11 + $0x2] ss:$0 sm:$0xff] }
 0x401   : > { %v3917_v43 = vpop.f32.mrf.mxu1 }
 0x402   : > { %v4066_v3 = vpack.c.bf16 %v4025_v24, %v4024_v48  ;;  %v3918_v7 = vadd.f32 %v7311_v50, %v3917_v43  ;;  %v4030_v63 = vmax.f32 %v3926_v17, 0.0  ;;  %v6607_v24 = vmov 0.0  }
 0x403   : > { %v5903_v23 = vpop.f32.mrf.mxu1  ;;  %294 = vst [vmem:[#allocation4] sm:$0x3] %v6607_v24 }
 0x404   : > { %v3929_v49 = vadd.f32 %v5903_v23, %v7311_v50  ;;  %5976 = vmatprep.mubr.bf16.mxu1 %v4066_v3  ;;  %v4028_v1 = vmax.f32 %v3918_v7, 0.0 }
 0x405   : > { %v3920_v20 = vpop.f32.mrf.mxu1  ;;  %5977 = vmatmul.mubr.bf16.gmra.mxu1 %v4067_v10 }
 0x406   : > { %v3921_v52 = vadd.f32 %v7311_v50, %v3920_v20  ;;  %v4031_v30 = vmax.f32 %v3929_v49, 0.0 }
 0x407   : > { %v5906_v21 = vpop.f32.mrf.mxu1 }
 0x408   : > { %v4029_v53 = vmax.f32 %v3921_v52, 0.0  ;;  %v4069_v59 = vpack.c.bf16 %v4031_v30, %v4030_v63  ;;  %v3942_v60 = vadd.f32 %v5906_v21, %v7311_v50 }
 0x409   : > { %v3933_v27 = vpop.f32.mrf.mxu1 }
 0x40a   : > { %v4068_v14 = vpack.c.bf16 %v4029_v53, %v4028_v1  ;;  %v3934_v38 = vadd.f32 %v7311_v50, %v3933_v27  ;;  %v4034_v45 = vmax.f32 %v3942_v60, 0.0 }
 0x40b   : > { %v5907_v41 = vpop.f32.mrf.mxu1 }
 0x40c   : > { %v3945_v9 = vadd.f32 %v5907_v41, %v7311_v50  ;;  %5980 = vmatprep.mubr.bf16.mxu1 %v4068_v14  ;;  %v4032_v5 = vmax.f32 %v3934_v38, 0.0 }
 0x40d   : > { %v3936_v25 = vpop.f32.mrf.mxu1  ;;  %5981 = vmatmul.mubr.bf16.gmra.mxu1 %v4069_v59 }
 0x40e   : > { %v3937_v56 = vadd.f32 %v7311_v50, %v3936_v25  ;;  %v4035_v61 = vmax.f32 %v3945_v9, 0.0 }
 0x40f   : > { %v5910_v32 = vpop.f32.mrf.mxu1 }
 0x410   : > { %v4033_v19 = vmax.f32 %v3937_v56, 0.0  ;;  %v4071_v36 = vpack.c.bf16 %v4035_v61, %v4034_v45  ;;  %v3958_v12 = vadd.f32 %v5910_v32, %v7311_v50 }
 0x411   : > { %v3949_v4 = vpop.f32.mrf.mxu1 }
 0x412   : > { %v4070_v37 = vpack.c.bf16 %v4033_v19, %v4032_v5  ;;  %v3950_v6 = vadd.f32 %v7311_v50, %v3949_v4  ;;  %v4038_v54 = vmax.f32 %v3958_v12, 0.0 }
 0x413   : > { %v5911_v29 = vpop.f32.mrf.mxu1 }
 0x414   : > { %v3961_v57 = vadd.f32 %v5911_v29, %v7311_v50  ;;  %5984 = vmatprep.mubr.bf16.mxu1 %v4070_v37  ;;  %v4036_v15 = vmax.f32 %v3950_v6, 0.0 }
 0x415   : > { %v3952_v0 = vpop.f32.mrf.mxu1  ;;  %5985 = vmatmul.mubr.bf16.gmra.mxu1 %v4071_v36 }
 0x416   : > { %v3953_v44 = vadd.f32 %v7311_v50, %v3952_v0  ;;  %v4039_v31 = vmax.f32 %v3961_v57, 0.0 }
 0x417   : > { %v5914_v13 = vpop.f32.mrf.mxu1 }
 0x418   : > { %v4037_v8 = vmax.f32 %v3953_v44, 0.0  ;;  %v4073_v39 = vpack.c.bf16 %v4039_v31, %v4038_v54  ;;  %v3974_v18 = vadd.f32 %v5914_v13, %v7311_v50 }
 0x419   : > { %v3965_v33 = vpop.f32.mrf.mxu1 }
 0x41a   : > { %v4072_v2 = vpack.c.bf16 %v4037_v8, %v4036_v15  ;;  %v3966_v26 = vadd.f32 %v7311_v50, %v3965_v33  ;;  %v4042_v11 = vmax.f32 %v3974_v18, 0.0 }
 0x41b   : > { %v5915_v46 = vpop.f32.mrf.mxu1 }
 0x41c   : > { %v3977_v51 = vadd.f32 %v5915_v46, %v7311_v50  ;;  %5988 = vmatprep.mubr.bf16.mxu1 %v4072_v2  ;;  %v4040_v35 = vmax.f32 %v3966_v26, 0.0 }
 0x41d   : > { %v3968_v22 = vpop.f32.mrf.mxu1  ;;  %5989 = vmatmul.mubr.bf16.gmra.mxu1 %v4073_v39 }
 0x41e   : > { %v3969_v28 = vadd.f32 %v7311_v50, %v3968_v22  ;;  %v4043_v58 = vmax.f32 %v3977_v51, 0.0 }
 0x420   : > { %v4041_v62 = vmax.f32 %v3969_v28, 0.0  ;;  %v4075_v16 = vpack.c.bf16 %v4043_v58, %v4042_v11 }
 0x422   : > { %v4074_v34 = vpack.c.bf16 %v4041_v62, %v4040_v35 }
 0x424   : > { %5992 = vmatprep.mubr.bf16.mxu1 %v4074_v34 }
 0x425   : > { %5993 = vmatmul.mubr.bf16.gmra.mxu1 %v4075_v16 }
 0x46d   : > { %v5934_v55 = vpop.f32.mrf.mxu1 }
 0x46e   : > { %v4171_v47 = vadd.f32 %v5934_v55, %v7377_v42 }
 0x46f   : > { %v4162_v48 = vpop.f32.mrf.mxu1 }
 0x470   : > { %4485 = vst [vmem:[#allocation3 + $0x70] sm:$0xff] %v4171_v47  ;;  %v4163_v40 = vadd.f32 %v7377_v42, %v4162_v48  ;;  %v4622_v30 = vmul.f32 %v4171_v47, %v4171_v47 }
 0x471   : > { %v5935_v50 = vpop.f32.mrf.mxu1 }
 0x472   : > { %4483 = vst [vmem:[#allocation3 + $0x68] sm:$0xff] %v4163_v40  ;;  %v4174_v43 = vadd.f32 %v5935_v50, %v7377_v42  ;;  %v4620_v7 = vmul.f32 %v4163_v40, %v4163_v40 }
 0x473   : > { %v4165_v3 = vpop.f32.mrf.mxu1 }
 0x474   : > { %4486 = vst [vmem:[#allocation3 + $0x160] sm:$0xff] %v4174_v43  ;;  %v4166_v10 = vadd.f32 %v7377_v42, %v4165_v3  ;;  %v4623_v27 = vmul.f32 %v4174_v43, %v4174_v43 }
 0x475   : > { %v5938_v23 = vpop.f32.mrf.mxu1 }
 0x476   : > { %4484 = vst [vmem:[#allocation3 + $0x150] sm:$0xff] %v4166_v10  ;;  %v4548_v49 = vadd.f32 %v4166_v10, %v4163_v40  ;;  %v4621_v17 = vmul.f32 %v4166_v10, %v4166_v10  ;;  %v4187_v20 = vadd.f32 %v5938_v23, %v7377_v42 }
 0x477   : > { %v4178_v52 = vpop.f32.mrf.mxu1 }
 0x478   : > { %v4549_v21 = vadd.f32 %v4548_v49, %v4171_v47  ;;  %v4684_v1 = vadd.f32 %v4621_v17, %v4620_v7  ;;  %4489 = vst [vmem:[#allocation3 + $0x1e0] sm:$0xff] %v4187_v20  ;;  %v4179_v53 = vadd.f32 %v7377_v42, %v4178_v52  ;;  %v4626_v37 = vmul.f32 %v4187_v20, %v4187_v20 }
 0x479   : > { %v5939_v63 = vpop.f32.mrf.mxu1 }
 0x47a   : > { %v4685_v14 = vadd.f32 %v4684_v1, %v4622_v30  ;;  %4487 = vst [vmem:[#allocation3 + $0xd0] sm:$0xff] %v4179_v53  ;;  %v4550_v59 = vadd.f32 %v4549_v21, %v4174_v43  ;;  %v4190_v41 = vadd.f32 %v5939_v63, %v7377_v42  ;;  %v4624_v60 = vmul.f32 %v4179_v53, %v4179_v53 }
 0x47b   : > { %v4181_v38 = vpop.f32.mrf.mxu1 }
 0x47c   : > { %v4551_v9 = vadd.f32 %v4550_v59, %v4179_v53  ;;  %v4686_v25 = vadd.f32 %v4685_v14, %v4623_v27  ;;  %4490 = vst [vmem:[#allocation3 + $0x30] sm:$0xff] %v4190_v41  ;;  %v4182_v56 = vadd.f32 %v7377_v42, %v4181_v38  ;;  %v4627_v12 = vmul.f32 %v4190_v41, %v4190_v41 }
 0x47d   : > { %v5942_v61 = vpop.f32.mrf.mxu1 }
 0x47e   : > { %v4687_v32 = vadd.f32 %v4686_v25, %v4624_v60  ;;  %4488 = vst [vmem:[#allocation3 + $0xd8] sm:$0xff] %v4182_v56  ;;  %v4552_v5 = vadd.f32 %v4551_v9, %v4182_v56  ;;  %v4625_v19 = vmul.f32 %v4182_v56, %v4182_v56  ;;  %v4203_v45 = vadd.f32 %v5942_v61, %v7377_v42 }
 0x47f   : > { %v4194_v4 = vpop.f32.mrf.mxu1 }
 0x480   : > { %v4553_v36 = vadd.f32 %v4552_v5, %v4187_v20  ;;  %v4688_v29 = vadd.f32 %v4687_v32, %v4625_v19  ;;  %4493 = vst [vmem:[#allocation3 + $0x1f0] sm:$0xff] %v4203_v45  ;;  %v4195_v6 = vadd.f32 %v7377_v42, %v4194_v4  ;;  %v4630_v22 = vmul.f32 %v4203_v45, %v4203_v45 }
 0x481   : > { %v5943_v57 = vpop.f32.mrf.mxu1 }
 0x482   : > { %v4689_v0 = vadd.f32 %v4688_v29, %v4626_v37  ;;  %4491 = vst [vmem:[#allocation3 + $0x148] sm:$0xff] %v4195_v6  ;;  %v4554_v44 = vadd.f32 %v4553_v36, %v4190_v41  ;;  %v4206_v31 = vadd.f32 %v5943_v57, %v7377_v42  ;;  %v4628_v8 = vmul.f32 %v4195_v6, %v4195_v6 }
 0x483   : > { %v4197_v13 = vpop.f32.mrf.mxu1 }
 0x484   : > { %v4555_v15 = vadd.f32 %v4554_v44, %v4195_v6  ;;  %v4690_v54 = vadd.f32 %v4689_v0, %v4627_v12  ;;  %4494 = vst [vmem:[#allocation3 + $0x130] sm:$0xff] %v4206_v31  ;;  %v4198_v33 = vadd.f32 %v7377_v42, %v4197_v13  ;;  %v4631_v11 = vmul.f32 %v4206_v31, %v4206_v31 }
 0x485   : > { %v5946_v2 = vpop.f32.mrf.mxu1 }
 0x486   : > { %v4691_v39 = vadd.f32 %v4690_v54, %v4628_v8  ;;  %4492 = vst [vmem:[#allocation3 + $0x50] sm:$0xff] %v4198_v33  ;;  %v4556_v46 = vadd.f32 %v4555_v15, %v4198_v33  ;;  %v4629_v26 = vmul.f32 %v4198_v33, %v4198_v33  ;;  %v4219_v51 = vadd.f32 %v5946_v2, %v7377_v42 }
 0x487   : > { %v4210_v18 = vpop.f32.mrf.mxu1 }
 0x488   : > { %v4557_v28 = vadd.f32 %v4556_v46, %v4203_v45  ;;  %v4692_v58 = vadd.f32 %v4691_v39, %v4629_v26  ;;  %4497 = vst [vmem:[#allocation3 + $0x88] sm:$0xff] %v4219_v51  ;;  %v4211_v35 = vadd.f32 %v7377_v42, %v4210_v18  ;;  %v4634_v17 = vmul.f32 %v4219_v51, %v4219_v51 }
 0x489   : > { %v5947_v62 = vpop.f32.mrf.mxu1 }
 0x48a   : > { %v4693_v34 = vadd.f32 %v4692_v58, %v4630_v22  ;;  %4495 = vst [vmem:[#allocation3 + $0x190] sm:$0xff] %v4211_v35  ;;  %v4558_v16 = vadd.f32 %v4557_v28, %v4206_v31  ;;  %v4222_v55 = vadd.f32 %v5947_v62, %v7377_v42  ;;  %v4632_v24 = vmul.f32 %v4211_v35, %v4211_v35 }
 0x48b   : > { %v4213_v47 = vpop.f32.mrf.mxu1 }
 0x48c   : > { %v4559_v48 = vadd.f32 %v4558_v16, %v4211_v35  ;;  %v4694_v40 = vadd.f32 %v4693_v34, %v4631_v11  ;;  %4498 = vst [vmem:[#allocation3 + $0x38] sm:$0xff] %v4222_v55  ;;  %v4214_v50 = vadd.f32 %v7377_v42, %v4213_v47  ;;  %v4635_v1 = vmul.f32 %v4222_v55, %v4222_v55 }
 0x48d   : > { %v5950_v43 = vpop.f32.mrf.mxu1 }
 0x48e   : > { %v4695_v3 = vadd.f32 %v4694_v40, %v4632_v24  ;;  %4496 = vst [vmem:[#allocation3 + $0x8] sm:$0xff] %v4214_v50  ;;  %v4560_v10 = vadd.f32 %v4559_v48, %v4214_v50  ;;  %v4633_v23 = vmul.f32 %v4214_v50, %v4214_v50  ;;  %v4235_v7 = vadd.f32 %v5950_v43, %v7377_v42 }
 0x48f   : > { %v4226_v49 = vpop.f32.mrf.mxu1 }
 0x490   : > { %v4561_v20 = vadd.f32 %v4560_v10, %v4219_v51  ;;  %v4696_v52 = vadd.f32 %v4695_v3, %v4633_v23  ;;  %4501 = vst [vmem:[#allocation3 + $0x1a8] sm:$0xff] %v4235_v7  ;;  %v4227_v30 = vadd.f32 %v7377_v42, %v4226_v49  ;;  %v4638_v19 = vmul.f32 %v4235_v7, %v4235_v7 }
 0x491   : > { %v5951_v21 = vpop.f32.mrf.mxu1 }
 0x492   : > { %v4697_v53 = vadd.f32 %v4696_v52, %v4634_v17  ;;  %4499 = vst [vmem:[#allocation3 + $0xe0] sm:$0xff] %v4227_v30  ;;  %v4562_v63 = vadd.f32 %v4561_v20, %v4222_v55  ;;  %v4238_v27 = vadd.f32 %v5951_v21, %v7377_v42  ;;  %v4636_v41 = vmul.f32 %v4227_v30, %v4227_v30 }
 0x493   : > { %v4229_v14 = vpop.f32.mrf.mxu1 }
 0x494   : > { %v4563_v59 = vadd.f32 %v4562_v63, %v4227_v30  ;;  %v4698_v38 = vadd.f32 %v4697_v53, %v4635_v1  ;;  %4502 = vst [vmem:[#allocation3 + $0xa0] sm:$0xff] %v4238_v27  ;;  %v4230_v9 = vadd.f32 %v7377_v42, %v4229_v14  ;;  %v4639_v29 = vmul.f32 %v4238_v27, %v4238_v27 }
 0x495   : > { %v5954_v60 = vpop.f32.mrf.mxu1 }
 0x496   : > { %v4699_v25 = vadd.f32 %v4698_v38, %v4636_v41  ;;  %4500 = vst [vmem:[#allocation3 + $0x10] sm:$0xff] %v4230_v9  ;;  %v4564_v56 = vadd.f32 %v4563_v59, %v4230_v9  ;;  %v4637_v61 = vmul.f32 %v4230_v9, %v4230_v9  ;;  %v4251_v32 = vadd.f32 %v5954_v60, %v7377_v42 }
 0x497   : > { %v4242_v5 = vpop.f32.mrf.mxu1 }
 0x498   : > { %v4565_v45 = vadd.f32 %v4564_v56, %v4235_v7  ;;  %v4700_v4 = vadd.f32 %v4699_v25, %v4637_v61  ;;  %4505 = vst [vmem:[#allocation3 + $0x108] sm:$0xff] %v4251_v32  ;;  %v4243_v37 = vadd.f32 %v7377_v42, %v4242_v5  ;;  %v4642_v26 = vmul.f32 %v4251_v32, %v4251_v32 }
 0x499   : > { %v5955_v36 = vpop.f32.mrf.mxu1 }
 0x49a   : > { %v4701_v6 = vadd.f32 %v4700_v4, %v4638_v19  ;;  %4503 = vst [vmem:[#allocation3 + $0x1c0] sm:$0xff] %v4243_v37  ;;  %v4566_v57 = vadd.f32 %v4565_v45, %v4238_v27  ;;  %v4254_v12 = vadd.f32 %v5955_v36, %v7377_v42  ;;  %v4640_v31 = vmul.f32 %v4243_v37, %v4243_v37 }
 0x49b   : > { %v4245_v0 = vpop.f32.mrf.mxu1 }
 0x49c   : > { %v4567_v44 = vadd.f32 %v4566_v57, %v4243_v37  ;;  %v4702_v13 = vadd.f32 %v4701_v6, %v4639_v29  ;;  %4506 = vst [vmem:[#allocation3 + $0x80] sm:$0xff] %v4254_v12  ;;  %v4246_v15 = vadd.f32 %v7377_v42, %v4245_v0  ;;  %v4643_v58 = vmul.f32 %v4254_v12, %v4254_v12 }
 0x49d   : > { %v5958_v8 = vpop.f32.mrf.mxu1 }
 0x49e   : > { %v4703_v54 = vadd.f32 %v4702_v13, %v4640_v31  ;;  %4504 = vst [vmem:[#allocation3 + $0x78] sm:$0xff] %v4246_v15  ;;  %v4568_v33 = vadd.f32 %v4567_v44, %v4246_v15  ;;  %v4641_v2 = vmul.f32 %v4246_v15, %v4246_v15  ;;  %v4267_v39 = vadd.f32 %v5958_v8, %v7377_v42 }
 0x49f   : > { %v4258_v46 = vpop.f32.mrf.mxu1 }
 0x4a0   : > { %v4569_v51 = vadd.f32 %v4568_v33, %v4251_v32  ;;  %v4704_v18 = vadd.f32 %v4703_v54, %v4641_v2  ;;  %4509 = vst [vmem:[#allocation3 + $0x40] sm:$0xff] %v4267_v39  ;;  %v4259_v22 = vadd.f32 %v7377_v42, %v4258_v46  ;;  %v4646_v23 = vmul.f32 %v4267_v39, %v4267_v39 }
 0x4a1   : > { %v5959_v28 = vpop.f32.mrf.mxu1 }
 0x4a2   : > { %v4705_v35 = vadd.f32 %v4704_v18, %v4642_v26  ;;  %4507 = vst [vmem:[#allocation3 + $0x58] sm:$0xff] %v4259_v22  ;;  %v4570_v62 = vadd.f32 %v4569_v51, %v4254_v12  ;;  %v4270_v11 = vadd.f32 %v5959_v28, %v7377_v42  ;;  %v4644_v55 = vmul.f32 %v4259_v22, %v4259_v22 }
 0x4a3   : > { %v4261_v34 = vpop.f32.mrf.mxu1 }
 0x4a4   : > { %v4571_v16 = vadd.f32 %v4570_v62, %v4259_v22  ;;  %v4706_v47 = vadd.f32 %v4705_v35, %v4643_v58  ;;  %4510 = vst [vmem:[#allocation3 + $0x1a0] sm:$0xff] %v4270_v11  ;;  %v4262_v48 = vadd.f32 %v7377_v42, %v4261_v34  ;;  %v4647_v52 = vmul.f32 %v4270_v11, %v4270_v11 }
 0x4a5   : > { %v5962_v24 = vpop.f32.mrf.mxu1 }
 0x4a6   : > { %v4707_v40 = vadd.f32 %v4706_v47, %v4644_v55  ;;  %4508 = vst [vmem:[#allocation3 + $0x48] sm:$0xff] %v4262_v48  ;;  %v4572_v50 = vadd.f32 %v4571_v16, %v4262_v48  ;;  %v4645_v43 = vmul.f32 %v4262_v48, %v4262_v48  ;;  %v4283_v3 = vadd.f32 %v5962_v24, %v7377_v42 }
 0x4a7   : > { %v4274_v10 = vpop.f32.mrf.mxu1 }
 0x4a8   : > { %v4573_v7 = vadd.f32 %v4572_v50, %v4267_v39  ;;  %v4708_v49 = vadd.f32 %v4707_v40, %v4645_v43  ;;  %4513 = vst [vmem:[#allocation3 + $0x168] sm:$0xff] %v4283_v3  ;;  %v4275_v17 = vadd.f32 %v7377_v42, %v4274_v10  ;;  %v4650_v61 = vmul.f32 %v4283_v3, %v4283_v3 }
 0x4a9   : > { %v5963_v20 = vpop.f32.mrf.mxu1 }
 0x4aa   : > { %v4709_v30 = vadd.f32 %v4708_v49, %v4646_v23  ;;  %4511 = vst [vmem:[#allocation3 + $0x198] sm:$0xff] %v4275_v17  ;;  %v4574_v21 = vadd.f32 %v4573_v7, %v4270_v11  ;;  %v4286_v1 = vadd.f32 %v5963_v20, %v7377_v42  ;;  %v4648_v27 = vmul.f32 %v4275_v17, %v4275_v17 }
 0x4ab   : > { %v4277_v53 = vpop.f32.mrf.mxu1 }
 0x4ac   : > { %v4575_v63 = vadd.f32 %v4574_v21, %v4275_v17  ;;  %v4710_v14 = vadd.f32 %v4709_v30, %v4647_v52  ;;  %4514 = vst [vmem:[#allocation3 + $0x158] sm:$0xff] %v4286_v1  ;;  %v4278_v59 = vadd.f32 %v7377_v42, %v4277_v53  ;;  %v4651_v4 = vmul.f32 %v4286_v1, %v4286_v1 }
 0x4ad   : > { %v5966_v41 = vpop.f32.mrf.mxu1 }
 0x4ae   : > { %v4711_v38 = vadd.f32 %v4710_v14, %v4648_v27  ;;  %4512 = vst [vmem:[#allocation3 + $0xe8] sm:$0xff] %v4278_v59  ;;  %v4576_v9 = vadd.f32 %v4575_v63, %v4278_v59  ;;  %v4649_v60 = vmul.f32 %v4278_v59, %v4278_v59  ;;  %v4299_v25 = vadd.f32 %v5966_v41, %v7377_v42 }
 0x4af   : > { %v4290_v56 = vpop.f32.mrf.mxu1 }
 0x4b0   : > { %v4577_v32 = vadd.f32 %v4576_v9, %v4283_v3  ;;  %v4712_v5 = vadd.f32 %v4711_v38, %v4649_v60  ;;  %4517 = vst [vmem:[#allocation3] sm:$0xff] %v4299_v25  ;;  %v4291_v19 = vadd.f32 %v7377_v42, %v4290_v56  ;;  %v4654_v2 = vmul.f32 %v4299_v25, %v4299_v25 }
 0x4b1   : > { %v5967_v45 = vpop.f32.mrf.mxu1 }
 0x4b2   : > { %v4713_v37 = vadd.f32 %v4712_v5, %v4650_v61  ;;  %4515 = vst [vmem:[#allocation3 + $0x1d8] sm:$0xff] %v4291_v19  ;;  %v4578_v36 = vadd.f32 %v4577_v32, %v4286_v1  ;;  %v4302_v29 = vadd.f32 %v5967_v45, %v7377_v42  ;;  %v4652_v12 = vmul.f32 %v4291_v19, %v4291_v19 }
 0x4b3   : > { %v4293_v6 = vpop.f32.mrf.mxu1 }
 0x4b4   : > { %v4579_v57 = vadd.f32 %v4578_v36, %v4291_v19  ;;  %v4714_v0 = vadd.f32 %v4713_v37, %v4651_v4  ;;  %4518 = vst [vmem:[#allocation3 + $0x1c8] sm:$0xff] %v4302_v29  ;;  %v4294_v44 = vadd.f32 %v7377_v42, %v4293_v6  ;;  %v4655_v18 = vmul.f32 %v4302_v29, %v4302_v29 }
 0x4b5   : > { %v5970_v31 = vpop.f32.mrf.mxu1 }
 0x4b6   : > { %v4715_v13 = vadd.f32 %v4714_v0, %v4652_v12  ;;  %4516 = vst [vmem:[#allocation3 + $0x28] sm:$0xff] %v4294_v44  ;;  %v4580_v15 = vadd.f32 %v4579_v57, %v4294_v44  ;;  %v4653_v8 = vmul.f32 %v4294_v44, %v4294_v44  ;;  %v4315_v54 = vadd.f32 %v5970_v31, %v7377_v42 }
 0x4b7   : > { %v4306_v33 = vpop.f32.mrf.mxu1 }
 0x4b8   : > { %v4581_v39 = vadd.f32 %v4580_v15, %v4299_v25  ;;  %v4716_v46 = vadd.f32 %v4715_v13, %v4653_v8  ;;  %4521 = vst [vmem:[#allocation3 + $0x60] sm:$0xff] %v4315_v54  ;;  %v4307_v26 = vadd.f32 %v7377_v42, %v4306_v33  ;;  %v4658_v43 = vmul.f32 %v4315_v54, %v4315_v54 }
 0x4b9   : > { %v5971_v51 = vpop.f32.mrf.mxu1 }
 0x4ba   : > { %v4717_v22 = vadd.f32 %v4716_v46, %v4654_v2  ;;  %4519 = vst [vmem:[#allocation3 + $0x1e8] sm:$0xff] %v4307_v26  ;;  %v4582_v28 = vadd.f32 %v4581_v39, %v4302_v29  ;;  %v4318_v58 = vadd.f32 %v5971_v51, %v7377_v42  ;;  %v4656_v11 = vmul.f32 %v4307_v26, %v4307_v26 }
 0x4bb   : > { %v4309_v35 = vpop.f32.mrf.mxu1 }
 0x4bc   : > { %v4583_v62 = vadd.f32 %v4582_v28, %v4307_v26  ;;  %v4718_v34 = vadd.f32 %v4717_v22, %v4655_v18  ;;  %4522 = vst [vmem:[#allocation3 + $0x98] sm:$0xff] %v4318_v58  ;;  %v4310_v16 = vadd.f32 %v7377_v42, %v4309_v35  ;;  %v4659_v49 = vmul.f32 %v4318_v58, %v4318_v58 }
 0x4bd   : > { %v5974_v55 = vpop.f32.mrf.mxu1 }
 0x4be   : > { %v4719_v47 = vadd.f32 %v4718_v34, %v4656_v11  ;;  %4520 = vst [vmem:[#allocation3 + $0x140] sm:$0xff] %v4310_v16  ;;  %v4584_v48 = vadd.f32 %v4583_v62, %v4310_v16  ;;  %v4657_v24 = vmul.f32 %v4310_v16, %v4310_v16  ;;  %v4331_v40 = vadd.f32 %v5974_v55, %v7377_v42 }
 0x4bf   : > { %v4322_v50 = vpop.f32.mrf.mxu1 }
 0x4c0   : > { %v4585_v3 = vadd.f32 %v4584_v48, %v4315_v54  ;;  %v4720_v10 = vadd.f32 %v4719_v47, %v4657_v24  ;;  %4525 = vst [vmem:[#allocation3 + $0xc8] sm:$0xff] %v4331_v40  ;;  %v4323_v23 = vadd.f32 %v7377_v42, %v4322_v50  ;;  %v4662_v60 = vmul.f32 %v4331_v40, %v4331_v40 }
 0x4c1   : > { %v5975_v7 = vpop.f32.mrf.mxu1 }
 0x4c2   : > { %v4721_v17 = vadd.f32 %v4720_v10, %v4658_v43  ;;  %4523 = vst [vmem:[#allocation3 + $0x1b8] sm:$0xff] %v4323_v23  ;;  %v4586_v20 = vadd.f32 %v4585_v3, %v4318_v58  ;;  %v4334_v52 = vadd.f32 %v5975_v7, %v7377_v42  ;;  %v4660_v1 = vmul.f32 %v4323_v23, %v4323_v23 }
 0x4c3   : > { %v4325_v30 = vpop.f32.mrf.mxu1 }
 0x4c4   : > { %v4587_v21 = vadd.f32 %v4586_v20, %v4323_v23  ;;  %v4722_v53 = vadd.f32 %v4721_v17, %v4659_v49  ;;  %4526 = vst [vmem:[#allocation3 + $0xf8] sm:$0xff] %v4334_v52  ;;  %v4326_v63 = vadd.f32 %v7377_v42, %v4325_v30  ;;  %v4663_v5 = vmul.f32 %v4334_v52, %v4334_v52 }
 0x4c5   : > { %v5978_v27 = vpop.f32.mrf.mxu1 }
 0x4c6   : > { %v4723_v14 = vadd.f32 %v4722_v53, %v4660_v1  ;;  %4524 = vst [vmem:[#allocation3 + $0x100] sm:$0xff] %v4326_v63  ;;  %v4588_v59 = vadd.f32 %v4587_v21, %v4326_v63  ;;  %v4661_v41 = vmul.f32 %v4326_v63, %v4326_v63  ;;  %v4347_v38 = vadd.f32 %v5978_v27, %v7377_v42 }
 0x4c7   : > { %v4338_v9 = vpop.f32.mrf.mxu1 }
 0x4c8   : > { %v4589_v25 = vadd.f32 %v4588_v59, %v4331_v40  ;;  %v4724_v56 = vadd.f32 %v4723_v14, %v4661_v41  ;;  %4529 = vst [vmem:[#allocation3 + $0xb0] sm:$0xff] %v4347_v38  ;;  %v4339_v61 = vadd.f32 %v7377_v42, %v4338_v9  ;;  %v4666_v8 = vmul.f32 %v4347_v38, %v4347_v38 }
 0x4c9   : > { %v5979_v32 = vpop.f32.mrf.mxu1 }
 0x4ca   : > { %v4725_v19 = vadd.f32 %v4724_v56, %v4662_v60  ;;  %4527 = vst [vmem:[#allocation3 + $0x178] sm:$0xff] %v4339_v61  ;;  %v4590_v45 = vadd.f32 %v4589_v25, %v4334_v52  ;;  %v4350_v4 = vadd.f32 %v5979_v32, %v7377_v42  ;;  %v4664_v29 = vmul.f32 %v4339_v61, %v4339_v61 }
 0x4cb   : > { %v4341_v37 = vpop.f32.mrf.mxu1 }
 0x4cc   : > { %v4591_v36 = vadd.f32 %v4590_v45, %v4339_v61  ;;  %v4726_v6 = vadd.f32 %v4725_v19, %v4663_v5  ;;  %4530 = vst [vmem:[#allocation3 + $0x110] sm:$0xff] %v4350_v4  ;;  %v4342_v57 = vadd.f32 %v7377_v42, %v4341_v37  ;;  %v4667_v46 = vmul.f32 %v4350_v4, %v4350_v4 }
 0x4cd   : > { %v5982_v12 = vpop.f32.mrf.mxu1 }
 0x4ce   : > { %v4727_v0 = vadd.f32 %v4726_v6, %v4664_v29  ;;  %4528 = vst [vmem:[#allocation3 + $0x180] sm:$0xff] %v4342_v57  ;;  %v4592_v44 = vadd.f32 %v4591_v36, %v4342_v57  ;;  %v4665_v31 = vmul.f32 %v4342_v57, %v4342_v57  ;;  %v4363_v13 = vadd.f32 %v5982_v12, %v7377_v42 }
 0x4cf   : > { %v4354_v15 = vpop.f32.mrf.mxu1 }
 0x4d0   : > { %v4593_v54 = vadd.f32 %v4592_v44, %v4347_v38  ;;  %v4728_v33 = vadd.f32 %v4727_v0, %v4665_v31  ;;  %4533 = vst [vmem:[#allocation3 + $0x120] sm:$0xff] %v4363_v13  ;;  %v4355_v2 = vadd.f32 %v7377_v42, %v4354_v15  ;;  %v4670_v24 = vmul.f32 %v4363_v13, %v4363_v13 }
 0x4d1   : > { %v5983_v39 = vpop.f32.mrf.mxu1 }
 0x4d2   : > { %v4729_v26 = vadd.f32 %v4728_v33, %v4666_v8  ;;  %4531 = vst [vmem:[#allocation3 + $0x20] sm:$0xff] %v4355_v2  ;;  %v4594_v51 = vadd.f32 %v4593_v54, %v4350_v4  ;;  %v4366_v18 = vadd.f32 %v5983_v39, %v7377_v42  ;;  %v4668_v58 = vmul.f32 %v4355_v2, %v4355_v2 }
 0x4d3   : > { %v4357_v22 = vpop.f32.mrf.mxu1 }
 0x4d4   : > { %v4595_v28 = vadd.f32 %v4594_v51, %v4355_v2  ;;  %v4730_v35 = vadd.f32 %v4729_v26, %v4667_v46  ;;  %4534 = vst [vmem:[#allocation3 + $0x90] sm:$0xff] %v4366_v18  ;;  %v4358_v62 = vadd.f32 %v7377_v42, %v4357_v22  ;;  %v4671_v10 = vmul.f32 %v4366_v18, %v4366_v18 }
 0x4d5   : > { %v5986_v11 = vpop.f32.mrf.mxu1 }
 0x4d6   : > { %v4731_v34 = vadd.f32 %v4730_v35, %v4668_v58  ;;  %4532 = vst [vmem:[#allocation3 + $0xb8] sm:$0xff] %v4358_v62  ;;  %v4596_v16 = vadd.f32 %v4595_v28, %v4358_v62  ;;  %v4669_v55 = vmul.f32 %v4358_v62, %v4358_v62  ;;  %v4379_v47 = vadd.f32 %v5986_v11, %v7377_v42 }
 0x4d7   : > { %v4370_v48 = vpop.f32.mrf.mxu1 }
 0x4d8   : > { %v4597_v40 = vadd.f32 %v4596_v16, %v4363_v13  ;;  %v4732_v50 = vadd.f32 %v4731_v34, %v4669_v55  ;;  %4537 = vst [vmem:[#allocation3 + $0x138] sm:$0xff] %v4379_v47  ;;  %v4371_v43 = vadd.f32 %v7377_v42, %v4370_v48  ;;  %v4674_v41 = vmul.f32 %v4379_v47, %v4379_v47 }
 0x4d9   : > { %v5987_v3 = vpop.f32.mrf.mxu1 }
 0x4da   : > { %v4733_v23 = vadd.f32 %v4732_v50, %v4670_v24  ;;  %4535 = vst [vmem:[#allocation3 + $0xa8] sm:$0xff] %v4371_v43  ;;  %v4598_v7 = vadd.f32 %v4597_v40, %v4366_v18  ;;  %v4382_v49 = vadd.f32 %v5987_v3, %v7377_v42  ;;  %v4672_v52 = vmul.f32 %v4371_v43, %v4371_v43 }
 0x4db   : > { %v4373_v17 = vpop.f32.mrf.mxu1 }
 0x4dc   : > { %v4599_v20 = vadd.f32 %v4598_v7, %v4371_v43  ;;  %v4734_v30 = vadd.f32 %v4733_v23, %v4671_v10  ;;  %4538 = vst [vmem:[#allocation3 + $0x188] sm:$0xff] %v4382_v49  ;;  %v4374_v21 = vadd.f32 %v7377_v42, %v4373_v17  ;;  %v4675_v56 = vmul.f32 %v4382_v49, %v4382_v49  ;;  %v4547_v17 = vld [vmem:[#allocation4] sm:$0x1] }
 0x4dd   : > { %v5990_v1 = vpop.f32.mrf.mxu1 }
 0x4de   : > { %v4735_v53 = vadd.f32 %v4734_v30, %v4672_v52  ;;  %4536 = vst [vmem:[#allocation3 + $0xc0] sm:$0xff] %v4374_v21  ;;  %v4600_v63 = vadd.f32 %v4599_v20, %v4374_v21  ;;  %v4673_v27 = vmul.f32 %v4374_v21, %v4374_v21  ;;  %v4395_v14 = vadd.f32 %v5990_v1, %v7377_v42  ;;  %v4619_v30 = vld [vmem:[#allocation4 + $0x1] sm:$0x1] }
 0x4df   : > { %v4386_v59 = vpop.f32.mrf.mxu1 }
 0x4e0   : > { %v4601_v38 = vadd.f32 %v4600_v63, %v4379_v47  ;;  %v4736_v9 = vadd.f32 %v4735_v53, %v4673_v27  ;;  %4541 = vst [vmem:[#allocation3 + $0xf0] sm:$0xff] %v4395_v14  ;;  %v4387_v60 = vadd.f32 %v7377_v42, %v4386_v59  ;;  %v4678_v31 = vmul.f32 %v4395_v14, %v4395_v14 }
 0x4e1   : > { %v5991_v25 = vpop.f32.mrf.mxu1 }
 0x4e2   : > { %v4737_v61 = vadd.f32 %v4736_v9, %v4674_v41  ;;  %4539 = vst [vmem:[#allocation3 + $0x1b0] sm:$0xff] %v4387_v60  ;;  %v4602_v32 = vadd.f32 %v4601_v38, %v4382_v49  ;;  %v4398_v5 = vadd.f32 %v5991_v25, %v7377_v42  ;;  %v4676_v4 = vmul.f32 %v4387_v60, %v4387_v60 }
 0x4e3   : > { %v4389_v19 = vpop.f32.mrf.mxu1 }
 0x4e4   : > { %v4603_v45 = vadd.f32 %v4602_v32, %v4387_v60  ;;  %v4738_v37 = vadd.f32 %v4737_v61, %v4675_v56  ;;  %4542 = vst [vmem:[#allocation3 + $0x128] sm:$0xff] %v4398_v5  ;;  %v4390_v36 = vadd.f32 %v7377_v42, %v4389_v19  ;;  %v4679_v33 = vmul.f32 %v4398_v5, %v4398_v5 }
 0x4e5   : > { %v5994_v29 = vpop.f32.mrf.mxu1 }
 0x4e6   : > { %v4739_v6 = vadd.f32 %v4738_v37, %v4676_v4  ;;  %4540 = vst [vmem:[#allocation3 + $0x18] sm:$0xff] %v4390_v36  ;;  %v4604_v57 = vadd.f32 %v4603_v45, %v4390_v36  ;;  %v4677_v12 = vmul.f32 %v4390_v36, %v4390_v36  ;;  %v4411_v0 = vadd.f32 %v5994_v29, %v7377_v42 }
 0x4e7   : > { %v4402_v44 = vpop.f32.mrf.mxu1 }
 0x4e8   : > { %v4605_v13 = vadd.f32 %v4604_v57, %v4395_v14  ;;  %v4740_v15 = vadd.f32 %v4739_v6, %v4677_v12  ;;  %4545 = vst [vmem:[#allocation3 + $0x1d0] sm:$0xff] %v4411_v0  ;;  %v4403_v8 = vadd.f32 %v7377_v42, %v4402_v44  ;;  %v4682_v11 = vmul.f32 %v4411_v0, %v4411_v0 }
 0x4e9   : > { %v5995_v54 = vpop.f32.mrf.mxu1 }
 0x4ea   : > { %v4741_v2 = vadd.f32 %v4740_v15, %v4678_v31  ;;  %4543 = vst [vmem:[#allocation3 + $0x1f8] sm:$0xff] %v4403_v8  ;;  %v4606_v39 = vadd.f32 %v4605_v13, %v4398_v5  ;;  %v4414_v46 = vadd.f32 %v5995_v54, %v7377_v42  ;;  %v4680_v18 = vmul.f32 %v4403_v8, %v4403_v8 }
 0x4eb   : > { %v4405_v26 = vpop.f32.mrf.mxu1 }
 0x4ec   : > { %v4607_v51 = vadd.f32 %v4606_v39, %v4403_v8  ;;  %v4742_v22 = vadd.f32 %v4741_v2, %v4679_v33  ;;  %4546 = vst [vmem:[#allocation3 + $0x118] sm:$0xff] %v4414_v46  ;;  %v4406_v28 = vadd.f32 %v7377_v42, %v4405_v26  ;;  %v4683_v55 = vmul.f32 %v4414_v46, %v4414_v46 }
 0x4ee   : > { %v4743_v58 = vadd.f32 %v4742_v22, %v4680_v18  ;;  %4544 = vst [vmem:[#allocation3 + $0x170] sm:$0xff] %v4406_v28  ;;  %v4608_v35 = vadd.f32 %v4607_v51, %v4406_v28  ;;  %v4681_v62 = vmul.f32 %v4406_v28, %v4406_v28 }
 0x4f0   : > { %v4609_v34 = vadd.f32 %v4608_v35, %v4411_v0  ;;  %v4744_v16 = vadd.f32 %v4743_v58, %v4681_v62 }
 0x4f2   : > { %v4610_v47 = vadd.f32 %v4609_v34, %v4414_v46  ;;  %v4745_v48 = vadd.f32 %v4744_v16, %v4682_v11 }
 0x4f4   : > { %v4611_v24 = vrot.slane %v4610_v47, 4  ;;  %v4746_v40 = vadd.f32 %v4745_v48, %v4683_v55 }
 0x4f6   : > { %v4612_v50 = vadd.f32 %v4611_v24, %v4610_v47  ;;  %v4747_v43 = vrot.slane %v4746_v40, 4 }
 0x4f8   : > { %v4613_v3 = vrot.slane %v4612_v50, 2  ;;  %v4748_v10 = vadd.f32 %v4747_v43, %v4746_v40 }
 0x4fa   : > { %v4614_v23 = vadd.f32 %v4613_v3, %v4612_v50  ;;  %v4749_v7 = vrot.slane %v4748_v10, 2 }
 0x4fc   : > { %v4615_v49 = vrot.slane %v4614_v23, 1  ;;  %v4750_v42 = vadd.f32 %v4749_v7, %v4748_v10 }
 0x4fe   : > { %v4616_v20 = vadd.f32 %v4615_v49, %v4614_v23  ;;  %v4751_v52 = vrot.slane %v4750_v42, 1 }
 0x500   : > { %v4617_v21 = vadd.f32 %v4616_v20, %v4547_v17  ;;  %v4752_v1 = vadd.f32 %v4751_v52, %v4750_v42 }
 0x502   : > { %4618 = vst [vmem:[#allocation4] sm:$0x1] %v4617_v21  ;;  %v4753_v53 = vadd.f32 %v4752_v1, %v4619_v30 }
 0x504   : > { %4754 = vst [vmem:[#allocation4 + $0x1] sm:$0x1] %v4753_v53 }
 0x505 PF: > { %p5535_p3 = scmp.ne.s32.totalorder %s6588_s15, 1 }
 0x507   : > { %4758 = sbr.rel (%p5535_p3) target bundleno = 1380 (0x564), region = 64 }
 0x50c   : > { %v4761_v63 = vld [vmem:[#allocation4] sm:$0x1]  ;;  %v4763_v14 = vld [vmem:[#allocation4 + $0x1] sm:$0x1]  ;;  %v4903_v25 = vlaneseq  ;;  %v4759_v61 = vld [vmem:[#allocation11 + $0x3] sm:$0x1] }
 0x50d   : > { %v4762_v27 = vmul.f32 0.001953125, %v4761_v63  ;;  %v4764_v59 = vmul.f32 0.001953125, %v4763_v14  ;;  %v4760_v19 = vld [vmem:[#allocation11 + $0x4] sm:$0x1]  ;;  %v4774_v4 = vld [vmem:[#allocation3 + $0x68] sm:$0xff]  ;;  %v4775_v37 = vld [vmem:[#allocation3 + $0x150] sm:$0xff] }
 0x50e   : > { %v4904_v56 = vshrl.u32 %v4903_v25, 7  ;;  %v4776_v36 = vld [vmem:[#allocation3 + $0x70] sm:$0xff]  ;;  %v4777_v29 = vld [vmem:[#allocation3 + $0x160] sm:$0xff]  ;;  %v4779_v0 = vld [vmem:[#allocation3 + $0xd8] sm:$0xff] }
 0x50f   : > { %v4765_v41 = vmul.f32 %v4762_v27, %v4762_v27  ;;  %v4778_v6 = vld [vmem:[#allocation3 + $0xd0] sm:$0xff]  ;;  %v4780_v44 = vld [vmem:[#allocation3 + $0x1e0] sm:$0xff]  ;;  %v4782_v13 = vld [vmem:[#allocation3 + $0x148] sm:$0xff] }
 0x510   : > { %v4905_v32 = vsub.s32 0, %v4904_v56  ;;  %v4781_v31 = vld [vmem:[#allocation3 + $0x30] sm:$0xff]  ;;  %v4787_v51 = vld [vmem:[#allocation3 + $0x8] sm:$0xff]  ;;  %v4841_v47 = vld [vmem:[#allocation2 + $0xd8] sm:$0xff] }
 0x511   : > { %v4766_v38 = vsub.f32 %v4764_v59, %v4765_v41  ;;  %v4783_v15 = vld [vmem:[#allocation3 + $0x50] sm:$0xff]  ;;  %v4842_v48 = vld [vmem:[#allocation2 + $0x18] sm:$0xff]  ;;  %v4844_v42 = vld [vmem:[#allocation2 + $0x168] sm:$0xff] }
 0x512   : > { %v4784_v8 = vld [vmem:[#allocation3 + $0x1f0] sm:$0xff]  ;;  %v4846_v20 = vld [vmem:[#allocation2 + $0x48] sm:$0xff]  ;;  %v4847_v53 = vld [vmem:[#allocation2 + $0x180] sm:$0xff] }
 0x513   : > { %v4767_v9 = vmax.f32 %v4766_v38, 0.0  ;;  %v4785_v46 = vld [vmem:[#allocation3 + $0x130] sm:$0xff]  ;;  %v4788_v38 = vld [vmem:[#allocation3 + $0x88] sm:$0xff] }
 0x514   : > { %v4786_v26 = vld [vmem:[#allocation3 + $0x190] sm:$0xff] }
 0x515   : > { %v4768_v60 = vadd.f32 1e-05, %v4767_v9  ;;  %v4839_v35 = vld [vmem:[#allocation2 + $0xb0] sm:$0xff]  ;;  %v4789_v9 = vld [vmem:[#allocation3 + $0x38] sm:$0xff] }
 0x516   : > { %v4840_v11 = vld [vmem:[#allocation2 + $0x1b0] sm:$0xff] }
 0x517   : > { %6428 = vrsqrt.f32 %v4768_v60  ;;  %v4843_v24 = vld [vmem:[#allocation2 + $0x50] sm:$0xff] }
 0x518   : > { %v4845_v17 = vld [vmem:[#allocation2 + $0x130] sm:$0xff] }
 0x519   : > { %v4848_v41 = vld [vmem:[#allocation2 + $0x110] sm:$0xff] }
 0x524   : > { %v6429_v5 = vpop.eup %6428 }
 0x525   : > { %v4770_v45 = vmul.f32 %v6429_v5, %v4759_v61  ;;  %v4850_v5 = vld [vmem:[#allocation2 + $0x98] sm:$0xff] }
 0x527   : > { %v4771_v57 = vmul.f32 %v4770_v45, %v4762_v27  ;;  %v7444_v12 = vrot.slane %v4770_v45, %v4905_v32 }
 0x529   : > { %v4772_v54 = vsub.f32 %v4760_v19, %v4771_v57  ;;  %v4907_v33 = vmul.f32 %v7444_v12, %v4774_v4  ;;  %v4908_v2 = vmul.f32 %v7444_v12, %v4775_v37  ;;  %v4909_v39 = vmul.f32 %v7444_v12, %v4776_v36  ;;  %v4851_v19 = vld [vmem:[#allocation2 + $0x120] sm:$0xff] }
 0x52a   : > { %v4910_v18 = vmul.f32 %v7444_v12, %v4777_v29  ;;  %v4911_v22 = vmul.f32 %v7444_v12, %v4778_v6  ;;  %v4912_v28 = vmul.f32 %v7444_v12, %v4779_v0  ;;  %v4913_v58 = vmul.f32 %v7444_v12, %v4780_v44  ;;  %v4852_v29 = vld [vmem:[#allocation2 + $0x150] sm:$0xff]  ;;  %v4853_v6 = vld [vmem:[#allocation2 + $0x108] sm:$0xff]  ;;  %v4790_v57 = vld [vmem:[#allocation3 + $0xe0] sm:$0xff] }
 0x52b   : > { %v7453_v62 = vrot.slane %v4772_v54, %v4905_v32  ;;  %v4914_v34 = vmul.f32 %v7444_v12, %v4781_v31  ;;  %v4915_v16 = vmul.f32 %v7444_v12, %v4782_v13  ;;  %v4916_v55 = vmul.f32 %v7444_v12, %v4783_v15  ;;  %v4849_v32 = vld [vmem:[#allocation2 + $0x118] sm:$0xff]  ;;  %v4791_v15 = vld [vmem:[#allocation3 + $0x10] sm:$0xff]  ;;  %v4793_v54 = vld [vmem:[#allocation3 + $0xa0] sm:$0xff] }
 0x52c   : > { %v4917_v40 = vmul.f32 %v7444_v12, %v4784_v8  ;;  %v4918_v50 = vmul.f32 %v7444_v12, %v4785_v46  ;;  %v4919_v43 = vmul.f32 %v7444_v12, %v4786_v26  ;;  %v4920_v3 = vmul.f32 %v7444_v12, %v4787_v51  ;;  %v4792_v8 = vld [vmem:[#allocation3 + $0x1a8] sm:$0xff]  ;;  %v4854_v26 = vld [vmem:[#allocation2 + $0x60] sm:$0xff] }
 0x52d   : > { %v4975_v10 = vadd.f32 %v7453_v62, %v4907_v33  ;;  %v4976_v23 = vadd.f32 %v7453_v62, %v4908_v2  ;;  %v4977_v7 = vadd.f32 %v7453_v62, %v4909_v39  ;;  %v4978_v49 = vadd.f32 %v7453_v62, %v4910_v18  ;;  %v4794_v51 = vld [vmem:[#allocation3 + $0x1c0] sm:$0xff]  ;;  %v4795_v18 = vld [vmem:[#allocation3 + $0x78] sm:$0xff] }
 0x52e   : > { %v4979_v52 = vadd.f32 %v7453_v62, %v4911_v22  ;;  %v4980_v30 = vadd.f32 %v7453_v62, %v4912_v28  ;;  %v4981_v21 = vadd.f32 %v7453_v62, %v4913_v58  ;;  %v4982_v1 = vadd.f32 %v7453_v62, %v4914_v34 }
 0x52f   : > { %v5039_v63 = vadd.f32 %v4975_v10, %v4839_v35  ;;  %v5040_v27 = vadd.f32 %v4976_v23, %v4840_v11  ;;  %v5041_v14 = vadd.f32 %v4977_v7, %v4841_v47  ;;  %v5042_v59 = vadd.f32 %v4978_v49, %v4842_v48  ;;  %v4855_v11 = vld [vmem:[#allocation2 + $0xe0] sm:$0xff] }
 0x530   : > { %v5043_v60 = vadd.f32 %v4979_v52, %v4843_v24  ;;  %v5044_v25 = vadd.f32 %v4980_v30, %v4844_v42  ;;  %v5045_v56 = vadd.f32 %v4981_v21, %v4845_v17  ;;  %v5046_v61 = vadd.f32 %v4982_v1, %v4846_v20  ;;  %v4796_v24 = vld [vmem:[#allocation3 + $0x108] sm:$0xff]  ;;  %v4858_v10 = vld [vmem:[#allocation2 + $0x140] sm:$0xff]  ;;  %v4861_v21 = vld [vmem:[#allocation2 + $0x1b8] sm:$0xff] }
 0x531   : > { %5103 = vst [vmem:[#allocation13] sm:$0xff] %v5039_v63  ;;  %5104 = vst [vmem:[#allocation13 + $0x8] sm:$0xff] %v5040_v27  ;;  %v4983_v45 = vadd.f32 %v7453_v62, %v4915_v16  ;;  %v4984_v4 = vadd.f32 %v7453_v62, %v4916_v55  ;;  %v4985_v37 = vadd.f32 %v7453_v62, %v4917_v40  ;;  %v4856_v16 = vld [vmem:[#allocation2 + $0x188] sm:$0xff]  ;;  %v4797_v40 = vld [vmem:[#allocation3 + $0x80] sm:$0xff] }
 0x532   : > { %5105 = vst [vmem:[#allocation13 + $0x10] sm:$0xff] %v5041_v14  ;;  %5106 = vst [vmem:[#allocation13 + $0x18] sm:$0xff] %v5042_v59  ;;  %v4986_v36 = vadd.f32 %v7453_v62, %v4918_v50  ;;  %v4987_v0 = vadd.f32 %v7453_v62, %v4919_v43  ;;  %v4988_v44 = vadd.f32 %v7453_v62, %v4920_v3  ;;  %v4857_v3 = vld [vmem:[#allocation2 + $0x138] sm:$0xff]  ;;  %v4859_v23 = vld [vmem:[#allocation2 + $0x80] sm:$0xff] }
 0x533   : > { %5107 = vst [vmem:[#allocation13 + $0x20] sm:$0xff] %v5043_v60  ;;  %5108 = vst [vmem:[#allocation13 + $0x28] sm:$0xff] %v5044_v25  ;;  %v4921_v31 = vmul.f32 %v7444_v12, %v4788_v38  ;;  %v4922_v13 = vmul.f32 %v7444_v12, %v4789_v9  ;;  %v5047_v33 = vadd.f32 %v4983_v45, %v4847_v53  ;;  %v4860_v30 = vld [vmem:[#allocation2 + $0x1a8] sm:$0xff]  ;;  %v4798_v1 = vld [vmem:[#allocation3 + $0x58] sm:$0xff] }
 0x534   : > { %5109 = vst [vmem:[#allocation13 + $0x30] sm:$0xff] %v5045_v56  ;;  %5110 = vst [vmem:[#allocation13 + $0x38] sm:$0xff] %v5046_v61  ;;  %v5048_v2 = vadd.f32 %v4984_v4, %v4848_v41  ;;  %v5049_v39 = vadd.f32 %v4985_v37, %v4849_v32  ;;  %v5050_v46 = vadd.f32 %v4986_v36, %v4850_v5  ;;  %v4799_v59 = vld [vmem:[#allocation3 + $0x48] sm:$0xff]  ;;  %v4800_v41 = vld [vmem:[#allocation3 + $0x40] sm:$0xff] }
 0x535   : > { %v5051_v22 = vadd.f32 %v4987_v0, %v4851_v19  ;;  %v5052_v28 = vadd.f32 %v4988_v44, %v4852_v29  ;;  %v4989_v58 = vadd.f32 %v7453_v62, %v4921_v31  ;;  %v4990_v35 = vadd.f32 %v7453_v62, %v4922_v13  ;;  %5111 = vst [vmem:[#allocation13 + $0x40] sm:$0xff] %v5047_v33  ;;  %v4801_v38 = vld [vmem:[#allocation3 + $0x1a0] sm:$0xff]  ;;  %v4862_v61 = vld [vmem:[#allocation2 + $0x28] sm:$0xff]  ;;  %v4802_v32 = vld [vmem:[#allocation3 + $0x198] sm:$0xff] }
 0x536   : > { %5112 = vst [vmem:[#allocation13 + $0x48] sm:$0xff] %v5048_v2  ;;  %5113 = vst [vmem:[#allocation13 + $0x50] sm:$0xff] %v5049_v39  ;;  %v4923_v34 = vmul.f32 %v7444_v12, %v4790_v57  ;;  %v4924_v55 = vmul.f32 %v7444_v12, %v4791_v15  ;;  %v4925_v47 = vmul.f32 %v7444_v12, %v4792_v8  ;;  %v4803_v5 = vld [vmem:[#allocation3 + $0xe8] sm:$0xff]  ;;  %v4805_v13 = vld [vmem:[#allocation3 + $0x158] sm:$0xff] }
 0x537   : > { %5114 = vst [vmem:[#allocation13 + $0x58] sm:$0xff] %v5050_v46  ;;  %v4926_v48 = vmul.f32 %v7444_v12, %v4793_v54  ;;  %5115 = vst [vmem:[#allocation13 + $0x60] sm:$0xff] %v5051_v22  ;;  %v5053_v50 = vadd.f32 %v4989_v58, %v4853_v6  ;;  %v5054_v43 = vadd.f32 %v4990_v35, %v4854_v26  ;;  %v4863_v36 = vld [vmem:[#allocation2 + $0x1e8] sm:$0xff]  ;;  %v4864_v6 = vld [vmem:[#allocation2 + $0xf8] sm:$0xff] }
 0x538   : > { %5116 = vst [vmem:[#allocation13 + $0x68] sm:$0xff] %v5052_v28  ;;  %v4927_v7 = vmul.f32 %v7444_v12, %v4794_v51  ;;  %v4928_v49 = vmul.f32 %v7444_v12, %v4795_v18  ;;  %v4991_v42 = vadd.f32 %v7453_v62, %v4923_v34  ;;  %v4992_v17 = vadd.f32 %v7453_v62, %v4924_v55  ;;  %v4804_v31 = vld [vmem:[#allocation3 + $0x168] sm:$0xff]  ;;  %v4865_v54 = vld [vmem:[#allocation2 + $0x160] sm:$0xff]  ;;  %v4866_v33 = vld [vmem:[#allocation2 + $0x30] sm:$0xff] }
 0x539   : > { %v4993_v20 = vadd.f32 %v7453_v62, %v4925_v47  ;;  %v4994_v52 = vadd.f32 %v7453_v62, %v4926_v48  ;;  %5117 = vst [vmem:[#allocation13 + $0x70] sm:$0xff] %v5053_v50  ;;  %5118 = vst [vmem:[#allocation13 + $0x78] sm:$0xff] %v5054_v43  ;;  %v4929_v27 = vmul.f32 %v7444_v12, %v4796_v24  ;;  %v4867_v2 = vld [vmem:[#allocation2 + $0x1e0] sm:$0xff]  ;;  %v4869_v58 = vld [vmem:[#allocation2 + $0xf0] sm:$0xff] }
 0x53a   : > { %v4995_v53 = vadd.f32 %v7453_v62, %v4927_v7  ;;  %v4996_v63 = vadd.f32 %v7453_v62, %v4928_v49  ;;  %v4930_v14 = vmul.f32 %v7444_v12, %v4797_v40  ;;  %v5055_v9 = vadd.f32 %v4991_v42, %v4855_v11  ;;  %v4868_v28 = vld [vmem:[#allocation2] sm:$0xff]  ;;  %v4806_v35 = vld [vmem:[#allocation3 + $0x1d8] sm:$0xff]  ;;  %v4807_v47 = vld [vmem:[#allocation3 + $0x28] sm:$0xff] }
 0x53b   : > { %v5056_v60 = vadd.f32 %v4992_v17, %v4856_v16  ;;  %v5057_v25 = vadd.f32 %v4993_v20, %v4857_v3  ;;  %v5058_v56 = vadd.f32 %v4994_v52, %v4858_v10  ;;  %v4997_v4 = vadd.f32 %v7453_v62, %v4929_v27  ;;  %v4808_v48 = vld [vmem:[#allocation3] sm:$0xff]  ;;  %v4809_v24 = vld [vmem:[#allocation3 + $0x1c8] sm:$0xff] }
 0x53c   : > { %v5059_v19 = vadd.f32 %v4995_v53, %v4859_v23  ;;  %v5060_v45 = vadd.f32 %v4996_v63, %v4860_v30  ;;  %v4998_v37 = vadd.f32 %v7453_v62, %v4930_v14  ;;  %5119 = vst [vmem:[#allocation13 + $0x80] sm:$0xff] %v5055_v9  ;;  %v4931_v29 = vmul.f32 %v7444_v12, %v4798_v1  ;;  %v4870_v10 = vld [vmem:[#allocation2 + $0x8] sm:$0xff]  ;;  %v4811_v7 = vld [vmem:[#allocation3 + $0x140] sm:$0xff]  ;;  %v4813_v14 = vld [vmem:[#allocation3 + $0x98] sm:$0xff] }
 0x53d   : > { %5120 = vst [vmem:[#allocation13 + $0x88] sm:$0xff] %v5056_v60  ;;  %5121 = vst [vmem:[#allocation13 + $0x90] sm:$0xff] %v5057_v25  ;;  %v4932_v57 = vmul.f32 %v7444_v12, %v4799_v59  ;;  %v4933_v0 = vmul.f32 %v7444_v12, %v4800_v41  ;;  %v4934_v44 = vmul.f32 %v7444_v12, %v4801_v38  ;;  %v4810_v23 = vld [vmem:[#allocation3 + $0x1e8] sm:$0xff]  ;;  %v4812_v27 = vld [vmem:[#allocation3 + $0x60] sm:$0xff] }
 0x53e   : > { %5122 = vst [vmem:[#allocation13 + $0x98] sm:$0xff] %v5058_v56  ;;  %5123 = vst [vmem:[#allocation13 + $0xa0] sm:$0xff] %v5059_v19  ;;  %v5061_v15 = vadd.f32 %v4997_v4, %v4861_v21  ;;  %v5062_v8 = vadd.f32 %v4998_v37, %v4862_v61  ;;  %v4935_v39 = vmul.f32 %v7444_v12, %v4802_v32  ;;  %v4871_v52 = vld [vmem:[#allocation2 + $0x148] sm:$0xff]  ;;  %v4872_v21 = vld [vmem:[#allocation2 + $0x1d0] sm:$0xff] }
 0x53f   : > { %5124 = vst [vmem:[#allocation13 + $0xa8] sm:$0xff] %v5060_v45  ;;  %v4936_v46 = vmul.f32 %v7444_v12, %v4803_v5  ;;  %v4999_v26 = vadd.f32 %v7453_v62, %v4931_v29  ;;  %v5000_v51 = vadd.f32 %v7453_v62, %v4932_v57  ;;  %v5001_v18 = vadd.f32 %v7453_v62, %v4933_v0  ;;  %v4873_v38 = vld [vmem:[#allocation2 + $0x100] sm:$0xff]  ;;  %v4874_v9 = vld [vmem:[#allocation2 + $0xc8] sm:$0xff]  ;;  %v4876_v45 = vld [vmem:[#allocation2 + $0x1f8] sm:$0xff] }
 0x540   : > { %v5002_v22 = vadd.f32 %v7453_v62, %v4934_v44  ;;  %5125 = vst [vmem:[#allocation13 + $0xb0] sm:$0xff] %v5061_v15  ;;  %5126 = vst [vmem:[#allocation13 + $0xb8] sm:$0xff] %v5062_v8  ;;  %v5003_v11 = vadd.f32 %v7453_v62, %v4935_v39  ;;  %v4937_v16 = vmul.f32 %v7444_v12, %v4804_v31  ;;  %v4875_v60 = vld [vmem:[#allocation2 + $0x40] sm:$0xff]  ;;  %v4814_v37 = vld [vmem:[#allocation3 + $0x1b8] sm:$0xff] }
 0x541   : > { %v5004_v34 = vadd.f32 %v7453_v62, %v4936_v46  ;;  %v4938_v55 = vmul.f32 %v7444_v12, %v4805_v13  ;;  %v5063_v40 = vadd.f32 %v4999_v26, %v4863_v36  ;;  %v5064_v50 = vadd.f32 %v5000_v51, %v4864_v6  ;;  %v4877_v4 = vld [vmem:[#allocation2 + $0x20] sm:$0xff]  ;;  %v4816_v44 = vld [vmem:[#allocation3 + $0xc8] sm:$0xff]  ;;  %v4817_v31 = vld [vmem:[#allocation3 + $0xf8] sm:$0xff] }
 0x542   : > { %v5065_v43 = vadd.f32 %v5001_v18, %v4865_v54  ;;  %v5066_v3 = vadd.f32 %v5002_v22, %v4866_v33  ;;  %v5067_v49 = vadd.f32 %v5003_v11, %v4867_v2  ;;  %v5005_v17 = vadd.f32 %v7453_v62, %v4937_v16  ;;  %v4815_v0 = vld [vmem:[#allocation3 + $0x100] sm:$0xff]  ;;  %v4878_v33 = vld [vmem:[#allocation2 + $0x128] sm:$0xff]  ;;  %v4818_v2 = vld [vmem:[#allocation3 + $0x178] sm:$0xff] }
 0x543   : > { %v5068_v42 = vadd.f32 %v5004_v34, %v4868_v28  ;;  %v5006_v20 = vadd.f32 %v7453_v62, %v4938_v55  ;;  %5127 = vst [vmem:[#allocation13 + $0xc0] sm:$0xff] %v5063_v40  ;;  %5128 = vst [vmem:[#allocation13 + $0xc8] sm:$0xff] %v5064_v50  ;;  %v4939_v30 = vmul.f32 %v7444_v12, %v4806_v35  ;;  %v4819_v39 = vld [vmem:[#allocation3 + $0x180] sm:$0xff]  ;;  %v4820_v16 = vld [vmem:[#allocation3 + $0xb0] sm:$0xff] }
 0x544   : > { %5129 = vst [vmem:[#allocation13 + $0xd0] sm:$0xff] %v5065_v43  ;;  %5130 = vst [vmem:[#allocation13 + $0xd8] sm:$0xff] %v5066_v3  ;;  %v4940_v1 = vmul.f32 %v7444_v12, %v4807_v47  ;;  %v4941_v53 = vmul.f32 %v7444_v12, %v4808_v48  ;;  %v4942_v63 = vmul.f32 %v7444_v12, %v4809_v24  ;;  %v4879_v22 = vld [vmem:[#allocation2 + $0x1a0] sm:$0xff]  ;;  %v4821_v55 = vld [vmem:[#allocation3 + $0x110] sm:$0xff] }
 0x545   : > { %5131 = vst [vmem:[#allocation13 + $0xe0] sm:$0xff] %v5067_v49  ;;  %5132 = vst [vmem:[#allocation13 + $0xe8] sm:$0xff] %v5068_v42  ;;  %v5069_v59 = vadd.f32 %v5005_v17, %v4869_v58  ;;  %v5070_v41 = vadd.f32 %v5006_v20, %v4870_v10  ;;  %v4943_v25 = vmul.f32 %v7444_v12, %v4810_v23  ;;  %v4880_v58 = vld [vmem:[#allocation2 + $0x1f0] sm:$0xff]  ;;  %v4881_v24 = vld [vmem:[#allocation2 + $0xe8] sm:$0xff] }
 0x546   : > { %v4944_v56 = vmul.f32 %v7444_v12, %v4811_v7  ;;  %v5007_v61 = vadd.f32 %v7453_v62, %v4939_v30  ;;  %v5008_v32 = vadd.f32 %v7453_v62, %v4940_v1  ;;  %v5009_v5 = vadd.f32 %v7453_v62, %v4941_v53  ;;  %v4882_v40 = vld [vmem:[#allocation2 + $0x78] sm:$0xff]  ;;  %v4883_v50 = vld [vmem:[#allocation2 + $0x70] sm:$0xff]  ;;  %v4822_v20 = vld [vmem:[#allocation3 + $0x20] sm:$0xff] }
 0x547   : > { %v5010_v19 = vadd.f32 %v7453_v62, %v4942_v63  ;;  %5133 = vst [vmem:[#allocation13 + $0xf0] sm:$0xff] %v5069_v59  ;;  %5134 = vst [vmem:[#allocation13 + $0xf8] sm:$0xff] %v5070_v41  ;;  %v5011_v36 = vadd.f32 %v7453_v62, %v4943_v25  ;;  %v4945_v6 = vmul.f32 %v7444_v12, %v4812_v27  ;;  %v4884_v42 = vld [vmem:[#allocation2 + $0x90] sm:$0xff]  ;;  %v4885_v17 = vld [vmem:[#allocation2 + $0x1d8] sm:$0xff] }
 0x548   : > { %v5012_v29 = vadd.f32 %v7453_v62, %v4944_v56  ;;  %v4946_v57 = vmul.f32 %v7444_v12, %v4813_v14  ;;  %v5071_v13 = vadd.f32 %v5007_v61, %v4871_v52  ;;  %v5072_v15 = vadd.f32 %v5008_v32, %v4872_v21  ;;  %v4823_v53 = vld [vmem:[#allocation3 + $0xb8] sm:$0xff]  ;;  %v4824_v63 = vld [vmem:[#allocation3 + $0x120] sm:$0xff]  ;;  %v4825_v27 = vld [vmem:[#allocation3 + $0x90] sm:$0xff] }
 0x549   : > { %v5073_v8 = vadd.f32 %v5009_v5, %v4873_v38  ;;  %v5074_v54 = vadd.f32 %v5010_v19, %v4874_v9  ;;  %v5075_v46 = vadd.f32 %v5011_v36, %v4875_v60  ;;  %v5013_v51 = vadd.f32 %v7453_v62, %v4945_v6  ;;  %v4886_v9 = vld [vmem:[#allocation2 + $0xd0] sm:$0xff]  ;;  %v4826_v60 = vld [vmem:[#allocation3 + $0xa8] sm:$0xff]  ;;  %v4827_v25 = vld [vmem:[#allocation3 + $0xc0] sm:$0xff] }
 0x54a   : > { %v5076_v26 = vadd.f32 %v5012_v29, %v4876_v45  ;;  %v5014_v18 = vadd.f32 %v7453_v62, %v4946_v57  ;;  %5135 = vst [vmem:[#allocation13 + $0x100] sm:$0xff] %v5071_v13  ;;  %5136 = vst [vmem:[#allocation13 + $0x108] sm:$0xff] %v5072_v15  ;;  %v4947_v28 = vmul.f32 %v7444_v12, %v4814_v37  ;;  %v4887_v19 = vld [vmem:[#allocation2 + $0xb8] sm:$0xff]  ;;  %v4829_v57 = vld [vmem:[#allocation3 + $0x188] sm:$0xff] }
 0x54b   : > { %5137 = vst [vmem:[#allocation13 + $0x110] sm:$0xff] %v5073_v8  ;;  %5138 = vst [vmem:[#allocation13 + $0x118] sm:$0xff] %v5074_v54  ;;  %v4948_v35 = vmul.f32 %v7444_v12, %v4815_v0  ;;  %v4949_v11 = vmul.f32 %v7444_v12, %v4816_v44  ;;  %v4950_v34 = vmul.f32 %v7444_v12, %v4817_v31  ;;  %v4828_v6 = vld [vmem:[#allocation3 + $0x138] sm:$0xff]  ;;  %v4889_v31 = vld [vmem:[#allocation2 + $0xa8] sm:$0xff] }
 0x54c   : > { %5139 = vst [vmem:[#allocation13 + $0x120] sm:$0xff] %v5075_v46  ;;  %5140 = vst [vmem:[#allocation13 + $0x128] sm:$0xff] %v5076_v26  ;;  %v5077_v47 = vadd.f32 %v5013_v51, %v4877_v4  ;;  %v5078_v48 = vadd.f32 %v5014_v18, %v4878_v33  ;;  %v4951_v43 = vmul.f32 %v7444_v12, %v4818_v2  ;;  %v4888_v4 = vld [vmem:[#allocation2 + $0x88] sm:$0xff]  ;;  %v4891_v15 = vld [vmem:[#allocation2 + $0x170] sm:$0xff] }
 0x54d   : > { %v4952_v3 = vmul.f32 %v7444_v12, %v4819_v39  ;;  %v5015_v10 = vadd.f32 %v7453_v62, %v4947_v28  ;;  %v5016_v23 = vadd.f32 %v7453_v62, %v4948_v35  ;;  %v5017_v7 = vadd.f32 %v7453_v62, %v4949_v11  ;;  %v4890_v13 = vld [vmem:[#allocation2 + $0x1c8] sm:$0xff]  ;;  %v4892_v26 = vld [vmem:[#allocation2 + $0x178] sm:$0xff]  ;;  %v4830_v18 = vld [vmem:[#allocation3 + $0x1b0] sm:$0xff] }
 0x54e   : > { %v5018_v49 = vadd.f32 %v7453_v62, %v4950_v34  ;;  %5141 = vst [vmem:[#allocation13 + $0x130] sm:$0xff] %v5077_v47  ;;  %5142 = vst [vmem:[#allocation13 + $0x138] sm:$0xff] %v5078_v48  ;;  %v5019_v52 = vadd.f32 %v7453_v62, %v4951_v43  ;;  %v4953_v21 = vmul.f32 %v7444_v12, %v4820_v16  ;;  %v4893_v51 = vld [vmem:[#allocation2 + $0x68] sm:$0xff]  ;;  %v4831_v11 = vld [vmem:[#allocation3 + $0x18] sm:$0xff] }
 0x54f   : > { %v5020_v30 = vadd.f32 %v7453_v62, %v4952_v3  ;;  %v4954_v1 = vmul.f32 %v7444_v12, %v4821_v55  ;;  %v5079_v14 = vadd.f32 %v5015_v10, %v4879_v22  ;;  %v5080_v59 = vadd.f32 %v5016_v23, %v4880_v58  ;;  %v4832_v34 = vld [vmem:[#allocation3 + $0xf0] sm:$0xff]  ;;  %v4833_v16 = vld [vmem:[#allocation3 + $0x128] sm:$0xff] }
 0x550   : > { %v5081_v41 = vadd.f32 %v5017_v7, %v4881_v24  ;;  %v5082_v38 = vadd.f32 %v5018_v49, %v4882_v40  ;;  %v5083_v56 = vadd.f32 %v5019_v52, %v4883_v50  ;;  %v5021_v32 = vadd.f32 %v7453_v62, %v4953_v21  ;;  %v4894_v40 = vld [vmem:[#allocation2 + $0x190] sm:$0xff]  ;;  %v4834_v50 = vld [vmem:[#allocation3 + $0x1f8] sm:$0xff] }
 0x551   : > { %v5084_v61 = vadd.f32 %v5020_v30, %v4884_v42  ;;  %v5022_v5 = vadd.f32 %v7453_v62, %v4954_v1  ;;  %5143 = vst [vmem:[#allocation13 + $0x140] sm:$0xff] %v5079_v14  ;;  %5144 = vst [vmem:[#allocation13 + $0x148] sm:$0xff] %v5080_v59  ;;  %v4955_v45 = vmul.f32 %v7444_v12, %v4822_v20  ;;  %v4835_v43 = vld [vmem:[#allocation3 + $0x170] sm:$0xff]  ;;  %v4895_v49 = vld [vmem:[#allocation2 + $0x198] sm:$0xff] }
 0x552   : > { %5145 = vst [vmem:[#allocation13 + $0x150] sm:$0xff] %v5081_v41  ;;  %5146 = vst [vmem:[#allocation13 + $0x158] sm:$0xff] %v5082_v38  ;;  %v4956_v37 = vmul.f32 %v7444_v12, %v4823_v53  ;;  %v4957_v36 = vmul.f32 %v7444_v12, %v4824_v63  ;;  %v4958_v29 = vmul.f32 %v7444_v12, %v4825_v27  ;;  %v4836_v30 = vld [vmem:[#allocation3 + $0x1d0] sm:$0xff]  ;;  %v4837_v21 = vld [vmem:[#allocation3 + $0x118] sm:$0xff] }
 0x553   : > { %5147 = vst [vmem:[#allocation13 + $0x160] sm:$0xff] %v5083_v56  ;;  %5148 = vst [vmem:[#allocation13 + $0x168] sm:$0xff] %v5084_v61  ;;  %v5085_v0 = vadd.f32 %v5021_v32, %v4885_v17  ;;  %v5086_v44 = vadd.f32 %v5022_v5, %v4886_v9  ;;  %v4959_v8 = vmul.f32 %v7444_v12, %v4826_v60  ;;  %v4896_v63 = vld [vmem:[#allocation2 + $0x38] sm:$0xff]  ;;  %v4897_v27 = vld [vmem:[#allocation2 + $0xc0] sm:$0xff] }
 0x554   : > { %v4960_v54 = vmul.f32 %v7444_v12, %v4827_v25  ;;  %v5023_v33 = vadd.f32 %v7453_v62, %v4955_v45  ;;  %v5024_v2 = vadd.f32 %v7453_v62, %v4956_v37  ;;  %v5025_v39 = vadd.f32 %v7453_v62, %v4957_v36  ;;  %v4898_v14 = vld [vmem:[#allocation2 + $0x1c0] sm:$0xff]  ;;  %v4899_v56 = vld [vmem:[#allocation2 + $0x158] sm:$0xff]  ;;  %v4900_v61 = vld [vmem:[#allocation2 + $0x10] sm:$0xff] }
 0x555   : > { %v5026_v46 = vadd.f32 %v7453_v62, %v4958_v29  ;;  %5149 = vst [vmem:[#allocation13 + $0x170] sm:$0xff] %v5085_v0  ;;  %5150 = vst [vmem:[#allocation13 + $0x178] sm:$0xff] %v5086_v44  ;;  %v5027_v22 = vadd.f32 %v7453_v62, %v4959_v8  ;;  %v4961_v58 = vmul.f32 %v7444_v12, %v4828_v6  ;;  %v4901_v6 = vld [vmem:[#allocation2 + $0x58] sm:$0xff] }
 0x556   : > { %v5028_v28 = vadd.f32 %v7453_v62, %v4960_v54  ;;  %v4962_v35 = vmul.f32 %v7444_v12, %v4829_v57  ;;  %v5087_v55 = vadd.f32 %v5023_v33, %v4887_v19  ;;  %v5088_v47 = vadd.f32 %v5024_v2, %v4888_v4  ;;  %v4902_v57 = vld [vmem:[#allocation2 + $0xa0] sm:$0xff] }
 0x557   : > { %v5089_v48 = vadd.f32 %v5025_v39, %v4889_v31  ;;  %v5090_v24 = vadd.f32 %v5026_v46, %v4890_v13  ;;  %v5091_v3 = vadd.f32 %v5027_v22, %v4891_v15  ;;  %v5029_v23 = vadd.f32 %v7453_v62, %v4961_v58 }
 0x558   : > { %v5092_v10 = vadd.f32 %v5028_v28, %v4892_v26  ;;  %v5030_v7 = vadd.f32 %v7453_v62, %v4962_v35  ;;  %5151 = vst [vmem:[#allocation13 + $0x180] sm:$0xff] %v5087_v55  ;;  %5152 = vst [vmem:[#allocation13 + $0x188] sm:$0xff] %v5088_v47  ;;  %v4963_v42 = vmul.f32 %v7444_v12, %v4830_v18 }
 0x559   : > { %5153 = vst [vmem:[#allocation13 + $0x190] sm:$0xff] %v5089_v48  ;;  %5154 = vst [vmem:[#allocation13 + $0x198] sm:$0xff] %v5090_v24  ;;  %v4964_v17 = vmul.f32 %v7444_v12, %v4831_v11  ;;  %v4965_v20 = vmul.f32 %v7444_v12, %v4832_v34  ;;  %v4966_v52 = vmul.f32 %v7444_v12, %v4833_v16 }
 0x55a   : > { %5155 = vst [vmem:[#allocation13 + $0x1a0] sm:$0xff] %v5091_v3  ;;  %5156 = vst [vmem:[#allocation13 + $0x1a8] sm:$0xff] %v5092_v10  ;;  %v5093_v1 = vadd.f32 %v5029_v23, %v4893_v51  ;;  %v5094_v53 = vadd.f32 %v5030_v7, %v4894_v40  ;;  %v4967_v59 = vmul.f32 %v7444_v12, %v4834_v50 }
 0x55b   : > { %v4968_v41 = vmul.f32 %v7444_v12, %v4835_v43  ;;  %v5031_v38 = vadd.f32 %v7453_v62, %v4963_v42  ;;  %v5032_v9 = vadd.f32 %v7453_v62, %v4964_v17  ;;  %v5033_v60 = vadd.f32 %v7453_v62, %v4965_v20 }
 0x55c   : > { %v5034_v25 = vadd.f32 %v7453_v62, %v4966_v52  ;;  %5157 = vst [vmem:[#allocation13 + $0x1b0] sm:$0xff] %v5093_v1  ;;  %5158 = vst [vmem:[#allocation13 + $0x1b8] sm:$0xff] %v5094_v53  ;;  %v5035_v32 = vadd.f32 %v7453_v62, %v4967_v59  ;;  %v4969_v19 = vmul.f32 %v7444_v12, %v4836_v30 }
 0x55d   : > { %v5036_v5 = vadd.f32 %v7453_v62, %v4968_v41  ;;  %v4970_v45 = vmul.f32 %v7444_v12, %v4837_v21  ;;  %v5095_v4 = vadd.f32 %v5031_v38, %v4895_v49  ;;  %v5096_v37 = vadd.f32 %v5032_v9, %v4896_v63 }
 0x55e   : > { %v5097_v36 = vadd.f32 %v5033_v60, %v4897_v27  ;;  %v5098_v29 = vadd.f32 %v5034_v25, %v4898_v14  ;;  %v5099_v0 = vadd.f32 %v5035_v32, %v4899_v56  ;;  %v5037_v31 = vadd.f32 %v7453_v62, %v4969_v19 }
 0x55f   : > { %v5100_v44 = vadd.f32 %v5036_v5, %v4900_v61  ;;  %v5038_v13 = vadd.f32 %v7453_v62, %v4970_v45  ;;  %5159 = vst [vmem:[#allocation13 + $0x1c0] sm:$0xff] %v5095_v4  ;;  %5160 = vst [vmem:[#allocation13 + $0x1c8] sm:$0xff] %v5096_v37 }
 0x560   : > { %5161 = vst [vmem:[#allocation13 + $0x1d0] sm:$0xff] %v5097_v36  ;;  %5162 = vst [vmem:[#allocation13 + $0x1d8] sm:$0xff] %v5098_v29  ;;  %v5101_v15 = vadd.f32 %v5037_v31, %v4901_v6 }
 0x561   : > { %5163 = vst [vmem:[#allocation13 + $0x1e0] sm:$0xff] %v5099_v0  ;;  %5164 = vst [vmem:[#allocation13 + $0x1e8] sm:$0xff] %v5100_v44  ;;  %v5102_v12 = vadd.f32 %v5038_v13, %v4902_v57 }
 0x562   : > { %5165 = vst [vmem:[#allocation13 + $0x1f0] sm:$0xff] %v5101_v15 }
 0x563   : > { %5166 = vst [vmem:[#allocation13 + $0x1f8] sm:$0xff] %v5102_v12 }
 0x564 PF: > { %p7578_p0 = scmp.eq.s32.totalorder %s5302_s18, 1  ;;  %s6608_s21 = smov [#allocation13]  }
 0x565   : > { %s5182_s22 = sshll.u32 %s6608_s21, 4  ;;  %s5183_s22 = int_to_ptr.vmem [resolvable:$true] %s5182_s22 }
 0x566   : > { %s6534_s6 = scalar_lea.vmem %s5183_s22, 8192  ;;  %s6540_s7 = scalar_lea.vmem %s5183_s22, 16384 }
 0x567   : > { %p6535_p11 = scmp.ne.s32.totalorder %s5183_s22, %s6534_s6  ;;  %p6541_p6 = scmp.lt.s32.totalorder %s5183_s22, %s5183_s22 }
 0x568   : > { %p6542_p13 = scmp.lt.s32.totalorder %s6540_s7, %s6534_s6 }
 0x569   : > { %p6536_p12 = pnand %p6535_p11, %p7578_p0 }
 0x56a   : > { %p6543_p1 = por %p6542_p13, %p6541_p6 }
 0x56b   : > { %p6537_p8 = pneg %p6536_p12 }
 0x56d   : > { %p6544_p2 = pnand %p6543_p1, %p6537_p8 }
 0x56f   : > { %6547 = shalt.err (!%p6544_p2)
}
 0x570   : > { %s6609_s8 = smov 128   ;;  %s6610_s18 = smov 8  }
 0x571   : > { %6013 = dma.vmem_to_hbm [thread:$0]  (%p7578_p0), %s5183_s22, 8192, %s7606_s4, [#allocation7], %s6609_s8, %s6609_s8, %s6610_s18  }
 0x572 PF: > { %p6045_p5 = scmp.eq.s32.totalorder %s5303_s19, 1  ;;  %p7673_p10 = scmp.ge.s32.totalorder %s6596_s17, 2 }
 0x574   : > { %p6031_p7 = pnand %p6045_p5, %p7673_p10 }
 0x576   : > { %p6032_p9 = pneg %p6031_p7 }
 0x578   : > { %6583 = dma.done.wait (%p6032_p9), [#allocation7], 8192  }
 0x579   : > { %6585 = vsyncadd (%p6032_p9), [#allocation7], 4294959104  ;;  %s22_s17 = sadd.s32 1, %s6596_s17   ;;  %s7674_s15 = smov %s6592_s16 }
 0x57a   : > { %p19_p4 = scmp.ge.s32.totalorder %s22_s17, 4   ;;  %s7675_s16 = smov %s7677_s20 }
 0x57c   :  { %21 = sbr.rel (!%p19_p4) target bundleno = 7 (0x7), region = 112 }
 0x581   :  { %5203 = vsyncpa [#allocation6], 1 }
 0x582   :  { %5205 = vsyncpa [#allocation6 + $0x1], 1 }
 0x583   :  { %5206 = vsyncpa [#allocation9], 1 }
 0x584   :  { %5207 = vsyncpa [#allocation12], 1 }
 0x585   :  { %5208 = vsyncpa [#allocation7], 1 }
 0x586   :  { %5210 = vsyncpa [#allocation7 + $0x1], 1 }

</bundles_post_ra>
